<compile_context>
chip_gen: v6e
topology: v6e:2x2x1
jax: 0.10.0
libtpu: 0.0.40
codegen_flags: <defaults>
</compile_context>

<pallas_src>
import math
import functools

import jax
import jax.numpy as jnp
from jax import lax
from jax.experimental import pallas as pl
from jax.experimental.pallas import tpu as pltpu


_LANE = 128                 # pad Cout to this so stores are lane-dense (full vst)
_VMEM_BUDGET = 4 << 20      # per-tile working-set budget (safe for v7x 64 MiB VMEM)
_VMEM_LIMIT = 32 * 1024 * 1024


def _round_up(x, m):
    return (x + m - 1) // m * m


def _pick_row_tile(Ho, Wp, Cin, Cpad, budget_bytes=_VMEM_BUDGET):
    """Largest divisor of Ho whose strip working set fits the VMEM budget.

    Prefers tiles whose flattened row count (TH*Wp) is a multiple of 8 so the
    output BlockSpec stays sublane-aligned.
    """
    per_row = Wp * (Cin * 2 + Cpad * 4 * 3)   # bf16 strip + f32 acc + f32 y (w/ margin)
    max_th = max(1, budget_bytes // per_row)
    best, best_aligned = 1, None
    for d in range(1, Ho + 1):
        if Ho % d or d > max_th:
            continue
        best = d
        if (d * Wp) % 8 == 0:
            best_aligned = d
    return best_aligned if best_aligned is not None else best


# ----------------------------------------------------------------------------
# Pass 1: conv (K*K shifted matmuls) + BN partial statistics
# ----------------------------------------------------------------------------
def _conv_stats_kernel(xs_ref, w_ref, y_ref, ssum_ref, ssq_ref, *,
                       K, Wp, Wo, Cin, TH):
    # xs_ref  : (THp*Wp + K-1, Cin) bf16 — flattened (row-major) padded H-strip
    # w_ref   : (K*K*Cin, Cpad)     bf16 — lane-padded weight matrix
    # y_ref   : (TH*Wp, Cpad)       f32  — conv output (cols ow >= Wo are garbage)
    # ssum_ref: (1, Cpad)           f32  — per-tile sum over valid rows
    # ssq_ref : (1, Cpad)           f32  — per-tile sum of squares over valid rows
    M = TH * Wp
    acc = None
    for dy in range(K):
        for dx in range(K):
            off = dy * Wp + dx
            xm = xs_ref[off:off + M, :]                                # (M, Cin)
            wm = w_ref[(dy * K + dx) * Cin:(dy * K + dx + 1) * Cin, :]  # (Cin, Cpad)
            part = jnp.dot(xm, wm, preferred_element_type=jnp.float32)
            acc = part if acc is None else acc + part
    y_ref[...] = acc

    # Mask out the "wrap-around" columns (ow >= Wo) from the BN statistics.
    col = lax.broadcasted_iota(jnp.int32, (M, 1), 0) % Wp
    valid = (col < Wo).astype(jnp.float32)
    ssum_ref[...] = jnp.sum(acc * valid, axis=0, keepdims=True)
    ssq_ref[...] = jnp.sum((acc * acc) * valid, axis=0, keepdims=True)


# ----------------------------------------------------------------------------
# Pass 2: normalize + affine + ReLU (row-tiled)
# ----------------------------------------------------------------------------
def _bn_relu_kernel(y_ref, sc_ref, sh_ref, o_ref):
    y = y_ref[...] * sc_ref[...] + sh_ref[...]
    o_ref[...] = jnp.maximum(y, 0.0).astype(o_ref.dtype)


# ----------------------------------------------------------------------------
# One (Conv2d reflect-pad -> /scaling^2 -> BN(train) -> ReLU) block
# ----------------------------------------------------------------------------
def conv_bn_relu_block(x_nhwc, w, gamma, beta, *, scaling=1, eps=1e-5,
                       out_dtype=jnp.float32):
    """x_nhwc: (N, H, W, Cin); w: (Cout, Cin, K, K) (PyTorch OIHW).

    The conv bias is intentionally not used: a pre-BN per-channel bias is
    exactly cancelled by training-mode BN mean subtraction.  The /scaling^2 of
    scaling_layer is folded into BN eps (eps * scaling^4) — exact as well.
    Returns (N, Ho, Wo, Cout).
    """
    N, H, W, Cin = x_nhwc.shape
    Cout, _, K, _ = w.shape
    pad = math.ceil((K - 1) / 2)
    Ho = H + 2 * pad - K + 1
    Wo = W + 2 * pad - K + 1
    Wp = W + 2 * pad
    Cpad = _round_up(max(Cout, _LANE), _LANE)

    # Reflect pad + overlapping H-strips (halo of K-1 rows), flattened row-major.
    xp = jnp.pad(x_nhwc, ((0, 0), (pad, pad), (pad, pad), (0, 0)), mode="reflect")
    TH = _pick_row_tile(Ho, Wp, Cin, Cpad)
    T = Ho // TH
    THp = TH + K - 1
    strips = jnp.stack([xp[:, t * TH:t * TH + THp] for t in range(T)], axis=1)
    L = THp * Wp + (K - 1)          # +K-1 tail so shifted in-kernel slices stay in-bounds
    strips = strips.reshape(N, T, THp * Wp, Cin)
    strips = jnp.pad(strips, ((0, 0), (0, 0), (0, K - 1), (0, 0)))
    strips = strips.astype(jnp.bfloat16)                       # bf16 feed for the MXU

    # Weight matrix, row = (dy*K+dx)*Cin + ci, columns zero-padded to 128 lanes.
    w_mat = jnp.transpose(w, (2, 3, 1, 0)).reshape(K * K * Cin, Cout)
    w_mat = jnp.pad(w_mat, ((0, 0), (0, Cpad - Cout))).astype(jnp.bfloat16)

    Mtile = TH * Wp
    NT = N * T
    KKC = K * K * Cin

    cost1 = pl.CostEstimate(
        flops=2 * NT * Mtile * KKC * Cpad,
        transcendentals=0,
        bytes_accessed=int(strips.size) * 2 + int(w_mat.size) * 2
        + NT * Mtile * Cpad * 4 + NT * 2 * Cpad * 4)

    y_flat, ssum, ssq = pl.pallas_call(
        functools.partial(_conv_stats_kernel, K=K, Wp=Wp, Wo=Wo, Cin=Cin, TH=TH),
        grid=(N, T),
        in_specs=[
            pl.BlockSpec((None, None, L, Cin), lambda n, t: (n, t, 0, 0)),
            pl.BlockSpec((KKC, Cpad), lambda n, t: (0, 0)),
        ],
        out_specs=(
            pl.BlockSpec((Mtile, Cpad), lambda n, t: (n * T + t, 0)),
            pl.BlockSpec((None, 1, Cpad), lambda n, t: (n * T + t, 0, 0)),
            pl.BlockSpec((None, 1, Cpad), lambda n, t: (n * T + t, 0, 0)),
        ),
        out_shape=(
            jax.ShapeDtypeStruct((NT * Mtile, Cpad), jnp.float32),
            jax.ShapeDtypeStruct((NT, 1, Cpad), jnp.float32),
            jax.ShapeDtypeStruct((NT, 1, Cpad), jnp.float32),
        ),
        compiler_params=pltpu.CompilerParams(
            dimension_semantics=("parallel", "parallel"),
            vmem_limit_bytes=_VMEM_LIMIT),
        cost_estimate=cost1,
    )(strips, w_mat)

    # Global BN statistics from the per-tile partial sums (tiny reduction in XLA).
    count = float(N * Ho * Wo)
    mean = jnp.sum(ssum, axis=(0, 1)) / count                       # (Cpad,)
    var = jnp.maximum(jnp.sum(ssq, axis=(0, 1)) / count - mean * mean, 0.0)
    eps_eff = float(eps) * float(scaling) ** 4                      # exact /scaling^2 fold
    inv = lax.rsqrt(var + eps_eff)
    g = jnp.pad(gamma.astype(jnp.float32), (0, Cpad - Cout))
    b = jnp.pad(beta.astype(jnp.float32), (0, Cpad - Cout))
    scale = (g * inv).reshape(1, Cpad)
    shift = (b - g * inv * mean).reshape(1, Cpad)

    cost2 = pl.CostEstimate(
        flops=2 * NT * Mtile * Cpad,
        transcendentals=0,
        bytes_accessed=NT * Mtile * Cpad * (4 + jnp.dtype(out_dtype).itemsize)
        + 2 * Cpad * 4)

    out_flat = pl.pallas_call(
        _bn_relu_kernel,
        grid=(NT,),
        in_specs=[
            pl.BlockSpec((Mtile, Cpad), lambda i: (i, 0)),
            pl.BlockSpec((1, Cpad), lambda i: (0, 0)),
            pl.BlockSpec((1, Cpad), lambda i: (0, 0)),
        ],
        out_specs=pl.BlockSpec((Mtile, Cpad), lambda i: (i, 0)),
        out_shape=jax.ShapeDtypeStruct((NT * Mtile, Cpad), out_dtype),
        compiler_params=pltpu.CompilerParams(
            dimension_semantics=("parallel",),
            vmem_limit_bytes=_VMEM_LIMIT),
        cost_estimate=cost2,
    )(y_flat, scale, shift)

    out = out_flat.reshape(N, T, TH, Wp, Cpad)[:, :, :, :Wo, :Cout]
    return out.reshape(N, Ho, Wo, Cout)


# ----------------------------------------------------------------------------
# Glue: bilinear x2 upsample with align_corners=True (NHWC)
# ----------------------------------------------------------------------------
def _bilinear_up2_align_corners_nhwc(x):
    N, H, W, C = x.shape
    Ho, Wo = 2 * H, 2 * W

    def coords(out_size, in_size):
        if out_size == 1 or in_size == 1:
            src = jnp.zeros((out_size,), jnp.float32)
        else:
            src = jnp.arange(out_size, dtype=jnp.float32) * (
                (in_size - 1) / (out_size - 1))
        i0 = jnp.clip(jnp.floor(src).astype(jnp.int32), 0, in_size - 1)
        i1 = jnp.clip(i0 + 1, 0, in_size - 1)
        return i0, i1, src - i0.astype(jnp.float32)

    h0, h1, hf = coords(Ho, H)
    w0, w1, wf = coords(Wo, W)
    top = x[:, h0, :, :]
    bot = x[:, h1, :, :]
    xh = top + (bot - top) * hf[None, :, None, None]
    left = xh[:, :, w0, :]
    right = xh[:, :, w1, :]
    return left + (right - left) * wf[None, None, :, None]


# ----------------------------------------------------------------------------
# Up.forward
# ----------------------------------------------------------------------------
def up_forward(x1, x2, params, *, scaling=1):
    """x1, x2: NCHW float32. Returns NCHW float32 (like PyTorch Up.forward)."""
    # NCHW -> NHWC once at the boundary; everything in between stays NHWC.
    x1n = jnp.transpose(x1, (0, 2, 3, 1))
    x2n = jnp.transpose(x2, (0, 2, 3, 1))
    x1u = _bilinear_up2_align_corners_nhwc(x1n)
    diffY = x2n.shape[1] - x1u.shape[1]
    diffX = x2n.shape[2] - x1u.shape[2]
    x1p = jnp.pad(x1u, ((0, 0),
                        (diffY // 2, diffY - diffY // 2),
                        (diffX // 2, diffX - diffX // 2),
                        (0, 0)))
    x = jnp.concatenate([x2n, x1p], axis=-1)                 # NHWC
    H, W = x.shape[1], x.shape[2]

    # Conv biases b1/b2 are not passed: training-mode BN cancels them exactly.
    h = conv_bn_relu_block(x, params["w1"], params["g1"], params["bt1"],
                           scaling=scaling, out_dtype=jnp.bfloat16)
    h = conv_bn_relu_block(h, params["w2"], params["g2"], params["bt2"],
                           scaling=scaling, out_dtype=jnp.float32)
    h = h[:, :H, :W, :]                                      # DoubleConv output slice
    return jnp.transpose(h, (0, 3, 1, 2))                    # back to NCHW


# ----------------------------------------------------------------------------
# Pure-JAX reference (bias + explicit /scaling^2, standard BN) for checking
# ----------------------------------------------------------------------------
def _ref_block(x_nchw, w, b, g, bt, *, scaling=1, eps=1e-5):
    K = w.shape[2]
    p = math.ceil((K - 1) / 2)
    xp = jnp.pad(x_nchw, ((0, 0), (0, 0), (p, p), (p, p)), mode="reflect")
    y = lax.conv_general_dilated(
        xp, w, (1, 1), "VALID",
        dimension_numbers=("NCHW", "OIHW", "NCHW"),
        precision=lax.Precision.HIGHEST)
    y = (y + b[None, :, None, None]) / float(scaling) ** 2
    mean = y.mean(axis=(0, 2, 3), keepdims=True)
    var = ((y - mean) ** 2).mean(axis=(0, 2, 3), keepdims=True)
    y = (y - mean) * lax.rsqrt(var + eps)
    y = y * g[None, :, None, None] + bt[None, :, None, None]
    return jnp.maximum(y, 0.0)


def up_forward_ref(x1, x2, params, *, scaling=1):
    x1n = jnp.transpose(x1, (0, 2, 3, 1))
    x2n = jnp.transpose(x2, (0, 2, 3, 1))
    x1u = _bilinear_up2_align_corners_nhwc(x1n)
    diffY = x2n.shape[1] - x1u.shape[1]
    diffX = x2n.shape[2] - x1u.shape[2]
    x1p = jnp.pad(x1u, ((0, 0),
                        (diffY // 2, diffY - diffY // 2),
                        (diffX // 2, diffX - diffX // 2),
                        (0, 0)))
    x = jnp.transpose(jnp.concatenate([x2n, x1p], axis=-1), (0, 3, 1, 2))
    H, W = x.shape[2], x.shape[3]
    h = _ref_block(x, params["w1"], params["b1"], params["g1"], params["bt1"],
                   scaling=scaling)
    h = _ref_block(h, params["w2"], params["b2"], params["g2"], params["bt2"],
                   scaling=scaling)
    return h[:, :, :H, :W]


# ----------------------------------------------------------------------------
# main
# ----------------------------------------------------------------------------
if __name__ == "__main__":
    # Up(in_channels=8, out_channels=4, bilinear=True, scaling=1)
    in_channels, out_channels = 8, 4
    mid_channels = in_channels // 2
    K = 3  # scaling * 3 with scaling = 1

    key = jax.random.PRNGKey(0)
    k1, k2, k3, k4, k5, k6 = jax.random.split(key, 6)

    x1 = jax.random.normal(k1, (2, in_channels // 2, 8, 8), jnp.float32)
    x2 = jax.random.normal(k2, (2, in_channels // 2, 16, 16), jnp.float32)

    params = {
        "w1": 0.1 * jax.random.normal(k3, (mid_channels, in_channels, K, K),
                                      jnp.float32),
        "b1": 0.01 * jax.random.normal(k4, (mid_channels,), jnp.float32),
        "g1": jnp.ones((mid_channels,), jnp.float32),
        "bt1": jnp.zeros((mid_channels,), jnp.float32),
        "w2": 0.1 * jax.random.normal(k5, (out_channels, mid_channels, K, K),
                                      jnp.float32),
        "b2": 0.01 * jax.random.normal(k6, (out_channels,), jnp.float32),
        "g2": jnp.ones((out_channels,), jnp.float32),
        "bt2": jnp.zeros((out_channels,), jnp.float32),
    }

    out = jax.block_until_ready(up_forward(x1, x2, params, scaling=1))
    ref = jax.block_until_ready(up_forward_ref(x1, x2, params, scaling=1))

    assert out.shape == (2, out_channels, 16, 16), out.shape
    err = jnp.abs(out - ref)
    # bf16 MXU inputs -> ~1e-2 absolute error on O(1) normalized outputs.
    assert float(err.max()) < 5e-2 and float(err.mean()) < 1e-2, (
        float(err.max()), float(err.mean()))

    print("KERNEL_OK")
</pallas_src>

<mosaic_0001>
module attributes {stable_mosaic.version = 11 : i64} {
  func.func @_conv_stats_kernel(%arg0: i32, %arg1: i32, %arg2: memref<1x1x326x8xbf16, #tpu.memory_space<vmem>>, %arg3: memref<72x128xbf16, #tpu.memory_space<vmem>>, %arg4: memref<288x128xf32, #tpu.memory_space<vmem>>, %arg5: memref<1x1x128xf32, #tpu.memory_space<vmem>>, %arg6: memref<1x1x128xf32, #tpu.memory_space<vmem>>) attributes {dimension_semantics = [#tpu.dimension_semantics<parallel>, #tpu.dimension_semantics<parallel>], iteration_bounds = array<i64: 2, 1>, scalar_prefetch = 0 : i64, scratch_operands = 0 : i64, tpu.core_type = #tpu.core_type<tc>, window_params = [{transform_indices = @transform_0, window_bounds = array<i64: 1, 1, 326, 8>}, {pipeline_mode = #tpu.pipeline_mode<synchronous>, transform_indices = @transform_1, window_bounds = array<i64: 72, 128>}, {transform_indices = @transform_2, window_bounds = array<i64: 288, 128>}, {transform_indices = @transform_3, window_bounds = array<i64: 1, 1, 128>}, {transform_indices = @transform_4, window_bounds = array<i64: 1, 1, 128>}]} {
    %c0 = arith.constant 0 : index
    %c0_0 = arith.constant 0 : index
    %c0_1 = arith.constant 0 : index
    %c0_2 = arith.constant 0 : index
    %0 = vector.load %arg2[%c0, %c0_0, %c0_1, %c0_2] : memref<1x1x326x8xbf16, #tpu.memory_space<vmem>>, vector<1x1x288x8xbf16>
    %1 = vector.shape_cast %0 : vector<1x1x288x8xbf16> to vector<288x8xbf16>
    %c0_3 = arith.constant 0 : index
    %c0_4 = arith.constant 0 : index
    %2 = vector.load %arg3[%c0_3, %c0_4] : memref<72x128xbf16, #tpu.memory_space<vmem>>, vector<8x128xbf16>
    %cst = arith.constant dense<0.000000e+00> : vector<288x128xf32>
    %3 = tpu.matmul %1, %2, %cst {dimension_numbers = #tpu.dot_dimension_numbers<[1], [0], [0], [1], [0, 0, 1, 1], [], []>} : vector<288x8xbf16>, vector<8x128xbf16>, vector<288x128xf32> -> vector<288x128xf32>
    %c0_5 = arith.constant 0 : index
    %c0_6 = arith.constant 0 : index
    %c1 = arith.constant 1 : index
    %c0_7 = arith.constant 0 : index
    %4 = vector.load %arg2[%c0_5, %c0_6, %c1, %c0_7] : memref<1x1x326x8xbf16, #tpu.memory_space<vmem>>, vector<1x1x288x8xbf16>
    %5 = vector.shape_cast %4 : vector<1x1x288x8xbf16> to vector<288x8xbf16>
    %c8 = arith.constant 8 : index
    %c0_8 = arith.constant 0 : index
    %6 = vector.load %arg3[%c8, %c0_8] : memref<72x128xbf16, #tpu.memory_space<vmem>>, vector<8x128xbf16>
    %cst_9 = arith.constant dense<0.000000e+00> : vector<288x128xf32>
    %7 = tpu.matmul %5, %6, %cst_9 {dimension_numbers = #tpu.dot_dimension_numbers<[1], [0], [0], [1], [0, 0, 1, 1], [], []>} : vector<288x8xbf16>, vector<8x128xbf16>, vector<288x128xf32> -> vector<288x128xf32>
    %8 = arith.addf %3, %7 : vector<288x128xf32>
    %c0_10 = arith.constant 0 : index
    %c0_11 = arith.constant 0 : index
    %c2 = arith.constant 2 : index
    %c0_12 = arith.constant 0 : index
    %9 = vector.load %arg2[%c0_10, %c0_11, %c2, %c0_12] : memref<1x1x326x8xbf16, #tpu.memory_space<vmem>>, vector<1x1x288x8xbf16>
    %10 = vector.shape_cast %9 : vector<1x1x288x8xbf16> to vector<288x8xbf16>
    %c16 = arith.constant 16 : index
    %c0_13 = arith.constant 0 : index
    %11 = vector.load %arg3[%c16, %c0_13] : memref<72x128xbf16, #tpu.memory_space<vmem>>, vector<8x128xbf16>
    %cst_14 = arith.constant dense<0.000000e+00> : vector<288x128xf32>
    %12 = tpu.matmul %10, %11, %cst_14 {dimension_numbers = #tpu.dot_dimension_numbers<[1], [0], [0], [1], [0, 0, 1, 1], [], []>} : vector<288x8xbf16>, vector<8x128xbf16>, vector<288x128xf32> -> vector<288x128xf32>
    %13 = arith.addf %8, %12 : vector<288x128xf32>
    %c0_15 = arith.constant 0 : index
    %c0_16 = arith.constant 0 : index
    %c18 = arith.constant 18 : index
    %c0_17 = arith.constant 0 : index
    %14 = vector.load %arg2[%c0_15, %c0_16, %c18, %c0_17] : memref<1x1x326x8xbf16, #tpu.memory_space<vmem>>, vector<1x1x288x8xbf16>
    %15 = vector.shape_cast %14 : vector<1x1x288x8xbf16> to vector<288x8xbf16>
    %c24 = arith.constant 24 : index
    %c0_18 = arith.constant 0 : index
    %16 = vector.load %arg3[%c24, %c0_18] : memref<72x128xbf16, #tpu.memory_space<vmem>>, vector<8x128xbf16>
    %cst_19 = arith.constant dense<0.000000e+00> : vector<288x128xf32>
    %17 = tpu.matmul %15, %16, %cst_19 {dimension_numbers = #tpu.dot_dimension_numbers<[1], [0], [0], [1], [0, 0, 1, 1], [], []>} : vector<288x8xbf16>, vector<8x128xbf16>, vector<288x128xf32> -> vector<288x128xf32>
    %18 = arith.addf %13, %17 : vector<288x128xf32>
    %c0_20 = arith.constant 0 : index
    %c0_21 = arith.constant 0 : index
    %c19 = arith.constant 19 : index
    %c0_22 = arith.constant 0 : index
    %19 = vector.load %arg2[%c0_20, %c0_21, %c19, %c0_22] : memref<1x1x326x8xbf16, #tpu.memory_space<vmem>>, vector<1x1x288x8xbf16>
    %20 = vector.shape_cast %19 : vector<1x1x288x8xbf16> to vector<288x8xbf16>
    %c32 = arith.constant 32 : index
    %c0_23 = arith.constant 0 : index
    %21 = vector.load %arg3[%c32, %c0_23] : memref<72x128xbf16, #tpu.memory_space<vmem>>, vector<8x128xbf16>
    %cst_24 = arith.constant dense<0.000000e+00> : vector<288x128xf32>
    %22 = tpu.matmul %20, %21, %cst_24 {dimension_numbers = #tpu.dot_dimension_numbers<[1], [0], [0], [1], [0, 0, 1, 1], [], []>} : vector<288x8xbf16>, vector<8x128xbf16>, vector<288x128xf32> -> vector<288x128xf32>
    %23 = arith.addf %18, %22 : vector<288x128xf32>
    %c0_25 = arith.constant 0 : index
    %c0_26 = arith.constant 0 : index
    %c20 = arith.constant 20 : index
    %c0_27 = arith.constant 0 : index
    %24 = vector.load %arg2[%c0_25, %c0_26, %c20, %c0_27] : memref<1x1x326x8xbf16, #tpu.memory_space<vmem>>, vector<1x1x288x8xbf16>
    %25 = vector.shape_cast %24 : vector<1x1x288x8xbf16> to vector<288x8xbf16>
    %c40 = arith.constant 40 : index
    %c0_28 = arith.constant 0 : index
    %26 = vector.load %arg3[%c40, %c0_28] : memref<72x128xbf16, #tpu.memory_space<vmem>>, vector<8x128xbf16>
    %cst_29 = arith.constant dense<0.000000e+00> : vector<288x128xf32>
    %27 = tpu.matmul %25, %26, %cst_29 {dimension_numbers = #tpu.dot_dimension_numbers<[1], [0], [0], [1], [0, 0, 1, 1], [], []>} : vector<288x8xbf16>, vector<8x128xbf16>, vector<288x128xf32> -> vector<288x128xf32>
    %28 = arith.addf %23, %27 : vector<288x128xf32>
    %c0_30 = arith.constant 0 : index
    %c0_31 = arith.constant 0 : index
    %c36 = arith.constant 36 : index
    %c0_32 = arith.constant 0 : index
    %29 = vector.load %arg2[%c0_30, %c0_31, %c36, %c0_32] : memref<1x1x326x8xbf16, #tpu.memory_space<vmem>>, vector<1x1x288x8xbf16>
    %30 = vector.shape_cast %29 : vector<1x1x288x8xbf16> to vector<288x8xbf16>
    %c48 = arith.constant 48 : index
    %c0_33 = arith.constant 0 : index
    %31 = vector.load %arg3[%c48, %c0_33] : memref<72x128xbf16, #tpu.memory_space<vmem>>, vector<8x128xbf16>
    %cst_34 = arith.constant dense<0.000000e+00> : vector<288x128xf32>
    %32 = tpu.matmul %30, %31, %cst_34 {dimension_numbers = #tpu.dot_dimension_numbers<[1], [0], [0], [1], [0, 0, 1, 1], [], []>} : vector<288x8xbf16>, vector<8x128xbf16>, vector<288x128xf32> -> vector<288x128xf32>
    %33 = arith.addf %28, %32 : vector<288x128xf32>
    %c0_35 = arith.constant 0 : index
    %c0_36 = arith.constant 0 : index
    %c37 = arith.constant 37 : index
    %c0_37 = arith.constant 0 : index
    %34 = vector.load %arg2[%c0_35, %c0_36, %c37, %c0_37] : memref<1x1x326x8xbf16, #tpu.memory_space<vmem>>, vector<1x1x288x8xbf16>
    %35 = vector.shape_cast %34 : vector<1x1x288x8xbf16> to vector<288x8xbf16>
    %c56 = arith.constant 56 : index
    %c0_38 = arith.constant 0 : index
    %36 = vector.load %arg3[%c56, %c0_38] : memref<72x128xbf16, #tpu.memory_space<vmem>>, vector<8x128xbf16>
    %cst_39 = arith.constant dense<0.000000e+00> : vector<288x128xf32>
    %37 = tpu.matmul %35, %36, %cst_39 {dimension_numbers = #tpu.dot_dimension_numbers<[1], [0], [0], [1], [0, 0, 1, 1], [], []>} : vector<288x8xbf16>, vector<8x128xbf16>, vector<288x128xf32> -> vector<288x128xf32>
    %38 = arith.addf %33, %37 : vector<288x128xf32>
    %c0_40 = arith.constant 0 : index
    %c0_41 = arith.constant 0 : index
    %c38 = arith.constant 38 : index
    %c0_42 = arith.constant 0 : index
    %39 = vector.load %arg2[%c0_40, %c0_41, %c38, %c0_42] : memref<1x1x326x8xbf16, #tpu.memory_space<vmem>>, vector<1x1x288x8xbf16>
    %40 = vector.shape_cast %39 : vector<1x1x288x8xbf16> to vector<288x8xbf16>
    %c64 = arith.constant 64 : index
    %c0_43 = arith.constant 0 : index
    %41 = vector.load %arg3[%c64, %c0_43] : memref<72x128xbf16, #tpu.memory_space<vmem>>, vector<8x128xbf16>
    %cst_44 = arith.constant dense<0.000000e+00> : vector<288x128xf32>
    %42 = tpu.matmul %40, %41, %cst_44 {dimension_numbers = #tpu.dot_dimension_numbers<[1], [0], [0], [1], [0, 0, 1, 1], [], []>} : vector<288x8xbf16>, vector<8x128xbf16>, vector<288x128xf32> -> vector<288x128xf32>
    %43 = arith.addf %38, %42 : vector<288x128xf32>
    %c0_45 = arith.constant 0 : index
    %c0_46 = arith.constant 0 : index
    %44 = vector.load %arg4[%c0_45, %c0_46] : memref<288x128xf32, #tpu.memory_space<vmem>>, vector<288x128xf32>
    tpu.vector_store %arg4[%c0_45, %c0_46], %43 {strides = array<i32>} : memref<288x128xf32, #tpu.memory_space<vmem>>, vector<288x128xf32>,
    %45 = tpu.iota {dimensions = array<i32: 0>} : vector<288x1xi32>
    %c18_i32 = arith.constant 18 : i32
    %c0_i32 = arith.constant 0 : i32
    %46 = arith.cmpi eq, %c18_i32, %c0_i32 : i32
    %c1_i32 = arith.constant 1 : i32
    %47 = arith.select %46, %c1_i32, %c18_i32 : i32
    %48 = vector.broadcast %47 : i32 to vector<288x1xi32>
    %49 = arith.remsi %45, %48 : vector<288x1xi32>
    %c0_i32_47 = arith.constant 0 : i32
    %50 = vector.broadcast %c0_i32_47 : i32 to vector<288x1xi32>
    %51 = arith.cmpi ne, %49, %50 : vector<288x1xi32>
    %c0_i32_48 = arith.constant 0 : i32
    %52 = vector.broadcast %c0_i32_48 : i32 to vector<288x1xi32>
    %53 = arith.cmpi slt, %49, %52 : vector<288x1xi32>
    %c0_i32_49 = arith.constant 0 : i32
    %54 = arith.cmpi slt, %47, %c0_i32_49 : i32
    %55 = vector.broadcast %54 : i1 to vector<288x1xi1>
    %56 = vector.broadcast %55 : vector<288x1xi1> to vector<288x1xi1>
    %57 = arith.xori %53, %56 : vector<288x1xi1>
    %58 = arith.andi %57, %51 : vector<288x1xi1>
    %59 = vector.broadcast %47 : i32 to vector<288x1xi32>
    %60 = arith.addi %49, %59 : vector<288x1xi32>
    %61 = arith.select %58, %60, %49 : vector<288x1xi1>, vector<288x1xi32>
    %c16_i32 = arith.constant 16 : i32
    %62 = vector.broadcast %c16_i32 : i32 to vector<288x1xi32>
    %63 = arith.cmpi slt, %61, %62 : vector<288x1xi32>
    %64 = arith.extui %63 : vector<288x1xi1> to vector<288x1xi32>
    %65 = arith.sitofp %64 : vector<288x1xi32> to vector<288x1xf32>
    %66 = vector.broadcast %65 : vector<288x1xf32> to vector<288x128xf32>
    %67 = arith.mulf %43, %66 : vector<288x128xf32>
    %cst_50 = arith.constant dense<0.000000e+00> : vector<128xf32>
    %68 = vector.multi_reduction <add>, %67, %cst_50 [0] : vector<288x128xf32> to vector<128xf32>
    %69 = vector.shape_cast %68 : vector<128xf32> to vector<1x128xf32>
    %c0_51 = arith.constant 0 : index
    %c0_52 = arith.constant 0 : index
    %c0_53 = arith.constant 0 : index
    %70 = vector.load %arg5[%c0_51, %c0_52, %c0_53] : memref<1x1x128xf32, #tpu.memory_space<vmem>>, vector<1x1x128xf32>
    %71 = vector.shape_cast %70 : vector<1x1x128xf32> to vector<1x128xf32>
    %72 = vector.shape_cast %69 : vector<1x128xf32> to vector<1x1x128xf32>
    tpu.vector_store %arg5[%c0_51, %c0_52, %c0_53], %72 {strides = array<i32>} : memref<1x1x128xf32, #tpu.memory_space<vmem>>, vector<1x1x128xf32>,
    %73 = arith.mulf %43, %43 : vector<288x128xf32>
    %74 = vector.broadcast %65 : vector<288x1xf32> to vector<288x128xf32>
    %75 = arith.mulf %73, %74 : vector<288x128xf32>
    %cst_54 = arith.constant dense<0.000000e+00> : vector<128xf32>
    %76 = vector.multi_reduction <add>, %75, %cst_54 [0] : vector<288x128xf32> to vector<128xf32>
    %77 = vector.shape_cast %76 : vector<128xf32> to vector<1x128xf32>
    %c0_55 = arith.constant 0 : index
    %c0_56 = arith.constant 0 : index
    %c0_57 = arith.constant 0 : index
    %78 = vector.load %arg6[%c0_55, %c0_56, %c0_57] : memref<1x1x128xf32, #tpu.memory_space<vmem>>, vector<1x1x128xf32>
    %79 = vector.shape_cast %78 : vector<1x1x128xf32> to vector<1x128xf32>
    %80 = vector.shape_cast %77 : vector<1x128xf32> to vector<1x1x128xf32>
    tpu.vector_store %arg6[%c0_55, %c0_56, %c0_57], %80 {strides = array<i32>} : memref<1x1x128xf32, #tpu.memory_space<vmem>>, vector<1x1x128xf32>,
    return
  }
  func.func @transform_0(%arg0: i32, %arg1: i32) -> (i32, i32, i32, i32) {
    %c0_i32 = arith.constant 0 : i32
    %c0_i32_0 = arith.constant 0 : i32
    %c0_i32_1 = arith.constant 0 : i32
    return %arg0, %arg1, %c0_i32, %c0_i32_0 : i32, i32, i32, i32
  }
  func.func @transform_1(%arg0: i32, %arg1: i32) -> (i32, i32) {
    %c0_i32 = arith.constant 0 : i32
    %c0_i32_0 = arith.constant 0 : i32
    %c0_i32_1 = arith.constant 0 : i32
    return %c0_i32, %c0_i32_0 : i32, i32
  }
  func.func @transform_2(%arg0: i32, %arg1: i32) -> (i32, i32) {
    %c1_i32 = arith.constant 1 : i32
    %0 = arith.muli %arg0, %c1_i32 : i32
    %1 = arith.addi %0, %arg1 : i32
    %c0_i32 = arith.constant 0 : i32
    %c0_i32_0 = arith.constant 0 : i32
    return %1, %c0_i32 : i32, i32
  }
  func.func @transform_3(%arg0: i32, %arg1: i32) -> (i32, i32, i32) {
    %c1_i32 = arith.constant 1 : i32
    %0 = arith.muli %arg0, %c1_i32 : i32
    %1 = arith.addi %0, %arg1 : i32
    %c0_i32 = arith.constant 0 : i32
    %c0_i32_0 = arith.constant 0 : i32
    %c0_i32_1 = arith.constant 0 : i32
    return %1, %c0_i32, %c0_i32_0 : i32, i32, i32
  }
  func.func @transform_4(%arg0: i32, %arg1: i32) -> (i32, i32, i32) {
    %c1_i32 = arith.constant 1 : i32
    %0 = arith.muli %arg0, %c1_i32 : i32
    %1 = arith.addi %0, %arg1 : i32
    %c0_i32 = arith.constant 0 : i32
    %c0_i32_0 = arith.constant 0 : i32
    %c0_i32_1 = arith.constant 0 : i32
    return %1, %c0_i32, %c0_i32_0 : i32, i32, i32
  }
}

</mosaic_0001>

<bundles_post_ra>
// kernel: tpu_custom_call.1
= control target key start
LH: loop header
LB: loop body
LE: loop exit
PB: predicated region body
PF: predicated region fallthrough
CT: control target
= control target key end

     0   :  { %10 = vsyncpa [#allocation3], 0  ;;  %s8811_s0 = inlined_call_operand.vmem [shape: bf16[2,1,326,8], index: 0, kind: input, shape index: {}]   ;;  %s8812_s1 = inlined_call_operand.vmem [shape: bf16[72,128], index: 1, kind: input, shape index: {}]   ;;  %s8813_s2 = inlined_call_operand.hbm [shape: f32[576,128], index: 2, kind: output, shape index: {0}]   ;;  %s8814_s3 = inlined_call_operand.hbm [shape: f32[2,1,128], index: 3, kind: output, shape index: {1}]   ;;  %s8815_s4 = inlined_call_operand.hbm [shape: f32[2,1,128], index: 4, kind: output, shape index: {2}]  }
   0x1   :  { %12 = vsyncpa [#allocation3 + $0x1], 0 }
   0x2   :  { %13 = vsyncpa [#allocation5], 0 }
   0x3   :  { %15 = vsyncpa [#allocation5 + $0x1], 0  ;;  %s5990_s15 = smov 0   ;;  %s5992_s16 = smov 0  }
   0x4   :  { %s5994_s17 = smov 0   ;;  %s5996_s18 = smov 0  }
   0x5   :  { %s5998_s19 = smov 0   ;;  %s6000_s20 = smov 0  }
   0x6 LB: > { %s4824_s21 = sadd.s32 4294967295, %s5957_s20   ;;  %s8847_s22 = sadd.s32 4294967294, %s5957_s20   ;;  %s5957_s20 = sphi %s6000_s20, %s21_s20   ;;  %s5953_s19 = sphi %s5998_s19, %s9107_s19   ;;  %s5949_s18 = sphi %s5996_s18, %s9106_s18   ;;  %s5945_s17 = sphi %s5994_s17, %s9105_s17   ;;  %s5941_s16 = sphi %s5992_s16, %s9104_s16   ;;  %s5937_s15 = sphi %s5990_s15, %s9103_s15  }
   0x7   : > { %s33_s23 = sadd.s32 1, %s5953_s19  ;;  %s91_s24 = sadd.s32 1, %s5945_s17 }
   0x8   : > { %p35_p0 = scmp.ge.s32.totalorder %s33_s23, 2  ;;  %p101_p1 = scmp.ne.s32.totalorder %s5945_s17, %s5941_s16 }
   0x9   : > { %p102_p2 = scmp.eq.s32.totalorder %s4824_s21, 1  ;;  %p107_p3 = scmp.ne.s32.totalorder %s5941_s16, %s5937_s15 }
   0xa   : > { %s9109_s23 = smov (%p35_p0, %s33_s23), 0  ;;  %p108_p5 = scmp.eq.s32.totalorder %s8847_s22, 1 }
   0xb   : > { %p6032_p4 = por %p102_p2, %p101_p1  ;;  %s88_s26 = ssub.s32 %s5953_s19, %s9109_s23 }
   0xc   : > { %p4828_p6 = scmp.ge.s32.totalorder %s5957_s20, 1  ;;  %p89_p7 = scmp.eq.s32.totalorder %s88_s26, 0 }
   0xd   : > { %p6041_p8 = por %p108_p5, %p107_p3  ;;  %p197_p9 = scmp.lt.s32.totalorder %s5957_s20, 3 }
   0xe   : > { %s6047_s28 = scalar_select %p89_p7, %s5945_s17, %s91_s24  }
   0xf   : > { %p198_p10 = pnand %p4828_p6, %p197_p9 }
  0x11   : > { %201 = sbr.rel (%p198_p10) target bundleno = 627 (0x273), region = 28 }
  0x16   : > { %v287_v0 = vld [vmem:[%s8812_s1 + $0x4] sm:$0xf]  ;;  %vm585_vm0 = vcmask 1043456   ;;  %p235_p11 = scmp.lt.s32.totalorder %s5949_s18, 1  ;;  %v983_v2 = vld [vmem:[%s8812_s1 + $0x8] sm:$0xf] }
  0x17   : > { %5611 = vmatprep.subr.msk.bf16.mxu0 %vm585_vm0, %v287_v0  ;;  %5612 = vmatprep.subr.msk.bf16.mxu1 %vm585_vm0, %v287_v0  ;;  %v587_v1 = vsel %vm585_vm0, %v287_v0, 0  ;;  %v285_v3 = vld [vmem:[%s8812_s1] sm:$0xf]  ;;  %vm381_vm1 = vsmask.f32 7424  ;;  %vm530_vm2 = vcmask 64512  }
  0x18   : > { %5268 = vmatpush3.bf16.msra.mxu0 %v587_v1  ;;  %5610 = vmatpush3.bf16.msra.mxu1 %v587_v1  ;;  %s236_s9 = scalar_select %p235_p11, %s5949_s18, 1  ;;  %v1080_v8 = vsel %vm585_vm0, %v983_v2, 0  ;;  %v803_v16 = vsel %vm585_vm0, %v285_v3, 0  ;;  %v6113_v33 = vld [vmem:[%s8812_s1 + $0x10] sm:$0xf]  ;;  %vm987_vm3 = vcmask 1046528  }
  0x19   : > { %5614 = vmatprep.subr.msk.bf16.mxu0 %vm585_vm0, %v983_v2  ;;  %5613 = vmatprep.subr.msk.bf16.mxu1 %vm585_vm0, %v285_v3  ;;  %v6133_v45 = vld [vmem:[%s8812_s1 + $0xc] sm:$0xf]  ;;  %vm2184_vm4 = vcmask 1045504   ;;  %vm1738_vm5 = vsmask.f32 6400  ;;  %vm3381_vm6 = vcmask 1044480  }
  0x1a   : > { %s5622_s10 = smul.u32 164, %s236_s9  ;;  %vm2935_vm7 = vsmask.f32 5376  ;;  %s8221_s12 = sand.u32 1, %s5941_s16  }
  0x1b   : > { %s5095_s24 = smul.u32 4608, %s5949_s18  ;;  %s4639_s6 = scalar_lea.sflag [#allocation3], %s8221_s12 }
  0x1c   : > { %s6068_s13 = scalar_lea.vmem %s8811_s0, %s5622_s10  ;;  %s5960_s8 = smov [#allocation2]  }
  0x1d   : > { %v249_v4 = vld [vmem:[%s6068_s13] sm:$0xf]  ;;  %v6072_v5 = vld [vmem:[%s6068_s13 + $0x4] sm:$0xf]  ;;  %v6078_v7 = vld [vmem:[%s6068_s13 + $0x8] sm:$0xff]   ;;  %s8679_s5 = scalar_lea.hbm %s8813_s2, %s5095_s24  ;;  %s5829_s9 = sshll.u32 %s5960_s8, 4  ;;  %s5830_s9 = int_to_ptr.vmem [resolvable:$false] %s5829_s9 }
  0x1e   : > { %v6075_v6 = vcombine.low %v249_v4, %v6072_v5  ;;  %v390_v11 = vshll.u32 %v6078_v7, 16  ;;  %v394_v12 = vshrl.u32 %v6078_v7, 16  ;;  %v6086_v13 = vld [vmem:[%s6068_s13 + $0x50] sm:$0xff]   ;;  %v6089_v14 = vld [vmem:[%s6068_s13 + $0x58] sm:$0xff]   ;;  %v6101_v24 = vld [vmem:[%s6068_s13 + $0x60] sm:$0xff]   ;;  %s5831_s10 = scalar_lea.vmem %s5830_s9, 9216 }
  0x1f   : > { %v6092_v15 = vld [vmem:[%s6068_s13 + $0x10] sm:$0xff]   ;;  %v462_v19 = vshll.u32 %v6086_v13, 16  ;;  %v466_v20 = vshrl.u32 %v6086_v13, 16  ;;  %v470_v21 = vshll.u32 %v6089_v14, 16  ;;  %v474_v22 = vshrl.u32 %v6089_v14, 16  ;;  %v6106_v28 = vld [vmem:[%s6068_s13 + $0x18] sm:$0xff]  }
  0x20   : > { %v383_v9 = vshrl.u32 %v6075_v6, 16  ;;  %v385_v10 = vshll.u32 %v6075_v6, 16  ;;  %v392_v18 = vrot.slane %v390_v11, 1  ;;  %v398_v23 = vshll.u32 %v6092_v15, 16  ;;  %v6119_v37 = vld [vmem:[%s6068_s13 + $0x68] sm:$0xff]   ;;  %v6123_v39 = vld [vmem:[%s6068_s13 + $0x20] sm:$0xff]  }
  0x21   : > { %v6103_v27 = vrot.slane %v462_v19, 1  ;;  %v472_v29 = vrot.slane %v470_v21, 1  ;;  %v478_v31 = vshll.u32 %v6101_v24, 16  ;;  %v402_v32 = vshrl.u32 %v6092_v15, 16  ;;  %v6128_v44 = vld [vmem:[%s6068_s13 + $0x70] sm:$0xff]   ;;  %v6140_v50 = vld [vmem:[%s6068_s13 + $0x28] sm:$0xff]  }
  0x22   : > { %v387_v17 = vrot.slane %v385_v10, 1  ;;  %v396_v26 = vor.u32 %v394_v12, %v392_v18  ;;  %v400_v30 = vrot.slane %v398_v23, 1  ;;  %v406_v36 = vshll.u32 %v6106_v28, 16  ;;  %v6155_v62 = vld [vmem:[%s6068_s13 + $0x78] sm:$0xff]   ;;  %v6165_v10 = vld [vmem:[%s6068_s13 + $0x30] sm:$0xff]   ;;  %v6168_v11 = vld [vmem:[%s6068_s13 + $0x80] sm:$0xff]  }
  0x23   : > { %v468_v35 = vor.u32 %v466_v20, %v6103_v27  ;;  %v482_v38 = vshrl.u32 %v6101_v24, 16  ;;  %v476_v40 = vor.u32 %v474_v22, %v472_v29  ;;  %v480_v42 = vrot.slane %v478_v31, 1  ;;  %v6177_v23 = vld [vmem:[%s6068_s13 + $0x38] sm:$0xff]  }
  0x24   : > { %v388_v25 = vor.u32 %v387_v17, %v383_v9  ;;  %v401_v41 = vsel %vm381_vm1, %v396_v26, %v400_v30  ;;  %v404_v43 = vor.u32 %v402_v32, %v400_v30  ;;  %v408_v47 = vrot.slane %v406_v36, 1  ;;  %v6182_v26 = vld [vmem:[%s6068_s13 + $0x88] sm:$0xff]  }
  0x25   : > { %v473_v46 = vsel %vm381_vm1, %v468_v35, %v472_v29  ;;  %v486_v48 = vshll.u32 %v6119_v37, 16  ;;  %v410_v49 = vshrl.u32 %v6106_v28, 16  ;;  %v481_v51 = vsel %vm381_vm1, %v476_v40, %v480_v42  ;;  %v6194_v40 = vld [vmem:[%s6068_s13 + $0x48] sm:$0xff]  }
  0x26   : > { %v393_v34 = vsel %vm381_vm1, %v388_v25, %v392_v18  ;;  %5289 = vmatprep.mubr.msk.bf16.mxu1 %vm530_vm2, %v473_v46  ;;  %v484_v52 = vor.u32 %v482_v38, %v480_v42  ;;  %v414_v53 = vshll.u32 %v6123_v39, 16  ;;  %v490_v54 = vshrl.u32 %v6119_v37, 16  ;;  %v6191_v38 = vld [vmem:[%s6068_s13 + $0x40] sm:$0xff]  }
  0x27   : > { %5269 = vmatprep.mubr.msk.bf16.mxu0 %vm530_vm2, %v393_v34  ;;  %5290 = vmatmul.mubr.msk.bf16.vlgmr.msra.gmra.mxu1 %vm530_vm2, %v481_v51  ;;  %v409_v55 = vsel %vm381_vm1, %v404_v43, %v408_v47  ;;  %v488_v56 = vrot.slane %v486_v48, 1  ;;  %v412_v57 = vor.u32 %v410_v49, %v408_v47  ;;  %v494_v58 = vshll.u32 %v6128_v44, 16  ;;  %v5780_v43 = vld [vmem:[%s6068_s13 + $0x90] ss:$0 sps:$4 sm:$0x11]  }
  0x28   : > { %5270 = vmatmul.mubr.msk.bf16.vlgmr.msra.gmra.mxu0 %vm530_vm2, %v401_v41  ;;  %5306 = vmatpush3.bf16.msra.mxu1 %v803_v16  ;;  %v416_v59 = vrot.slane %v414_v53, 1  ;;  %v418_v60 = vshrl.u32 %v6123_v39, 16  ;;  %v422_v61 = vshll.u32 %v6140_v50, 16  ;;  %v498_v2 = vshrl.u32 %v6128_v44, 16 }
  0x29   : > { %5344 = vmatpush3.bf16.msra.mxu0 %v1080_v8  ;;  %5273 = vmatprep.mubr.msk.bf16.mxu0 %vm530_vm2, %v409_v55  ;;  %v489_v63 = vsel %vm381_vm1, %v484_v52, %v488_v56  ;;  %v492_v0 = vor.u32 %v490_v54, %v488_v56  ;;  %v496_v1 = vrot.slane %v494_v58, 1  ;;  %v502_v9 = vshll.u32 %v6155_v62, 16 }
  0x2a   : > { %5616 = vmatprep.subr.msk.bf16.mxu0 %vm585_vm0, %v6113_v33  ;;  %5615 = vmatprep.subr.msk.bf16.mxu1 %vm585_vm0, %v6133_v45  ;;  %v417_v3 = vsel %vm381_vm1, %v412_v57, %v416_v59  ;;  %v420_v4 = vor.u32 %v418_v60, %v416_v59  ;;  %v424_v8 = vrot.slane %v422_v61, 1  ;;  %v426_v17 = vshrl.u32 %v6140_v50, 16 }
  0x2b   : > { %5293 = vmatprep.mubr.msk.bf16.mxu1 %vm530_vm2, %v489_v63  ;;  %v497_v12 = vsel %vm381_vm1, %v492_v0, %v496_v1  ;;  %v500_v16 = vor.u32 %v498_v2, %v496_v1  ;;  %v506_v18 = vshrl.u32 %v6155_v62, 16  ;;  %v504_v20 = vrot.slane %v502_v9, 1  ;;  %v982_v63 = vld [vmem:[%s6068_s13] sm:$0xe] }
  0x2c   : > { %v425_v19 = vsel %vm381_vm1, %v420_v4, %v424_v8  ;;  %v430_v21 = vshll.u32 %v6165_v10, 16  ;;  %v510_v22 = vshll.u32 %v6168_v11, 16  ;;  %v434_v25 = vshrl.u32 %v6165_v10, 16 }
  0x2d   : > { %v505_v29 = vsel %vm381_vm1, %v500_v16, %v504_v20  ;;  %v428_v30 = vor.u32 %v426_v17, %v424_v8  ;;  %v438_v34 = vshll.u32 %v6177_v23, 16  ;;  %v514_v35 = vshrl.u32 %v6168_v11, 16 }
  0x2e   : > { %v432_v31 = vrot.slane %v430_v21, 1  ;;  %v512_v32 = vrot.slane %v510_v22, 1  ;;  %v518_v36 = vshll.u32 %v6182_v26, 16  ;;  %v508_v41 = vor.u32 %v506_v18, %v504_v20 }
  0x2f   : > { %5294 = vmatmul.mubr.msk.bf16.gmra.mxu1 %vm530_vm2, %v497_v12  ;;  %v440_v46 = vrot.slane %v438_v34, 1  ;;  %v446_v49 = vshll.u32 %v6191_v38, 16  ;;  %v442_v52 = vshrl.u32 %v6177_v23, 16  ;;  %v450_v54 = vshrl.u32 %v6191_v38, 16 }
  0x30   : > { %5274 = vmatmul.mubr.msk.bf16.gmra.mxu0 %vm530_vm2, %v417_v3  ;;  %5297 = vmatprep.mubr.msk.bf16.mxu1 %vm530_vm2, %v505_v29  ;;  %v436_v42 = vor.u32 %v434_v25, %v432_v31  ;;  %v516_v47 = vor.u32 %v514_v35, %v512_v32  ;;  %v520_v48 = vrot.slane %v518_v36, 1  ;;  %v433_v51 = vsel %vm381_vm1, %v428_v30, %v432_v31 }
  0x31   : > { %5277 = vmatprep.mubr.msk.bf16.mxu0 %vm530_vm2, %v425_v19  ;;  %v454_v55 = vshll.u32 %v6194_v40, 16  ;;  %v513_v56 = vsel %vm381_vm1, %v508_v41, %v512_v32  ;;  %v522_v57 = vshrl.u32 %v6182_v26, 16  ;;  %v526_v58 = vshll.u32 %v5780_v43, 16 }
  0x32   : > { %v441_v53 = vsel %vm381_vm1, %v436_v42, %v440_v46  ;;  %v521_v59 = vsel %vm381_vm1, %v516_v47, %v520_v48  ;;  %v448_v60 = vrot.slane %v446_v49, 1  ;;  %v444_v61 = vor.u32 %v442_v52, %v440_v46  ;;  %v6293_v46 = vld [vmem:[%s6068_s13 + $0x10] sm:$0xff]   ;;  %v6298_v49 = vld [vmem:[%s6068_s13 + $0x18] sm:$0xff]  }
  0x33   : > { %v456_v1 = vrot.slane %v454_v55, 1  ;;  %v524_v2 = vor.u32 %v522_v57, %v520_v48  ;;  %v528_v3 = vrot.slane %v526_v58, 1  ;;  %v458_v8 = vshrl.u32 %v6194_v40, 16  ;;  %v6311_v55 = vld [vmem:[%s6068_s13 + $0x30] sm:$0xff]  }
  0x34   : > { %v452_v0 = vor.u32 %v450_v54, %v448_v60  ;;  %v449_v4 = vsel %vm381_vm1, %v444_v61, %v448_v60  ;;  %v4885_v12 = vcombine.low %v982_v63, %v6072_v5  ;;  %v1021_v17 = vrot.slane %v6182_v26, 1  ;;  %v6326_v61 = vld [vmem:[%s6068_s13 + $0x38] sm:$0xff]  }
  0x35   : > { %v529_v16 = vsel %vm381_vm1, %v524_v2, %v528_v3  ;;  %v460_v18 = vor.u32 %v458_v8, %v456_v1  ;;  %v1023_v19 = vrot.slane %v5780_v43, 1  ;;  %v989_v21 = vrot.slane %v6078_v7, 1  ;;  %v2179_v43 = vld [vmem:[%s6068_s13 + $0x8] sm:$0xc]  ;;  %v6336_v2 = vld [vmem:[%s6068_s13 + $0x40] sm:$0xff]  }
  0x36   : > { %v457_v9 = vsel %vm381_vm1, %v452_v0, %v456_v1  ;;  %v988_v20 = vrot.slane %v4885_v12, 1  ;;  %v1518_v29 = vsel %vm585_vm0, %v6133_v45, 0  ;;  %v991_v30 = vrot.slane %v6092_v15, 1  ;;  %v6344_v8 = vld [vmem:[%s6068_s13 + $0x48] sm:$0xff]  }
  0x37   : > { %5298 = vmatmul.mubr.msk.bf16.gmra.mxu1 %vm530_vm2, %v513_v56  ;;  %v6227_v5 = vsel %vm987_vm3, %v1021_v17, %v1023_v19  ;;  %v465_v22 = vsel %vm381_vm1, %v460_v18, %v6103_v27  ;;  %v993_v27 = vrot.slane %v6106_v28, 1  ;;  %v1964_v31 = vsel %vm585_vm0, %v6113_v33, 0 }
  0x38   : > { %5278 = vmatmul.mubr.msk.bf16.gmra.mxu0 %vm530_vm2, %v433_v51  ;;  %5301 = vmatprep.mubr.msk.bf16.mxu1 %vm530_vm2, %v521_v59  ;;  %v990_v25 = vsel %vm987_vm3, %v988_v20, %v989_v21  ;;  %v992_v45 = vsel %vm987_vm3, %v989_v21, %v991_v30  ;;  %v997_v34 = vrot.slane %v6140_v50, 1  ;;  %v1001_v36 = vrot.slane %v6177_v23, 1  ;;  %v6302_v51 = vld [vmem:[%s6068_s13 + $0x20] sm:$0xff]  }
  0x39   : > { %5281 = vmatprep.mubr.msk.bf16.mxu0 %vm530_vm2, %v441_v53  ;;  %v994_v32 = vsel %vm987_vm3, %v991_v30, %v993_v27  ;;  %v1003_v42 = vrot.slane %v6191_v38, 1  ;;  %v2186_v53 = vrot.slane %v6293_v46, 2  ;;  %v2188_v54 = vrot.slane %v6298_v49, 2  ;;  %v6374_v30 = vld [vmem:[%s6068_s13 + $0x58] sm:$0xff]  }
  0x3a   : > { %v2190_v57 = vrot.slane %v6302_v51, 2  ;;  %v1007_v58 = vrot.slane %v6086_v13, 1  ;;  %v1009_v59 = vrot.slane %v6089_v14, 1  ;;  %v2194_v1 = vrot.slane %v6311_v55, 2 }
  0x3b   : > { %v1004_v48 = vsel %vm987_vm3, %v1001_v36, %v1003_v42  ;;  %v6321_v60 = vsel %vm2184_vm4, %v2186_v53, %v2188_v54  ;;  %v2200_v18 = vrot.slane %v6344_v8, 2  ;;  %v1011_v20 = vrot.slane %v6101_v24, 1 }
  0x3c   : > { %v6329_v63 = vsel %vm2184_vm4, %v2188_v54, %v2190_v57 }
  0x3f   : > { %5302 = vmatmul.mubr.msk.bf16.gmra.mxu1 %vm530_vm2, %v529_v16  ;;  %v2198_v16 = vrot.slane %v6336_v2, 2 }
  0x40   : > { %5282 = vmatmul.mubr.msk.bf16.gmra.mxu0 %vm530_vm2, %v449_v4  ;;  %5307 = vmatprep.mubr.msk.bf16.mxu1 %vm530_vm2, %v6075_v6  ;;  %v6240_v6 = vld [vmem:[%s8812_s1 + $0x14] sm:$0xf]  ;;  %v2196_v4 = vrot.slane %v6326_v61, 2 }
  0x41   : > { %5285 = vmatprep.mubr.msk.bf16.mxu0 %vm530_vm2, %v457_v9  ;;  %v6362_v21 = vsel %vm2184_vm4, %v2198_v16, %v2200_v18 }
  0x42   : > { %v6351_v12 = vsel %vm2184_vm4, %v2194_v1, %v2196_v4  ;;  %v6357_v19 = vsel %vm2184_vm4, %v2196_v4, %v2198_v16 }
  0x47   : > { %5308 = vmatmul.mubr.msk.bf16.vlgmr.msra.gmra.mxu1 %vm530_vm2, %v6078_v7  ;;  %v6256_v7 = vld [vmem:[%s8812_s1 + $0x18] sm:$0xf] }
  0x48   : > { %5286 = vmatmul.mubr.msk.bf16.gmra.mxu0 %vm530_vm2, %v465_v22  ;;  %5382 = vmatpush3.bf16.msra.mxu1 %v1518_v29  ;;  %v1013_v22 = vrot.slane %v6119_v37, 1  ;;  %v1012_v29 = vsel %vm987_vm3, %v1009_v59, %v1011_v20 }
  0x49   : > { %5345 = vmatprep.mubr.msk.bf16.mxu0 %vm530_vm2, %v990_v25  ;;  %5311 = vmatprep.mubr.msk.bf16.mxu1 %vm530_vm2, %v6092_v15  ;;  %v995_v15 = vrot.slane %v6123_v39, 1  ;;  %v6370_v25 = vld [vmem:[%s6068_s13 + $0x50] sm:$0xff]  }
  0x4a   : > { %5617 = vmatprep.subr.msk.bf16.mxu1 %vm585_vm0, %v6240_v6 }
  0x4b   : > { %v996_v33 = vsel %vm987_vm3, %v993_v27, %v995_v15  ;;  %v998_v35 = vsel %vm987_vm3, %v995_v15, %v997_v34  ;;  %v1014_v27 = vsel %vm987_vm3, %v1011_v20, %v1013_v22  ;;  %v1017_v15 = vrot.slane %v6155_v62, 1 }
  0x4f   : > { %5312 = vmatmul.mubr.msk.bf16.gmra.mxu1 %vm530_vm2, %v6106_v28  ;;  %v999_v28 = vrot.slane %v6165_v10, 1 }
  0x50   : > { %5346 = vmatmul.mubr.msk.bf16.vlgmr.msra.gmra.mxu0 %vm530_vm2, %v992_v45  ;;  %5315 = vmatprep.mubr.msk.bf16.mxu1 %vm530_vm2, %v6123_v39  ;;  %v2202_v45 = vrot.slane %v6370_v25, 2 }
  0x51   : > { %5420 = vmatpush3.bf16.msra.mxu0 %v1964_v31  ;;  %5349 = vmatprep.mubr.msk.bf16.mxu0 %vm530_vm2, %v994_v32  ;;  %v1000_v39 = vsel %vm987_vm3, %v997_v34, %v999_v28  ;;  %v1002_v41 = vsel %vm987_vm3, %v999_v28, %v1001_v36  ;;  %v1295_v34 = vld [vmem:[%s6068_s13 + $0x8] sm:$0xe] }
  0x52   : > { %5618 = vmatprep.subr.msk.bf16.mxu0 %vm585_vm0, %v6256_v7  ;;  %v6381_v31 = vsel %vm2184_vm4, %v2200_v18, %v2202_v45  ;;  %v6399_v28 = vld [vmem:[%s6068_s13 + $0x68] sm:$0xff]  }
  0x57   : > { %5316 = vmatmul.mubr.msk.bf16.gmra.mxu1 %vm530_vm2, %v6140_v50  ;;  %v1005_v50 = vrot.slane %v6194_v40, 1 }
  0x58   : > { %5350 = vmatmul.mubr.msk.bf16.gmra.mxu0 %vm530_vm2, %v996_v33  ;;  %5319 = vmatprep.mubr.msk.bf16.mxu1 %vm530_vm2, %v6165_v10  ;;  %v6290_v10 = vld [vmem:[%s6068_s13 + $0xc] sm:$0xf]  ;;  %v6395_v33 = vld [vmem:[%s6068_s13 + $0x60] sm:$0xff]  }
  0x59   : > { %5353 = vmatprep.mubr.msk.bf16.mxu0 %vm530_vm2, %v998_v35  ;;  %v4960_v47 = vcombine.low %v2179_v43, %v6290_v10 }
  0x5b   : > { %v2185_v52 = vrot.slane %v4960_v47, 2  ;;  %v1748_v47 = vshrl.u32 %v6293_v46, 16 }
  0x5d   : > { %v6314_v56 = vsel %vm2184_vm4, %v2185_v52, %v2186_v53  ;;  %v1427_v52 = vrot.slane %v6293_v46, 1  ;;  %v6422_v53 = vld [vmem:[%s6068_s13 + $0x70] sm:$0xff]  }
  0x5e   : > { %v2210_v4 = vrot.slane %v6422_v53, 2 }
  0x5f   : > { %5320 = vmatmul.mubr.msk.bf16.gmra.mxu1 %vm530_vm2, %v6177_v23  ;;  %v1006_v23 = vsel %vm987_vm3, %v1003_v42, %v1005_v50  ;;  %v1019_v42 = vrot.slane %v6168_v11, 1 }
  0x60   : > { %5354 = vmatmul.mubr.msk.bf16.gmra.mxu0 %vm530_vm2, %v1000_v39  ;;  %5323 = vmatprep.mubr.msk.bf16.mxu1 %vm530_vm2, %v6191_v38  ;;  %v6306_v38 = vld [vmem:[%s6068_s13 + $0x28] sm:$0xff]   ;;  %v2206_v39 = vrot.slane %v6395_v33, 2 }
  0x61   : > { %5357 = vmatprep.mubr.msk.bf16.mxu0 %vm530_vm2, %v1002_v41  ;;  %v2192_v0 = vrot.slane %v6306_v38, 2  ;;  %v4904_v41 = vcombine.low %v1295_v34, %v6290_v10  ;;  %v1020_v54 = vsel %vm987_vm3, %v1017_v15, %v1019_v42  ;;  %v6455_v34 = vld [vmem:[%s6068_s13 + $0x88] sm:$0xff]  }
  0x63   : > { %v6339_v3 = vsel %vm2184_vm4, %v2190_v57, %v2192_v0  ;;  %v6347_v9 = vsel %vm2184_vm4, %v2192_v0, %v2194_v1  ;;  %v1740_v43 = vshrl.u32 %v4904_v41, 16  ;;  %v1743_v10 = vshll.u32 %v4904_v41, 16 }
  0x64   : > { %v1022_v57 = vsel %vm987_vm3, %v1019_v42, %v1021_v17  ;;  %v1750_v0 = vrot.slane %v1748_v47, 1  ;;  %v1757_v17 = vshrl.u32 %v6298_v49, 16  ;;  %v1778_v47 = vshll.u32 %v6306_v38, 16 }
  0x67   : > { %5324 = vmatmul.mubr.msk.bf16.gmra.mxu1 %vm530_vm2, %v6194_v40  ;;  %v1008_v40 = vsel %vm987_vm3, %v1005_v50, %v1007_v58 }
  0x68   : > { %5358 = vmatmul.mubr.msk.bf16.gmra.mxu0 %vm530_vm2, %v1004_v48  ;;  %5327 = vmatprep.mubr.msk.bf16.mxu1 %vm530_vm2, %v6086_v13  ;;  %v1010_v13 = vsel %vm987_vm3, %v1007_v58, %v1009_v59  ;;  %v1751_v48 = vshll.u32 %v6293_v46, 16  ;;  %v6429_v58 = vld [vmem:[%s6068_s13 + $0x78] sm:$0xff]   ;;  %v1745_v59 = vrot.slane %v1743_v10, 2  ;;  %v1775_v10 = vshrl.u32 %v6306_v38, 16 }
  0x69   : > { %5361 = vmatprep.mubr.msk.bf16.mxu0 %vm530_vm2, %v1006_v23  ;;  %v1426_v23 = vrot.slane %v4904_v41, 1 }
  0x6a   : > { %v1753_v1 = vrot.slane %v1751_v48, 2 }
  0x6b   : > { %v1428_v46 = vsel %vm987_vm3, %v1426_v23, %v1427_v52  ;;  %v1784_v23 = vshrl.u32 %v6311_v55, 16 }
  0x6c   : > { %v1754_v20 = vor.u32 %v1753_v1, %v1750_v0  ;;  %v2715_v0 = vsel %vm585_vm0, %v6256_v7, 0  ;;  %v1777_v1 = vrot.slane %v1775_v10, 1 }
  0x6f   : > { %5328 = vmatmul.mubr.msk.bf16.gmra.mxu1 %vm530_vm2, %v6089_v14  ;;  %v2204_v14 = vrot.slane %v6374_v30, 2 }
  0x70   : > { %5362 = vmatmul.mubr.msk.bf16.gmra.mxu0 %vm530_vm2, %v1008_v40  ;;  %5331 = vmatprep.mubr.msk.bf16.mxu1 %vm530_vm2, %v6101_v24  ;;  %v1015_v24 = vrot.slane %v6128_v44, 1 }
  0x71   : > { %5365 = vmatprep.mubr.msk.bf16.mxu0 %vm530_vm2, %v1010_v13  ;;  %v6386_v32 = vsel %vm2184_vm4, %v2202_v45, %v2204_v14  ;;  %v1760_v13 = vshll.u32 %v6298_v49, 16  ;;  %v1431_v45 = vrot.slane %v6302_v51, 1 }
  0x72   : > { %v1016_v35 = vsel %vm987_vm3, %v1013_v22, %v1015_v24  ;;  %v1018_v36 = vsel %vm987_vm3, %v1015_v24, %v1017_v15  ;;  %v1766_v22 = vshrl.u32 %v6302_v51, 16  ;;  %v1759_v24 = vrot.slane %v1757_v17, 1 }
  0x73   : > { %v1762_v15 = vrot.slane %v1760_v13, 2  ;;  %v1786_v17 = vrot.slane %v1784_v23, 1 }
  0x77   : > { %5332 = vmatmul.mubr.msk.bf16.gmra.mxu1 %vm530_vm2, %v6119_v37  ;;  %v2208_v37 = vrot.slane %v6399_v28, 2 }
  0x78   : > { %5366 = vmatmul.mubr.msk.bf16.gmra.mxu0 %vm530_vm2, %v1012_v29  ;;  %5335 = vmatprep.mubr.msk.bf16.mxu1 %vm530_vm2, %v6128_v44  ;;  %v6407_v44 = vsel %vm2184_vm4, %v2204_v14, %v2206_v39  ;;  %v1769_v29 = vshll.u32 %v6302_v51, 16  ;;  %v6452_v14 = vld [vmem:[%s6068_s13 + $0x80] sm:$0xff]  }
  0x79   : > { %5369 = vmatprep.mubr.msk.bf16.mxu0 %vm530_vm2, %v1014_v27  ;;  %v6412_v50 = vsel %vm2184_vm4, %v2206_v39, %v2208_v37  ;;  %v6436_v40 = vsel %vm2184_vm4, %v2208_v37, %v2210_v4  ;;  %v1429_v27 = vrot.slane %v6298_v49, 1  ;;  %v2214_v39 = vrot.slane %v6452_v14, 2 }
  0x7a   : > { %v2216_v37 = vrot.slane %v6455_v34, 2  ;;  %v2277_v49 = vsel %vm585_vm0, %v6240_v6, 0 }
  0x7b   : > { %v1430_v41 = vsel %vm987_vm3, %v1427_v52, %v1429_v27  ;;  %v1432_v51 = vsel %vm987_vm3, %v1429_v27, %v1431_v45  ;;  %v1787_v52 = vshll.u32 %v6311_v55, 16  ;;  %v1793_v27 = vshrl.u32 %v6326_v61, 16 }
  0x7c   : > { %v6478_v6 = vsel %vm2184_vm4, %v2214_v39, %v2216_v37 }
  0x7f   : > { %5336 = vmatmul.mubr.msk.bf16.gmra.mxu1 %vm530_vm2, %v6155_v62  ;;  %v1742_v62 = vrot.slane %v1740_v43, 1  ;;  %v1763_v43 = vor.u32 %v1762_v15, %v1759_v24 }
  0x80   : > { %5370 = vmatmul.mubr.msk.bf16.gmra.mxu0 %vm530_vm2, %v1016_v35  ;;  %5339 = vmatprep.mubr.msk.bf16.mxu1 %vm530_vm2, %v6168_v11  ;;  %v2212_v11 = vrot.slane %v6429_v58, 2  ;;  %v1768_v35 = vrot.slane %v1766_v22, 1 }
  0x81   : > { %5373 = vmatprep.mubr.msk.bf16.mxu0 %vm530_vm2, %v1018_v36  ;;  %v1746_v18 = vor.u32 %v1745_v59, %v1742_v62  ;;  %v1771_v36 = vrot.slane %v1769_v29, 2  ;;  %v6487_v62 = vld [vmem:[%s6068_s13 + $0x90] sm:$0xff]   ;;  %v1764_v59 = vsel %vm1738_vm5, %v1754_v20, %v1763_v43 }
  0x82   : > { %v6442_v16 = vsel %vm2184_vm4, %v2210_v4, %v2212_v11  ;;  %v6467_v42 = vsel %vm2184_vm4, %v2212_v11, %v2214_v39  ;;  %v1780_v4 = vrot.slane %v1778_v47, 2  ;;  %v6495_v11 = vld [vmem:[%s6068_s13 + $0x98] ss:$0 sps:$4 sm:$0x33]   ;;  %v1439_v39 = vrot.slane %v6336_v2, 1 }
  0x83   : > { %v1772_v48 = vor.u32 %v1771_v36, %v1768_v35  ;;  %v1805_v35 = vshll.u32 %v6336_v2, 16  ;;  %v1437_v36 = vrot.slane %v6326_v61, 1 }
  0x84   : > { %v1781_v29 = vor.u32 %v1780_v4, %v1777_v1  ;;  %v6540_v1 = vld [vmem:[%s6068_s13 + $0x14] sm:$0xf]  ;;  %v3376_v4 = vld [vmem:[%s6068_s13 + $0x10] sm:$0x8] }
  0x85   : > { %v1807_v10 = vrot.slane %v1805_v35, 2  ;;  %v1440_v23 = vsel %vm987_vm3, %v1437_v36, %v1439_v39 }
  0x87   : > { %5340 = vmatmul.mubr.msk.bf16.gmra.mxu1 %vm530_vm2, %v6182_v26  ;;  %v1755_v26 = vsel %vm1738_vm5, %v1746_v18, %v1754_v20  ;;  %v6503_v18 = vld [vmem:[%s8812_s1 + $0x20] sm:$0xf]  ;;  %v2220_v20 = vrot.slane %v6495_v11, 2 }
  0x88   : > { %5374 = vmatmul.mubr.msk.bf16.gmra.mxu0 %vm530_vm2, %v1020_v54  ;;  %5383 = vmatprep.mubr.msk.bf16.mxu1 %vm530_vm2, %v1428_v46  ;;  %v1433_v54 = vrot.slane %v6306_v38, 1  ;;  %v1773_v46 = vsel %vm1738_vm5, %v1763_v43, %v1772_v48  ;;  %v1789_v38 = vrot.slane %v1787_v52, 2 }
  0x89   : > { %5377 = vmatprep.mubr.msk.bf16.mxu0 %vm530_vm2, %v1022_v57  ;;  %v1435_v57 = vrot.slane %v6311_v55, 1  ;;  %v2218_v55 = vrot.slane %v6487_v62, 2 }
  0x8a   : > { %v1434_v13 = vsel %vm987_vm3, %v1431_v45, %v1433_v54  ;;  %v1796_v45 = vshll.u32 %v6326_v61, 16  ;;  %v1790_v15 = vor.u32 %v1789_v38, %v1786_v17 }
  0x8b   : > { %v1436_v7 = vsel %vm987_vm3, %v1433_v54, %v1435_v57  ;;  %v6509_v22 = vsel %vm2184_vm4, %v2216_v37, %v2218_v55  ;;  %v6515_v24 = vsel %vm2184_vm4, %v2218_v55, %v2220_v20  ;;  %v1795_v37 = vrot.slane %v1793_v27, 1  ;;  %v6545_v55 = vld [vmem:[%s6068_s13 + $0x18] sm:$0xff]   ;;  %v6550_v27 = vld [vmem:[%s6068_s13 + $0x20] sm:$0xff]  }
  0x8c   : > { %v1438_v47 = vsel %vm987_vm3, %v1435_v57, %v1437_v36  ;;  %v1820_v54 = vshrl.u32 %v6370_v25, 16  ;;  %v1823_v57 = vshll.u32 %v6370_v25, 16  ;;  %v1829_v36 = vshrl.u32 %v6374_v30, 16 }
  0x8f   : > { %5384 = vmatmul.mubr.msk.bf16.vlgmr.msra.gmra.mxu1 %vm530_vm2, %v1430_v41  ;;  %v1782_v41 = vsel %vm1738_vm5, %v1772_v48, %v1781_v29  ;;  %v1814_v48 = vshll.u32 %v6344_v8, 16 }
  0x90   : > { %5378 = vmatmul.mubr.msk.bf16.gmra.mxu0 %vm530_vm2, %v6227_v5  ;;  %v6475_v5 = vld [vmem:[%s8812_s1 + $0x1c] sm:$0xf]  ;;  %5458 = vmatpush3.bf16.msra.mxu1 %v2277_v49  ;;  %v1798_v49 = vrot.slane %v1796_v45, 2  ;;  %v3383_v45 = vrot.slane %v6545_v55, 3 }
  0x91   : > { %5421 = vmatprep.mubr.msk.bf16.mxu0 %vm530_vm2, %v1755_v26  ;;  %5387 = vmatprep.mubr.msk.bf16.mxu1 %vm530_vm2, %v1432_v51  ;;  %v1802_v26 = vshrl.u32 %v6336_v2, 16  ;;  %v1791_v51 = vsel %vm1738_vm5, %v1781_v29, %v1790_v15  ;;  %v1811_v2 = vshrl.u32 %v6344_v8, 16  ;;  %v1816_v38 = vrot.slane %v1814_v48, 2 }
  0x92   : > { %5619 = vmatprep.subr.msk.bf16.mxu1 %vm585_vm0, %v6475_v5  ;;  %v1799_v61 = vor.u32 %v1798_v49, %v1795_v37  ;;  %v1825_v29 = vrot.slane %v1823_v57, 2  ;;  %v1838_v49 = vshrl.u32 %v6395_v33, 16 }
  0x93   : > { %v1804_v43 = vrot.slane %v1802_v26, 1  ;;  %v1813_v17 = vrot.slane %v1811_v2, 1  ;;  %v8816_v26 = vrot.slane %v6550_v27, 3 }
  0x95   : > { %v1808_v52 = vor.u32 %v1807_v10, %v1804_v43  ;;  %v1817_v35 = vor.u32 %v1816_v38, %v1813_v17  ;;  %v6569_v43 = vsel %vm3381_vm6, %v3383_v45, %v8816_v26  ;;  %v1445_v10 = vrot.slane %v6374_v30, 1 }
  0x96   : > { %v1856_v17 = vshrl.u32 %v6422_v53, 16  ;;  %v1859_v38 = vshll.u32 %v6422_v53, 16 }
  0x97   : > { %5388 = vmatmul.mubr.msk.bf16.gmra.mxu1 %vm530_vm2, %v1434_v13  ;;  %v5035_v13 = vcombine.low %v3376_v4, %v6540_v1  ;;  %v1809_v20 = vsel %vm1738_vm5, %v1799_v61, %v1808_v52 }
  0x98   : > { %5422 = vmatmul.mubr.msk.bf16.vlgmr.msra.gmra.mxu0 %vm530_vm2, %v1764_v59  ;;  %5391 = vmatprep.mubr.msk.bf16.mxu1 %vm530_vm2, %v1436_v7  ;;  %v1441_v59 = vrot.slane %v6344_v8, 1  ;;  %v1822_v7 = vrot.slane %v1820_v54, 1  ;;  %v1840_v54 = vrot.slane %v1838_v49, 1  ;;  %v1877_v49 = vshll.u32 %v6452_v14, 16 }
  0x99   : > { %5496 = vmatpush3.bf16.msra.mxu0 %v2715_v0  ;;  %5425 = vmatprep.mubr.msk.bf16.mxu0 %vm530_vm2, %v1773_v46  ;;  %v1443_v0 = vrot.slane %v6370_v25, 1  ;;  %v1800_v46 = vsel %vm1738_vm5, %v1790_v15, %v1799_v61  ;;  %v3382_v25 = vrot.slane %v5035_v13, 3  ;;  %v1831_v61 = vrot.slane %v1829_v36, 1 }
  0x9a   : > { %5620 = vmatprep.subr.msk.bf16.mxu0 %vm585_vm0, %v6503_v18  ;;  %v1442_v8 = vsel %vm987_vm3, %v1439_v39, %v1441_v59  ;;  %v1826_v39 = vor.u32 %v1825_v29, %v1822_v7  ;;  %v1451_v13 = vrot.slane %v6422_v53, 1  ;;  %v1868_v53 = vshll.u32 %v6429_v58, 16 }
  0x9b   : > { %v1444_v15 = vsel %vm987_vm3, %v1441_v59, %v1443_v0  ;;  %v6561_v37 = vsel %vm3381_vm6, %v3382_v25, %v3383_v45  ;;  %v1446_v59 = vsel %vm987_vm3, %v1443_v0, %v1445_v10  ;;  %v1449_v0 = vrot.slane %v6399_v28, 1 }
  0x9c   : > { %v1827_v48 = vsel %vm1738_vm5, %v1817_v35, %v1826_v39  ;;  %v1858_v25 = vrot.slane %v1856_v17, 1  ;;  %v1861_v45 = vrot.slane %v1859_v38, 2  ;;  %v1459_v17 = vrot.slane %v6487_v62, 1 }
  0x9f   : > { %5392 = vmatmul.mubr.msk.bf16.gmra.mxu1 %vm530_vm2, %v1438_v47  ;;  %v1447_v47 = vrot.slane %v6395_v33, 1 }
  0xa0   : > { %5426 = vmatmul.mubr.msk.bf16.gmra.mxu0 %vm530_vm2, %v1782_v41  ;;  %5395 = vmatprep.mubr.msk.bf16.mxu1 %vm530_vm2, %v1440_v23  ;;  %v1832_v41 = vshll.u32 %v6374_v30, 16  ;;  %v1818_v23 = vsel %vm1738_vm5, %v1808_v52, %v1817_v35  ;;  %v1847_v30 = vshrl.u32 %v6399_v28, 16  ;;  %v1452_v35 = vsel %vm987_vm3, %v1449_v0, %v1451_v13 }
  0xa1   : > { %5429 = vmatprep.mubr.msk.bf16.mxu0 %vm530_vm2, %v1791_v51  ;;  %v1841_v51 = vshll.u32 %v6395_v33, 16  ;;  %v1448_v4 = vsel %vm987_vm3, %v1445_v10, %v1447_v47  ;;  %v1850_v33 = vshll.u32 %v6399_v28, 16  ;;  %v1865_v28 = vshrl.u32 %v6429_v58, 16 }
  0xa2   : > { %v1834_v2 = vrot.slane %v1832_v41, 2  ;;  %v1849_v7 = vrot.slane %v1847_v30, 1  ;;  %v1862_v41 = vor.u32 %v1861_v45, %v1858_v25  ;;  %v1455_v10 = vrot.slane %v6452_v14, 1  ;;  %v5801_v25 = vld [vmem:[%s6068_s13 + $0x98] ss:$0 sps:$4 sm:$0x11]  }
  0xa3   : > { %v1843_v57 = vrot.slane %v1841_v51, 2  ;;  %v1852_v29 = vrot.slane %v1850_v33, 2  ;;  %v1453_v51 = vrot.slane %v6429_v58, 1  ;;  %v1883_v58 = vshrl.u32 %v6455_v34, 16 }
  0xa4   : > { %v1892_v30 = vshrl.u32 %v6487_v62, 16  ;;  %v1895_v33 = vshll.u32 %v6487_v62, 16  ;;  %v1901_v62 = vshrl.u32 %v6495_v11, 16 }
  0xa5   : > { %v1844_v52 = vor.u32 %v1843_v57, %v1840_v54  ;;  %v1853_v36 = vor.u32 %v1852_v29, %v1849_v7  ;;  %v1879_v54 = vrot.slane %v1877_v49, 2  ;;  %v1454_v57 = vsel %vm987_vm3, %v1451_v13, %v1453_v51 }
  0xa6   : > { %v1894_v7 = vrot.slane %v1892_v30, 1  ;;  %v1897_v29 = vrot.slane %v1895_v33, 2  ;;  %v6680_v30 = vld [vmem:[%s6068_s13 + $0x48] sm:$0xff]  }
  0xa7   : > { %5396 = vmatmul.mubr.msk.bf16.gmra.mxu1 %vm530_vm2, %v1442_v8 }
  0xa8   : > { %5430 = vmatmul.mubr.msk.bf16.gmra.mxu0 %vm530_vm2, %v1800_v46  ;;  %5399 = vmatprep.mubr.msk.bf16.mxu1 %vm530_vm2, %v1444_v15  ;;  %v1835_v46 = vor.u32 %v1834_v2, %v1831_v61  ;;  %v1450_v15 = vsel %vm987_vm3, %v1447_v47, %v1449_v0  ;;  %v1854_v47 = vsel %vm1738_vm5, %v1844_v52, %v1853_v36  ;;  %v1870_v61 = vrot.slane %v1868_v53, 2 }
  0xa9   : > { %5433 = vmatprep.mubr.msk.bf16.mxu0 %vm530_vm2, %v1809_v20  ;;  %v1863_v2 = vsel %vm1738_vm5, %v1853_v36, %v1862_v41  ;;  %v1885_v0 = vrot.slane %v1883_v58, 1  ;;  %v1461_v36 = vrot.slane %v5801_v25, 1  ;;  %v6664_v58 = vld [vmem:[%s6068_s13 + $0x38] sm:$0xff]  }
  0xaa   : > { %v1836_v20 = vsel %vm1738_vm5, %v1826_v39, %v1835_v46  ;;  %v1845_v8 = vsel %vm1738_vm5, %v1835_v46, %v1844_v52  ;;  %v1874_v39 = vshrl.u32 %v6452_v14, 16  ;;  %v1886_v14 = vshll.u32 %v6455_v34, 16 }
  0xab   : > { %v1457_v52 = vrot.slane %v6455_v34, 1 }
  0xac   : > { %v1888_v13 = vrot.slane %v1886_v14, 2  ;;  %v6676_v14 = vld [vmem:[%s6068_s13 + $0x40] sm:$0xff]  }
  0xad   : > { %v1460_v45 = vsel %vm987_vm3, %v1457_v52, %v1459_v17 }
  0xae   : > { %v1889_v34 = vor.u32 %v1888_v13, %v1885_v0 }
  0xaf   : > { %5400 = vmatmul.mubr.msk.bf16.gmra.mxu1 %vm530_vm2, %v1446_v59  ;;  %v1456_v59 = vsel %vm987_vm3, %v1453_v51, %v1455_v10 }
  0xb0   : > { %5434 = vmatmul.mubr.msk.bf16.gmra.mxu0 %vm530_vm2, %v1818_v23  ;;  %5403 = vmatprep.mubr.msk.bf16.mxu1 %vm530_vm2, %v1448_v4  ;;  %v1867_v23 = vrot.slane %v1865_v28, 1  ;;  %v2492_v28 = vld [vmem:[%s6068_s13 + $0x10] sm:$0xc] }
  0xb1   : > { %5437 = vmatprep.mubr.msk.bf16.mxu0 %vm530_vm2, %v1827_v48  ;;  %v1876_v48 = vrot.slane %v1874_v39, 1  ;;  %v6631_v51 = vcombine.low %v2492_v28, %v6540_v1 }
  0xb2   : > { %v1871_v4 = vor.u32 %v1870_v61, %v1867_v23  ;;  %v2624_v23 = vrot.slane %v6545_v55, 2 }
  0xb3   : > { %v1880_v46 = vor.u32 %v1879_v54, %v1876_v48  ;;  %v3161_v48 = vsel %vm585_vm0, %v6475_v5, 0  ;;  %v2626_v54 = vrot.slane %v6550_v27, 2  ;;  %v3474_v5 = vsel %vm585_vm0, %v6503_v18, 0 }
  0xb4   : > { %v1872_v38 = vsel %vm1738_vm5, %v1862_v41, %v1871_v4  ;;  %v1903_v41 = vrot.slane %v1901_v62, 1 }
  0xb5   : > { %v1890_v53 = vsel %vm1738_vm5, %v1880_v46, %v1889_v34 }
  0xb7   : > { %5404 = vmatmul.mubr.msk.bf16.gmra.mxu1 %vm530_vm2, %v1450_v15  ;;  %v1904_v15 = vshll.u32 %v6495_v11, 16 }
  0xb8   : > { %5438 = vmatmul.mubr.msk.bf16.gmra.mxu0 %vm530_vm2, %v1836_v20  ;;  %5407 = vmatprep.mubr.msk.bf16.mxu1 %vm530_vm2, %v1452_v35  ;;  %v1881_v20 = vsel %vm1738_vm5, %v1871_v4, %v1880_v46  ;;  %v1898_v35 = vor.u32 %v1897_v29, %v1894_v7 }
  0xb9   : > { %5441 = vmatprep.mubr.msk.bf16.mxu0 %vm530_vm2, %v1845_v8  ;;  %v1458_v8 = vsel %vm987_vm3, %v1455_v10, %v1457_v52  ;;  %v1906_v39 = vrot.slane %v1904_v15, 2  ;;  %v1462_v10 = vsel %vm987_vm3, %v1459_v17, %v1461_v36  ;;  %v2636_v17 = vrot.slane %v6680_v30, 2 }
  0xba   : > { %v1899_v49 = vsel %vm1738_vm5, %v1889_v34, %v1898_v35 }
  0xbb   : > { %v1907_v11 = vor.u32 %v1906_v39, %v1903_v41 }
  0xbd   : > { %v1908_v1 = vsel %vm1738_vm5, %v1898_v35, %v1907_v11 }
  0xbf   : > { %5408 = vmatmul.mubr.msk.bf16.gmra.mxu1 %vm530_vm2, %v1454_v57  ;;  %v2627_v57 = vsel %vm2184_vm4, %v2624_v23, %v2626_v54 }
  0xc0   : > { %5442 = vmatmul.mubr.msk.bf16.gmra.mxu0 %vm530_vm2, %v1854_v47  ;;  %5411 = vmatprep.mubr.msk.bf16.mxu1 %vm530_vm2, %v1456_v59  ;;  %v2623_v47 = vrot.slane %v6631_v51, 2  ;;  %v6658_v59 = vld [vmem:[%s6068_s13 + $0x30] sm:$0xff]  }
  0xc1   : > { %5445 = vmatprep.mubr.msk.bf16.mxu0 %vm530_vm2, %v1863_v2  ;;  %v6644_v2 = vld [vmem:[%s6068_s13 + $0x28] sm:$0xff]  }
  0xc2   : > { %v2625_v61 = vsel %vm2184_vm4, %v2623_v47, %v2624_v23 }
  0xc7   : > { %5412 = vmatmul.mubr.msk.bf16.gmra.mxu1 %vm530_vm2, %v1458_v8  ;;  %v6710_v8 = vld [vmem:[%s6068_s13 + $0x58] sm:$0xff]  }
  0xc8   : > { %5446 = vmatmul.mubr.msk.bf16.gmra.mxu0 %vm530_vm2, %v1872_v38  ;;  %5415 = vmatprep.mubr.msk.bf16.mxu1 %vm530_vm2, %v1460_v45  ;;  %v2640_v15 = vrot.slane %v6710_v8, 2 }
  0xc9   : > { %5449 = vmatprep.mubr.msk.bf16.mxu0 %vm530_vm2, %v1881_v20  ;;  %v6702_v20 = vld [vmem:[%s6068_s13 + $0x50] sm:$0xff]  }
  0xca   : > { %v2638_v45 = vrot.slane %v6702_v20, 2 }
  0xcc   : > { %v2639_v28 = vsel %vm2184_vm4, %v2636_v17, %v2638_v45 }
  0xcf   : > { %5416 = vmatmul.mubr.msk.bf16.gmra.mxu1 %vm530_vm2, %v1462_v10 }
  0xd0   : > { %5450 = vmatmul.mubr.msk.bf16.gmra.mxu0 %vm530_vm2, %v1890_v53  ;;  %5459 = vmatprep.mubr.msk.bf16.mxu1 %vm530_vm2, %v6314_v56  ;;  %v2628_v56 = vrot.slane %v6644_v2, 2  ;;  %v6734_v53 = vld [vmem:[%s6068_s13 + $0x60] sm:$0xff]  }
  0xd1   : > { %5453 = vmatprep.mubr.msk.bf16.mxu0 %vm530_vm2, %v1899_v49  ;;  %v6742_v49 = vld [vmem:[%s6068_s13 + $0x68] sm:$0xff]   ;;  %v2642_v11 = vrot.slane %v6734_v53, 2 }
  0xd2   : > { %v2629_v4 = vsel %vm2184_vm4, %v2626_v54, %v2628_v56 }
  0xd3   : > { %v2643_v54 = vsel %vm2184_vm4, %v2640_v15, %v2642_v11 }
  0xd7   : > { %5460 = vmatmul.mubr.msk.bf16.vlgmr.msra.gmra.mxu1 %vm530_vm2, %v6321_v60  ;;  %v2630_v60 = vrot.slane %v6658_v59, 2 }
  0xd8   : > { %5454 = vmatmul.mubr.msk.bf16.gmra.mxu0 %vm530_vm2, %v1908_v1  ;;  %5534 = vmatpush3.bf16.msra.mxu1 %v3161_v48  ;;  %v2644_v1 = vrot.slane %v6742_v49, 2 }
  0xd9   : > { %5497 = vmatprep.mubr.msk.bf16.mxu0 %vm530_vm2, %v2625_v61  ;;  %5463 = vmatprep.mubr.msk.bf16.mxu1 %vm530_vm2, %v6329_v63  ;;  %v2632_v63 = vrot.slane %v6664_v58, 2  ;;  %v2631_v18 = vsel %vm2184_vm4, %v2628_v56, %v2630_v60  ;;  %v6766_v56 = vld [vmem:[%s6068_s13 + $0x70] sm:$0xff]  }
  0xdb   : > { %v2633_v46 = vsel %vm2184_vm4, %v2630_v60, %v2632_v63 }
  0xdf   : > { %5464 = vmatmul.mubr.msk.bf16.gmra.mxu1 %vm530_vm2, %v6339_v3  ;;  %v2634_v3 = vrot.slane %v6676_v14, 2 }
  0xe0   : > { %5498 = vmatmul.mubr.msk.bf16.vlgmr.msra.gmra.mxu0 %vm530_vm2, %v2627_v57  ;;  %5467 = vmatprep.mubr.msk.bf16.mxu1 %vm530_vm2, %v6347_v9 }
  0xe1   : > { %5572 = vmatpush3.bf16.msra.mxu0 %v3474_v5  ;;  %5501 = vmatprep.mubr.msk.bf16.mxu0 %vm530_vm2, %v2629_v4  ;;  %v2635_v13 = vsel %vm2184_vm4, %v2632_v63, %v2634_v3  ;;  %v6774_v4 = vld [vmem:[%s6068_s13 + $0x78] sm:$0xff]   ;;  %v2646_v63 = vrot.slane %v6766_v56, 2 }
  0xe7   : > { %v6687_v52 = vpop.f32.mrf.mxu1  ;;  %5468 = vmatmul.mubr.msk.bf16.gmra.mxu1 %vm530_vm2, %v6351_v12  ;;  %v2637_v12 = vsel %vm2184_vm4, %v2634_v3, %v2636_v17  ;;  %v2648_v3 = vrot.slane %v6774_v4, 2 }
  0xe8   : > { %v6682_v33 = vpop.f32.mrf.mxu0  ;;  %5502 = vmatmul.mubr.msk.bf16.gmra.mxu0 %vm530_vm2, %v2631_v18  ;;  %5471 = vmatprep.mubr.msk.bf16.mxu1 %vm530_vm2, %v6357_v19 }
  0xe9   : > { %5505 = vmatprep.mubr.msk.bf16.mxu0 %vm530_vm2, %v2633_v46  ;;  %v6696_v38 = vpop.f32.mrf.mxu1 }
  0xea   : > { %v6691_v9 = vpop.f32.mrf.mxu0 }
  0xeb   : > { %v6704_v7 = vpop.f32.mrf.mxu1 }
  0xec   : > { %v6698_v0 = vpop.f32.mrf.mxu0 }
  0xed   : > { %v6712_v25 = vpop.f32.mrf.mxu1 }
  0xee   : > { %v6706_v29 = vpop.f32.mrf.mxu0 }
  0xef   : > { %v6719_v34 = vpop.f32.mrf.mxu1  ;;  %5472 = vmatmul.mubr.msk.bf16.gmra.mxu1 %vm530_vm2, %v6362_v21  ;;  %v2641_v21 = vsel %vm2184_vm4, %v2638_v45, %v2640_v15  ;;  %v6798_v45 = vld [vmem:[%s6068_s13 + $0x80] sm:$0xff]  }
  0xf0   : > { %v6714_v19 = vpop.f32.mrf.mxu0  ;;  %5506 = vmatmul.mubr.msk.bf16.gmra.mxu0 %vm530_vm2, %v2635_v13  ;;  %5475 = vmatprep.mubr.msk.bf16.mxu1 %vm530_vm2, %v6381_v31  ;;  %8858 = vst [vmem:[#allocation17_spill] sm:$0xff] %v6798_v45 }
  0xf1   : > { %5509 = vmatprep.mubr.msk.bf16.mxu0 %vm530_vm2, %v2637_v12  ;;  %v6728_v35 = vpop.f32.mrf.mxu1  ;;  %v2647_v12 = vsel %vm2184_vm4, %v2644_v1, %v2646_v63 }
  0xf2   : > { %v6723_v62 = vpop.f32.mrf.mxu0 }
  0xf3   : > { %v6736_v41 = vpop.f32.mrf.mxu1 }
  0xf4   : > { %v6730_v36 = vpop.f32.mrf.mxu0  ;;  %8850 = vst [vmem:[#allocation9_spill] sm:$0xff] %v6736_v41 }
  0xf5   : > { %v6744_v10 = vpop.f32.mrf.mxu1 }
  0xf6   : > { %v6738_v39 = vpop.f32.mrf.mxu0  ;;  %8851 = vst [vmem:[#allocation10_spill] sm:$0xff] %v6744_v10 }
  0xf7   : > { %v6751_v47 = vpop.f32.mrf.mxu1  ;;  %5476 = vmatmul.mubr.msk.bf16.gmra.mxu1 %vm530_vm2, %v6386_v32  ;;  %v2645_v32 = vsel %vm2184_vm4, %v2642_v11, %v2644_v1 }
  0xf8   : > { %v6746_v31 = vpop.f32.mrf.mxu0  ;;  %5510 = vmatmul.mubr.msk.bf16.gmra.mxu0 %vm530_vm2, %v2639_v28  ;;  %8852 = vst [vmem:[#allocation11_spill] sm:$0xff] %v6751_v47  ;;  %5479 = vmatprep.mubr.msk.bf16.mxu1 %vm530_vm2, %v6407_v44 }
  0xf9   : > { %5513 = vmatprep.mubr.msk.bf16.mxu0 %vm530_vm2, %v2641_v21  ;;  %v6760_v61 = vpop.f32.mrf.mxu1  ;;  %v6806_v21 = vld [vmem:[%s6068_s13 + $0x88] sm:$0xff]  }
  0xfa   : > { %v6755_v23 = vpop.f32.mrf.mxu0  ;;  %8853 = vst [vmem:[#allocation12_spill] sm:$0xff] %v6760_v61  ;;  %8860 = vst [vmem:[#allocation19_spill] sm:$0xff] %v6806_v21  ;;  %v6838_v61 = vld [vmem:[%s6068_s13 + $0x98] sm:$0xff]  }
  0xfb   : > { %v6768_v57 = vpop.f32.mrf.mxu1  ;;  %8862 = vst [vmem:[#allocation21_spill] sm:$0xff] %v6838_v61 }
  0xfc   : > { %v6762_v48 = vpop.f32.mrf.mxu0  ;;  %8854 = vst [vmem:[#allocation13_spill] sm:$0xff] %v6768_v57  ;;  %v6832_v57 = vld [vmem:[%s6068_s13 + $0x90] sm:$0xff]  }
  0xfd   : > { %v6776_v60 = vpop.f32.mrf.mxu1 }
  0xfe   : > { %v6770_v5 = vpop.f32.mrf.mxu0  ;;  %8855 = vst [vmem:[#allocation14_spill] sm:$0xff] %v6776_v60 }
  0xff   : > { %v6783_v18 = vpop.f32.mrf.mxu1  ;;  %5480 = vmatmul.mubr.msk.bf16.gmra.mxu1 %vm530_vm2, %v6412_v50  ;;  %v2649_v50 = vsel %vm2184_vm4, %v2646_v63, %v2648_v3  ;;  %v2652_v63 = vrot.slane %v6806_v21, 2 }
 0x100   : > { %v6778_v44 = vpop.f32.mrf.mxu0  ;;  %5514 = vmatmul.mubr.msk.bf16.gmra.mxu0 %vm530_vm2, %v2643_v54  ;;  %8856 = vst [vmem:[#allocation15_spill] sm:$0xff] %v6783_v18  ;;  %5483 = vmatprep.mubr.msk.bf16.mxu1 %vm530_vm2, %v6436_v40  ;;  %v2650_v40 = vrot.slane %v6798_v45, 2 }
 0x101   : > { %5517 = vmatprep.mubr.msk.bf16.mxu0 %vm530_vm2, %v2645_v32  ;;  %v6792_v17 = vpop.f32.mrf.mxu1 }
 0x102   : > { %v6787_v46 = vpop.f32.mrf.mxu0  ;;  %8857 = vst [vmem:[#allocation16_spill] sm:$0xff] %v6792_v17  ;;  %v2945_v17 = vshrl.u32 %v6545_v55, 16  ;;  %v2651_v60 = vsel %vm2184_vm4, %v2648_v3, %v2650_v40 }
 0x103   : > { %v6800_v15 = vpop.f32.mrf.mxu1 }
 0x104   : > { %v6794_v13 = vpop.f32.mrf.mxu0  ;;  %8859 = vst [vmem:[#allocation18_spill] sm:$0xff] %v6800_v15  ;;  %v2940_v15 = vshll.u32 %v6631_v51, 16 }
 0x105   : > { %v6808_v11 = vpop.f32.mrf.mxu1 }
 0x106   : > { %v6802_v28 = vpop.f32.mrf.mxu0  ;;  %8861 = vst [vmem:[#allocation20_spill] sm:$0xff] %v6808_v11  ;;  %v2942_v21 = vrot.slane %v2940_v15, 3 }
 0x107   : > { %v5309_v1 = vpop.f32.mrf.mxu1  ;;  %5484 = vmatmul.mubr.msk.bf16.gmra.mxu1 %vm530_vm2, %v6442_v16  ;;  %v2948_v16 = vshll.u32 %v6545_v55, 16 }
 0x108   : > { %v6810_v54 = vpop.f32.mrf.mxu0  ;;  %5518 = vmatmul.mubr.msk.bf16.gmra.mxu0 %vm530_vm2, %v2647_v12  ;;  %v848_v26 = vadd.f32 %v5309_v1, %v6682_v33  ;;  %5487 = vmatprep.mubr.msk.bf16.mxu1 %vm530_vm2, %v6467_v42  ;;  %v2653_v42 = vsel %vm2184_vm4, %v2650_v40, %v2652_v63  ;;  %v2654_v40 = vrot.slane %v6832_v57, 2 }
 0x109   : > { %5521 = vmatprep.mubr.msk.bf16.mxu0 %vm530_vm2, %v2649_v50  ;;  %v839_v12 = vpop.f32.mrf.mxu1  ;;  %v2937_v50 = vshrl.u32 %v6631_v51, 16 }
 0x10a   : > { %v6817_v32 = vpop.f32.mrf.mxu0  ;;  %v840_v18 = vadd.f32 %v839_v12, %v6691_v9  ;;  %v2947_v9 = vrot.slane %v2945_v17, 2  ;;  %v2950_v12 = vrot.slane %v2948_v16, 3 }
 0x10b   : > { %v5310_v33 = vpop.f32.mrf.mxu1  ;;  %v2939_v55 = vrot.slane %v2937_v50, 2 }
 0x10c   : > { %v6823_v11 = vpop.f32.mrf.mxu0  ;;  %v851_v47 = vadd.f32 %v5310_v33, %v6698_v0  ;;  %v2656_v33 = vrot.slane %v6838_v61, 2  ;;  %v2951_v16 = vor.u32 %v2950_v12, %v2947_v9 }
 0x10d   : > { %v842_v51 = vpop.f32.mrf.mxu1  ;;  %v2943_v50 = vor.u32 %v2942_v21, %v2939_v55 }
 0x10e   : > { %v6834_v1 = vpop.f32.mrf.mxu0  ;;  %v843_v3 = vadd.f32 %v842_v51, %v6706_v29  ;;  %v2957_v29 = vshll.u32 %v6550_v27, 16 }
 0x10f   : > { %v5313_v41 = vpop.f32.mrf.mxu1  ;;  %5488 = vmatmul.mubr.msk.bf16.gmra.mxu1 %vm530_vm2, %v6478_v6  ;;  %v2963_v6 = vshrl.u32 %v6644_v2, 16 }
 0x110   : > { %v5347_v10 = vpop.f32.mrf.mxu0  ;;  %5522 = vmatmul.mubr.msk.bf16.gmra.mxu0 %vm530_vm2, %v2651_v60  ;;  %v864_v60 = vadd.f32 %v5313_v41, %v6714_v19  ;;  %5491 = vmatprep.mubr.msk.bf16.mxu1 %vm530_vm2, %v6509_v22  ;;  %v2655_v41 = vsel %vm2184_vm4, %v2652_v63, %v2654_v40  ;;  %v5822_v22 = vld [vmem:[%s6068_s13 + $0xa0] ss:$0 sps:$4 sm:$0x33]   ;;  %v2959_v9 = vrot.slane %v2957_v29, 3  ;;  %v2975_v29 = vshll.u32 %v6658_v59, 16 }
 0x111   : > { %v6843_v45 = vadd.f32 %v5347_v10, %v848_v26  ;;  %5525 = vmatprep.mubr.msk.bf16.mxu0 %vm530_vm2, %v2653_v42  ;;  %v2954_v26 = vshrl.u32 %v6550_v27, 16  ;;  %v855_v10 = vpop.f32.mrf.mxu1  ;;  %v2966_v42 = vshll.u32 %v6644_v2, 16 }
 0x112   : > { %v1116_v0 = vpop.f32.mrf.mxu0  ;;  %v856_v51 = vadd.f32 %v855_v10, %v6723_v62  ;;  %v2952_v62 = vsel %vm2935_vm7, %v2943_v50, %v2951_v16 }
 0x113   : > { %8863 = vst [vmem:[#allocation22_spill] sm:$0xff] %v6843_v45  ;;  %v6851_v17 = vadd.f32 %v1116_v0, %v840_v18  ;;  %v5314_v18 = vpop.f32.mrf.mxu1  ;;  %v2956_v55 = vrot.slane %v2954_v26, 2  ;;  %v2968_v63 = vrot.slane %v2966_v42, 3  ;;  %v2972_v26 = vshrl.u32 %v6658_v59, 16 }
 0x114   : > { %v5348_v15 = vpop.f32.mrf.mxu0  ;;  %v867_v45 = vadd.f32 %v5314_v18, %v6730_v36  ;;  %v2981_v42 = vshrl.u32 %v6664_v58, 16 }
 0x115   : > { %8864 = vst [vmem:[#allocation23_spill] sm:$0xff] %v6851_v17  ;;  %v6860_v19 = vadd.f32 %v5348_v15, %v851_v47  ;;  %v2657_v17 = vsel %vm2184_vm4, %v2654_v40, %v2656_v33  ;;  %v858_v12 = vpop.f32.mrf.mxu1  ;;  %v2965_v47 = vrot.slane %v2963_v6, 2  ;;  %v2658_v40 = vrot.slane %v5822_v22, 2 }
 0x116   : > { %v1119_v0 = vpop.f32.mrf.mxu0  ;;  %v859_v10 = vadd.f32 %v858_v12, %v6738_v39  ;;  %v2960_v39 = vor.u32 %v2959_v9, %v2956_v55  ;;  %v2977_v12 = vrot.slane %v2975_v29, 3 }
 0x117   : > { %v6866_v21 = vadd.f32 %v1119_v0, %v843_v3  ;;  %v5317_v36 = vpop.f32.mrf.mxu1  ;;  %5492 = vmatmul.mubr.msk.bf16.gmra.mxu1 %vm530_vm2, %v6515_v24  ;;  %v2659_v18 = vsel %vm2184_vm4, %v2656_v33, %v2658_v40 }
 0x118   : > { %v5351_v61 = vpop.f32.mrf.mxu0  ;;  %5526 = vmatmul.mubr.msk.bf16.gmra.mxu0 %vm530_vm2, %v2655_v41  ;;  %v880_v50 = vadd.f32 %v5317_v36, %v6746_v31  ;;  %5535 = vmatprep.mubr.msk.bf16.mxu1 %vm530_vm2, %v2952_v62  ;;  %v2984_v41 = vshll.u32 %v6664_v58, 16  ;;  %v2961_v9 = vsel %vm2935_vm7, %v2951_v16, %v2960_v39 }
 0x119   : > { %v6871_v15 = vadd.f32 %v5351_v61, %v864_v60  ;;  %5529 = vmatprep.mubr.msk.bf16.mxu0 %vm530_vm2, %v2657_v17  ;;  %v871_v61 = vpop.f32.mrf.mxu1  ;;  %v2969_v17 = vor.u32 %v2968_v63, %v2965_v47 }
 0x11a   : > { %v1132_v3 = vpop.f32.mrf.mxu0  ;;  %v872_v24 = vadd.f32 %v871_v61, %v6755_v23  ;;  %v2986_v36 = vrot.slane %v2984_v41, 3 }
 0x11b   : > { %v6879_v6 = vadd.f32 %v1132_v3, %v856_v51  ;;  %v5318_v0 = vpop.f32.mrf.mxu1  ;;  %v2974_v51 = vrot.slane %v2972_v26, 2  ;;  %v2970_v23 = vsel %vm2935_vm7, %v2960_v39, %v2969_v17  ;;  %v3387_v3 = vrot.slane %v6644_v2, 3 }
 0x11c   : > { %v5352_v60 = vpop.f32.mrf.mxu0  ;;  %v883_v62 = vadd.f32 %v5318_v0, %v6762_v48  ;;  %v8865_v0 = vrot.slane %v6550_v27, 3 }
 0x11d   : > { %v6885_v22 = vadd.f32 %v5352_v60, %v867_v45  ;;  %v874_v47 = vpop.f32.mrf.mxu1  ;;  %v2983_v45 = vrot.slane %v2981_v42, 2  ;;  %v2978_v16 = vor.u32 %v2977_v12, %v2974_v51  ;;  %v2999_v60 = vshrl.u32 %v6680_v30, 16 }
 0x11e   : > { %v1135_v31 = vpop.f32.mrf.mxu0  ;;  %v875_v33 = vadd.f32 %v874_v47, %v6770_v5  ;;  %v2990_v5 = vshrl.u32 %v6676_v14, 16  ;;  %v3002_v42 = vshll.u32 %v6680_v30, 16 }
 0x11f   : > { %v6889_v55 = vadd.f32 %v1135_v31, %v859_v10  ;;  %v5321_v48 = vpop.f32.mrf.mxu1  ;;  %5536 = vmatmul.mubr.msk.bf16.vlgmr.msra.gmra.mxu1 %vm530_vm2, %v2961_v9  ;;  %v3388_v31 = vsel %vm3381_vm6, %v8865_v0, %v3387_v3 }
 0x120   : > { %v5355_v63 = vpop.f32.mrf.mxu0  ;;  %5530 = vmatmul.mubr.msk.bf16.gmra.mxu0 %vm530_vm2, %v2659_v18  ;;  %v896_v26 = vadd.f32 %v5321_v48, %v6778_v44  ;;  %5539 = vmatprep.mubr.msk.bf16.mxu1 %vm530_vm2, %v2970_v23  ;;  %v2979_v18 = vsel %vm2935_vm7, %v2969_v17, %v2978_v16  ;;  %v2992_v9 = vrot.slane %v2990_v5, 2  ;;  %v3391_v48 = vrot.slane %v6664_v58, 3 }
 0x121   : > { %v6895_v40 = vadd.f32 %v5355_v63, %v880_v50  ;;  %5573 = vmatprep.mubr.msk.bf16.mxu0 %vm530_vm2, %v6561_v37  ;;  %v2993_v50 = vshll.u32 %v6676_v14, 16  ;;  %v887_v39 = vpop.f32.mrf.mxu1  ;;  %v2987_v37 = vor.u32 %v2986_v36, %v2983_v45  ;;  %v3004_v45 = vrot.slane %v3002_v42, 3 }
 0x122   : > { %v1148_v10 = vpop.f32.mrf.mxu0  ;;  %v888_v41 = vadd.f32 %v887_v39, %v6787_v46  ;;  %v3017_v39 = vshrl.u32 %v6710_v8, 16 }
 0x123   : > { %v6902_v29 = vadd.f32 %v1148_v10, %v872_v24  ;;  %v5322_v44 = vpop.f32.mrf.mxu1  ;;  %v2995_v47 = vrot.slane %v2993_v50, 3  ;;  %v2988_v46 = vsel %vm2935_vm7, %v2978_v16, %v2987_v37  ;;  %v3011_v10 = vshll.u32 %v6702_v20, 16 }
 0x124   : > { %v5356_v61 = vpop.f32.mrf.mxu0  ;;  %v899_v51 = vadd.f32 %v5322_v44, %v6794_v13  ;;  %v3389_v13 = vrot.slane %v6658_v59, 3 }
 0x125   : > { %v6910_v2 = vadd.f32 %v5356_v61, %v883_v62  ;;  %v890_v63 = vpop.f32.mrf.mxu1  ;;  %v3001_v62 = vrot.slane %v2999_v60, 2  ;;  %v3020_v61 = vshll.u32 %v6710_v8, 16 }
 0x126   : > { %v1151_v24 = vpop.f32.mrf.mxu0  ;;  %v891_v17 = vadd.f32 %v890_v63, %v6802_v28  ;;  %v2996_v28 = vor.u32 %v2995_v47, %v2992_v9  ;;  %v3390_v42 = vsel %vm3381_vm6, %v3387_v3, %v3389_v13 }
 0x127   : > { %v6917_v12 = vadd.f32 %v1151_v24, %v875_v33  ;;  %v5325_v36 = vpop.f32.mrf.mxu1  ;;  %5540 = vmatmul.mubr.msk.bf16.gmra.mxu1 %vm530_vm2, %v2979_v18  ;;  %v3005_v59 = vor.u32 %v3004_v45, %v3001_v62  ;;  %v3013_v18 = vrot.slane %v3011_v10, 3  ;;  %v3022_v3 = vrot.slane %v3020_v61, 3 }
 0x128   : > { %v5359_v23 = vpop.f32.mrf.mxu0  ;;  %5574 = vmatmul.mubr.msk.bf16.vlgmr.msra.gmra.mxu0 %vm530_vm2, %v6569_v43  ;;  %v3008_v43 = vshrl.u32 %v6702_v20, 16  ;;  %v912_v16 = vadd.f32 %v5325_v36, %v6810_v54  ;;  %5543 = vmatprep.mubr.msk.bf16.mxu1 %vm530_vm2, %v2988_v46  ;;  %v2997_v9 = vsel %vm2935_vm7, %v2987_v37, %v2996_v28  ;;  %v3026_v36 = vshrl.u32 %v6734_v53, 16 }
 0x129   : > { %v6923_v27 = vadd.f32 %v5359_v23, %v896_v26  ;;  %5577 = vmatprep.mubr.msk.bf16.mxu0 %vm530_vm2, %v3388_v31  ;;  %v903_v26 = vpop.f32.mrf.mxu1 }
 0x12a   : > { %v1164_v33 = vpop.f32.mrf.mxu0  ;;  %v904_v58 = vadd.f32 %v903_v26, %v6817_v32  ;;  %v3010_v24 = vrot.slane %v3008_v43, 2  ;;  %v3006_v32 = vsel %vm2935_vm7, %v2996_v28, %v3005_v59 }
 0x12b   : > { %v6932_v5 = vadd.f32 %v1164_v33, %v888_v41  ;;  %v5326_v44 = vpop.f32.mrf.mxu1  ;;  %v3392_v41 = vsel %vm3381_vm6, %v3389_v13, %v3391_v48 }
 0x12c   : > { %v5360_v50 = vpop.f32.mrf.mxu0  ;;  %v915_v0 = vadd.f32 %v5326_v44, %v6823_v11  ;;  %v3393_v11 = vrot.slane %v6676_v14, 3  ;;  %v3014_v45 = vor.u32 %v3013_v18, %v3010_v24  ;;  %v3035_v14 = vshrl.u32 %v6742_v49, 16 }
 0x12d   : > { %v6938_v60 = vadd.f32 %v5360_v50, %v899_v51  ;;  %v906_v47 = vpop.f32.mrf.mxu1  ;;  %v3019_v51 = vrot.slane %v3017_v39, 2  ;;  %v3028_v44 = vrot.slane %v3026_v36, 2  ;;  %v3056_v36 = vshll.u32 %v6774_v4, 16 }
 0x12e   : > { %v1167_v54 = vpop.f32.mrf.mxu0  ;;  %v907_v23 = vadd.f32 %v906_v47, %v6834_v1  ;;  %v3029_v1 = vshll.u32 %v6734_v53, 16  ;;  %v3394_v26 = vsel %vm3381_vm6, %v3391_v48, %v3393_v11  ;;  %v3015_v39 = vsel %vm2935_vm7, %v3005_v59, %v3014_v45 }
 0x12f   : > { %v6943_v31 = vadd.f32 %v1167_v54, %v891_v17  ;;  %v5329_v62 = vpop.f32.mrf.mxu1  ;;  %5544 = vmatmul.mubr.msk.bf16.gmra.mxu1 %vm530_vm2, %v2997_v9  ;;  %v3395_v17 = vrot.slane %v6680_v30, 3  ;;  %v3023_v10 = vor.u32 %v3022_v3, %v3019_v51  ;;  %v3044_v51 = vshrl.u32 %v6766_v56, 16 }
 0x130   : > { %v5363_v63 = vpop.f32.mrf.mxu0  ;;  %5578 = vmatmul.mubr.msk.bf16.gmra.mxu0 %vm530_vm2, %v3390_v42  ;;  %5547 = vmatprep.mubr.msk.bf16.mxu1 %vm530_vm2, %v3006_v32  ;;  %v3031_v54 = vrot.slane %v3029_v1, 3  ;;  %v3399_v32 = vrot.slane %v6710_v8, 3  ;;  %v3047_v3 = vshll.u32 %v6766_v56, 16 }
 0x131   : > { %v6949_v46 = vadd.f32 %v5363_v63, %v912_v16  ;;  %5581 = vmatprep.mubr.msk.bf16.mxu0 %vm530_vm2, %v3392_v41  ;;  %v919_v33 = vpop.f32.mrf.mxu1  ;;  %v3038_v16 = vshll.u32 %v6742_v49, 16  ;;  %v3396_v61 = vsel %vm3381_vm6, %v3393_v11, %v3395_v17  ;;  %v3024_v18 = vsel %vm2935_vm7, %v3014_v45, %v3023_v10 }
 0x132   : > { %v1180_v37 = vpop.f32.mrf.mxu0  ;;  %v920_v9 = vadd.f32 %v919_v33, %v6696_v38  ;;  %v3032_v38 = vor.u32 %v3031_v54, %v3028_v44  ;;  %v3053_v45 = vshrl.u32 %v6774_v4, 16 }
 0x133   : > { %v6955_v13 = vadd.f32 %v1180_v37, %v904_v58  ;;  %v5330_v30 = vpop.f32.mrf.mxu1  ;;  %v928_v58 = vadd.f32 %v5329_v62, %v6687_v52  ;;  %v3040_v48 = vrot.slane %v3038_v16, 3  ;;  %v3397_v52 = vrot.slane %v6702_v20, 3 }
 0x134   : > { %v5364_v43 = vpop.f32.mrf.mxu0  ;;  %v3046_v16 = vrot.slane %v3044_v51, 2  ;;  %v3055_v44 = vrot.slane %v3053_v45, 2 }
 0x135   : > { %v6962_v28 = vadd.f32 %v5364_v43, %v915_v0  ;;  %v922_v41 = vpop.f32.mrf.mxu1  ;;  %v3037_v0 = vrot.slane %v3035_v14, 2  ;;  %v3398_v33 = vsel %vm3381_vm6, %v3395_v17, %v3397_v52  ;;  %v3400_v14 = vsel %vm3381_vm6, %v3397_v52, %v3399_v32 }
 0x136   : > { %v1183_v50 = vpop.f32.mrf.mxu0  ;;  %v923_v8 = vadd.f32 %v922_v41, %v6712_v25  ;;  %v3058_v17 = vrot.slane %v3056_v36, 3 }
 0x137   : > { %v6968_v42 = vadd.f32 %v1183_v50, %v907_v23  ;;  %v5333_v59 = vpop.f32.mrf.mxu1  ;;  %5548 = vmatmul.mubr.msk.bf16.gmra.mxu1 %vm530_vm2, %v3015_v39  ;;  %v931_v23 = vadd.f32 %v5330_v30, %v6704_v7  ;;  %v3041_v20 = vor.u32 %v3040_v48, %v3037_v0  ;;  %v3033_v39 = vsel %vm2935_vm7, %v3023_v10, %v3032_v38  ;;  %v8866_v48 = vld [vmem:[#allocation9_spill] sm:$0xff] }
 0x138   : > { %v5367_v24 = vpop.f32.mrf.mxu0  ;;  %5582 = vmatmul.mubr.msk.bf16.gmra.mxu0 %vm530_vm2, %v3394_v26  ;;  %5551 = vmatprep.mubr.msk.bf16.mxu1 %vm530_vm2, %v3024_v18  ;;  %v3049_v26 = vrot.slane %v3047_v3, 3  ;;  %v944_v30 = vadd.f32 %v5333_v59, %v6719_v34  ;;  %v3401_v34 = vrot.slane %v6734_v53, 3  ;;  %v3403_v0 = vrot.slane %v6742_v49, 3 }
 0x139   : > { %v6973_v47 = vadd.f32 %v5367_v24, %v928_v58  ;;  %5585 = vmatprep.mubr.msk.bf16.mxu0 %vm530_vm2, %v3396_v61  ;;  %v935_v62 = vpop.f32.mrf.mxu1  ;;  %v3042_v25 = vsel %vm2935_vm7, %v3032_v38, %v3041_v20  ;;  %v3059_v53 = vor.u32 %v3058_v17, %v3055_v44  ;;  %v8871_v17 = vld [vmem:[#allocation12_spill] sm:$0xff] }
 0x13a   : > { %v1196_v63 = vpop.f32.mrf.mxu0  ;;  %v936_v54 = vadd.f32 %v935_v62, %v6728_v35  ;;  %v3050_v18 = vor.u32 %v3049_v26, %v3046_v16  ;;  %v8867_v35 = vld [vmem:[#allocation17_spill] sm:$0xff]  ;;  %v3402_v36 = vsel %vm3381_vm6, %v3399_v32, %v3401_v34 }
 0x13b   : > { %v6982_v11 = vadd.f32 %v1196_v63, %v920_v9  ;;  %v5334_v43 = vpop.f32.mrf.mxu1  ;;  %v3062_v59 = vshrl.u32 %v8867_v35, 16  ;;  %v3065_v63 = vshll.u32 %v8867_v35, 16 }
 0x13c   : > { %v5368_v37 = vpop.f32.mrf.mxu0  ;;  %v947_v9 = vadd.f32 %v5334_v43, %v8866_v48  ;;  %v3051_v43 = vsel %vm2935_vm7, %v3041_v20, %v3050_v18  ;;  %v3405_v20 = vrot.slane %v6766_v56, 3  ;;  %v3407_v48 = vrot.slane %v6774_v4, 3  ;;  %v8874_v4 = vld [vmem:[#allocation14_spill] sm:$0xff] }
 0x13d   : > { %v6988_v1 = vadd.f32 %v5368_v37, %v931_v23  ;;  %v938_v61 = vpop.f32.mrf.mxu1  ;;  %v8868_v23 = vld [vmem:[#allocation19_spill] sm:$0xff]  ;;  %v8869_v37 = vld [vmem:[#allocation10_spill] sm:$0xff] }
 0x13e   : > { %v1199_v7 = vpop.f32.mrf.mxu0  ;;  %v3071_v38 = vshrl.u32 %v8868_v23, 16  ;;  %v3074_v62 = vshll.u32 %v8868_v23, 16  ;;  %v939_v45 = vadd.f32 %v938_v61, %v8869_v37  ;;  %v3060_v61 = vsel %vm2935_vm7, %v3050_v18, %v3059_v53  ;;  %v8873_v37 = vld [vmem:[#allocation21_spill] sm:$0xff] }
 0x13f   : > { %v6993_v50 = vadd.f32 %v1199_v7, %v923_v8  ;;  %v5337_v24 = vpop.f32.mrf.mxu1  ;;  %5552 = vmatmul.mubr.msk.bf16.gmra.mxu1 %vm530_vm2, %v3033_v39  ;;  %v3404_v7 = vsel %vm3381_vm6, %v3401_v34, %v3403_v0  ;;  %v3067_v39 = vrot.slane %v3065_v63, 3  ;;  %v3083_v18 = vshll.u32 %v6832_v57, 16 }
 0x140   : > { %v5371_v58 = vpop.f32.mrf.mxu0  ;;  %5586 = vmatmul.mubr.msk.bf16.gmra.mxu0 %vm530_vm2, %v3398_v33  ;;  %5555 = vmatprep.mubr.msk.bf16.mxu1 %vm530_vm2, %v3042_v25  ;;  %v3073_v44 = vrot.slane %v3071_v38, 2  ;;  %v3076_v32 = vrot.slane %v3074_v62, 3 }
 0x141   : > { %v6999_v41 = vadd.f32 %v5371_v58, %v944_v30  ;;  %5589 = vmatprep.mubr.msk.bf16.mxu0 %vm530_vm2, %v3400_v14  ;;  %v951_v51 = vpop.f32.mrf.mxu1  ;;  %v8870_v14 = vld [vmem:[#allocation11_spill] sm:$0xff]  ;;  %v3064_v30 = vrot.slane %v3062_v59, 2  ;;  %v8872_v59 = vld [vmem:[#allocation13_spill] sm:$0xff] }
 0x142   : > { %v1212_v10 = vpop.f32.mrf.mxu0  ;;  %v960_v16 = vadd.f32 %v5337_v24, %v8870_v14  ;;  %v3077_v62 = vor.u32 %v3076_v32, %v3073_v44 }
 0x143   : > { %v7006_v52 = vadd.f32 %v1212_v10, %v936_v54  ;;  %v5338_v8 = vpop.f32.mrf.mxu1  ;;  %v952_v54 = vadd.f32 %v951_v51, %v8871_v17  ;;  %v3068_v51 = vor.u32 %v3067_v39, %v3064_v30  ;;  %v7045_v30 = vld [vmem:[%s6068_s13 + $0xa0] ss:$0 sps:$4 sm:$0x77]   ;;  %v8875_v39 = vld [vmem:[#allocation15_spill] sm:$0xff]  ;;  %s5621_s13 = smul.u32 288, %s8221_s12 }
 0x144   : > { %v5372_v3 = vpop.f32.mrf.mxu0  ;;  %v963_v63 = vadd.f32 %v5338_v8, %v8872_v59 }
 0x145   : > { %v7014_v49 = vadd.f32 %v5372_v3, %v947_v9  ;;  %v954_v58 = vpop.f32.mrf.mxu1  ;;  %v3080_v9 = vshrl.u32 %v6832_v57, 16  ;;  %v3069_v17 = vsel %vm2935_vm7, %v3059_v53, %v3068_v51  ;;  %s8351_s14 = scalar_lea.vmem [#allocation2], %s5621_s13 }
 0x146   : > { %v1215_v33 = vpop.f32.mrf.mxu0  ;;  %s4661_s26 = sshll.u32 %s8351_s14, 4  ;;  %s8669_s26 = int_to_ptr.vmem [resolvable:$true] %s4661_s26 }
 0x147   : > { %v7020_v26 = vadd.f32 %v1215_v33, %v939_v45  ;;  %v5341_v34 = vpop.f32.mrf.mxu1  ;;  %5556 = vmatmul.mubr.msk.bf16.gmra.mxu1 %vm530_vm2, %v3051_v43  ;;  %v3089_v45 = vshrl.u32 %v8873_v37, 16  ;;  %v955_v33 = vadd.f32 %v954_v58, %v8874_v4  ;;  %v3411_v4 = vrot.slane %v8868_v23, 3  ;;  %s5825_s7 = scalar_lea.vmem %s8669_s26, 4608  ;;  %p5832_p1 = scmp.lt.s32.totalorder %s8669_s26, %s5830_s9 }
 0x148   : > { %v5375_v25 = vpop.f32.mrf.mxu0  ;;  %5590 = vmatmul.mubr.msk.bf16.gmra.mxu0 %vm530_vm2, %v3402_v36  ;;  %5559 = vmatprep.mubr.msk.bf16.mxu1 %vm530_vm2, %v3060_v61  ;;  %v3092_v36 = vshll.u32 %v8873_v37, 16  ;;  %v3085_v61 = vrot.slane %v3083_v18, 3  ;;  %v976_v44 = vadd.f32 %v5341_v34, %v8875_v39  ;;  %v3409_v34 = vrot.slane %v8867_v35, 3  ;;  %p5826_p12 = scmp.ne.s32.totalorder %s8669_s26, %s5825_s7  ;;  %p5833_p2 = scmp.lt.s32.totalorder %s5831_s10, %s5825_s7 }
 0x149   : > { %v7025_v10 = vadd.f32 %v5375_v25, %v960_v16  ;;  %5593 = vmatprep.mubr.msk.bf16.mxu0 %vm530_vm2, %v3404_v7  ;;  %v967_v38 = vpop.f32.mrf.mxu1  ;;  %v3406_v7 = vsel %vm3381_vm6, %v3403_v0, %v3405_v20  ;;  %v3408_v16 = vsel %vm3381_vm6, %v3405_v20, %v3407_v48  ;;  %v3082_v25 = vrot.slane %v3080_v9, 2 }
 0x14a   : > { %v1228_v24 = vpop.f32.mrf.mxu0  ;;  %v3078_v0 = vsel %vm2935_vm7, %v3068_v51, %v3077_v62  ;;  %v3094_v59 = vrot.slane %v3092_v36, 3  ;;  %v8877_v51 = vld [vmem:[#allocation18_spill] sm:$0xff]  ;;  %p5827_p13 = pnand %p5826_p12, %p6032_p4  ;;  %p5834_p3 = por %p5833_p2, %p5832_p1 }
 0x14b   : > { %v7034_v3 = vadd.f32 %v1228_v24, %v952_v54  ;;  %v5342_v8 = vpop.f32.mrf.mxu1  ;;  %v3091_v24 = vrot.slane %v3089_v45, 2  ;;  %v8878_v36 = vld [vmem:[#allocation22_spill] sm:$0xff] }
 0x14c   : > { %v5376_v56 = vpop.f32.mrf.mxu0  ;;  %v979_v45 = vadd.f32 %v5342_v8, %v8877_v51  ;;  %p5828_p0 = pneg %p5827_p13 }
 0x14d   : > { %v7040_v43 = vadd.f32 %v5376_v56, %v963_v63  ;;  %v970_v54 = vpop.f32.mrf.mxu1  ;;  %v8876_v63 = vld [vmem:[#allocation16_spill] sm:$0xff]  ;;  %v3086_v56 = vor.u32 %v3085_v61, %v3082_v25  ;;  %v3095_v39 = vor.u32 %v3094_v59, %v3091_v24  ;;  %v8880_v25 = vld [vmem:[#allocation23_spill] sm:$0xff] }
 0x14e   : > { %v1231_v14 = vpop.f32.mrf.mxu0  ;;  %v968_v20 = vadd.f32 %v967_v38, %v8876_v63  ;;  %p5835_p5 = pnand %p5834_p3, %p5828_p0 }
 0x14f   : > { %v7048_v32 = vadd.f32 %v1231_v14, %v955_v33  ;;  %v5385_v18 = vpop.f32.mrf.mxu1  ;;  %5560 = vmatmul.mubr.msk.bf16.gmra.mxu1 %vm530_vm2, %v3069_v17  ;;  %v3098_v33 = vshrl.u32 %v7045_v30, 16  ;;  %v3101_v14 = vshll.u32 %v7045_v30, 16 }
 0x150   : > { %v5379_v58 = vpop.f32.mrf.mxu0  ;;  %5594 = vmatmul.mubr.msk.bf16.gmra.mxu0 %vm530_vm2, %v3406_v7  ;;  %v1699_v7 = vadd.f32 %v5385_v18, %v8878_v36  ;;  %5563 = vmatprep.mubr.msk.bf16.mxu1 %vm530_vm2, %v3078_v0  ;;  %v3412_v18 = vsel %vm3381_vm6, %v3409_v34, %v3411_v4 }
 0x151   : > { %v7054_v9 = vadd.f32 %v5379_v58, %v976_v44  ;;  %5597 = vmatprep.mubr.msk.bf16.mxu0 %vm530_vm2, %v3408_v16  ;;  %v1554_v35 = vpop.f32.mrf.mxu1  ;;  %v8879_v44 = vld [vmem:[#allocation20_spill] sm:$0xff]  ;;  %v3410_v58 = vsel %vm3381_vm6, %v3407_v48, %v3409_v34  ;;  %v3100_v51 = vrot.slane %v3098_v33, 2  ;;  %v3103_v24 = vrot.slane %v3101_v14, 3 }
 0x152   : > { %v1244_v53 = vpop.f32.mrf.mxu0  ;;  %v971_v17 = vadd.f32 %v970_v54, %v8879_v44  ;;  %v1697_v61 = vadd.f32 %v1554_v35, %v8880_v25  ;;  %v3725_v34 = vlaneseq  ;;  %v3415_v14 = vrot.slane %v8873_v37, 3 }
 0x153   : > { %v7063_v38 = vadd.f32 %v1244_v53, %v968_v20  ;;  %v5386_v8 = vpop.f32.mrf.mxu1  ;;  %v3087_v20 = vsel %vm2935_vm7, %v3077_v62, %v3086_v56  ;;  %v3413_v62 = vrot.slane %v6832_v57, 3 }
 0x154   : > { %v5380_v16 = vpop.f32.mrf.mxu0  ;;  %v1700_v0 = vadd.f32 %v5386_v8, %v6860_v19 }
 0x155   : > { %v7069_v23 = vadd.f32 %v5380_v16, %v979_v45  ;;  %v1557_v59 = vpop.f32.mrf.mxu1  ;;  %v3096_v45 = vsel %vm2935_vm7, %v3086_v56, %v3095_v39  ;;  %v7090_v56 = vshrl.u32 %v3725_v34, 7  ;;  %v3414_v25 = vsel %vm3381_vm6, %v3411_v4, %v3413_v62 }
 0x156   : > { %v1247_v63 = vpop.f32.mrf.mxu0  ;;  %v1698_v48 = vadd.f32 %v1557_v59, %v6866_v21  ;;  %v3104_v21 = vor.u32 %v3103_v24, %v3100_v51 }
 0x157   : > { %v7075_v53 = vadd.f32 %v1247_v63, %v971_v17  ;;  %v5389_v19 = vpop.f32.mrf.mxu1  ;;  %5564 = vmatmul.mubr.msk.bf16.gmra.mxu1 %vm530_vm2, %v3087_v20 }
 0x158   : > { %v5423_v54 = vpop.f32.mrf.mxu0  ;;  %5598 = vmatmul.mubr.msk.bf16.gmra.mxu0 %vm530_vm2, %v3410_v58  ;;  %v1703_v35 = vadd.f32 %v5389_v19, %v6871_v15  ;;  %5567 = vmatprep.mubr.msk.bf16.mxu1 %vm530_vm2, %v3096_v45  ;;  %v7097_v58 = vadd.s32 16, %v7090_v56  ;;  %v3105_v20 = vsel %vm2935_vm7, %v3095_v39, %v3104_v21 }
 0x159   : > { %v7080_v36 = vadd.f32 %v5423_v54, %v1699_v7  ;;  %5601 = vmatprep.mubr.msk.bf16.mxu0 %vm530_vm2, %v3412_v18  ;;  %v1570_v7 = vpop.f32.mrf.mxu1  ;;  %v7116_v54 = vmul.u32.u64.low 3817748708, %v7090_v56  ;;  %v7117_v45 = vmul.u32.u64.high 3817748708, %v7090_v56, %v7116_v54 }
 0x15a   : > { %v2000_v33 = vpop.f32.mrf.mxu0  ;;  %v1701_v57 = vadd.f32 %v1570_v7, %v6879_v6  ;;  %v3417_v6 = vrot.slane %v7045_v30, 3  ;;  %v7111_v24 = vmul.u32.u64.low 3817748708, %v7097_v58  ;;  %v7112_v59 = vmul.u32.u64.high 3817748708, %v7097_v58, %v7111_v24 }
 0x15b   : > { %v7087_v16 = vadd.f32 %v2000_v33, %v1697_v61  ;;  %v5390_v37 = vpop.f32.mrf.mxu1  ;;  %v3416_v61 = vsel %vm3381_vm6, %v3413_v62, %v3415_v14  ;;  %v7120_v30 = vadd.s32 24, %v7090_v56 }
 0x15c   : > { %v5424_v44 = vpop.f32.mrf.mxu0  ;;  %v1704_v8 = vadd.f32 %v5390_v37, %v6885_v22 }
 0x15d   : > { %v7093_v17 = vadd.f32 %v5424_v44, %v1700_v0  ;;  %v1573_v18 = vpop.f32.mrf.mxu1 }
 0x15e   : > { %v2003_v15 = vpop.f32.mrf.mxu0  ;;  %v1702_v4 = vadd.f32 %v1573_v18, %v6889_v55  ;;  %v3768_v18 = vshrl.u32 %v7117_v45, 4 }
 0x15f   : > { %v7101_v63 = vadd.f32 %v2003_v15, %v1698_v48  ;;  %v5393_v22 = vpop.f32.mrf.mxu1  ;;  %5568 = vmatmul.mubr.msk.bf16.gmra.mxu1 %vm530_vm2, %v3105_v20 }
 0x160   : > { %v5427_v51 = vpop.f32.mrf.mxu0  ;;  %5602 = vmatmul.mubr.msk.bf16.gmra.mxu0 %vm530_vm2, %v3414_v25  ;;  %v1707_v55 = vadd.f32 %v5393_v22, %v6895_v40  ;;  %v7130_v44 = vmul.u32.u64.low 3817748708, %v7120_v30  ;;  %v7131_v25 = vmul.u32.u64.high 3817748708, %v7120_v30, %v7130_v44  ;;  %v7149_v22 = vadd.s32 48, %v7090_v56 }
 0x161   : > { %v7107_v0 = vadd.f32 %v5427_v51, %v1703_v35  ;;  %5605 = vmatprep.mubr.msk.bf16.mxu0 %vm530_vm2, %v3416_v61  ;;  %v1586_v62 = vpop.f32.mrf.mxu1  ;;  %v3418_v35 = vsel %vm3381_vm6, %v3415_v14, %v3417_v6  ;;  %v3790_v14 = vshrl.u32 %v7112_v59, 4  ;;  %v7143_v51 = vadd.s32 8, %v7090_v56 }
 0x162   : > { %v2016_v39 = vpop.f32.mrf.mxu0  ;;  %v1705_v19 = vadd.f32 %v1586_v62, %v6902_v29  ;;  %v3769_v45 = vmul.u32 18, %v3768_v18  ;;  %v3801_v62 = vshrl.u32 %v7131_v25, 4  ;;  %v7179_v18 = vadd.s32 32, %v7090_v56 }
 0x163   : > { %v7123_v48 = vadd.f32 %v2016_v39, %v1701_v57  ;;  %v5394_v21 = vpop.f32.mrf.mxu1  ;;  %v3791_v59 = vmul.u32 18, %v3790_v14 }
 0x164   : > { %v5428_v34 = vpop.f32.mrf.mxu0  ;;  %v1708_v37 = vadd.f32 %v5394_v21, %v6910_v2 }
 0x165   : > { %v7126_v33 = vadd.f32 %v5428_v34, %v1704_v8  ;;  %v1589_v40 = vpop.f32.mrf.mxu1  ;;  %v7170_v25 = vsub.s32 %v7097_v58, %v3791_v59  ;;  %v7186_v58 = vadd.s32 56, %v7090_v56 }
 0x166   : > { %v2019_v7 = vpop.f32.mrf.mxu0  ;;  %v1706_v29 = vadd.f32 %v1589_v40, %v6917_v12 }
 0x167   : > { %v7134_v15 = vadd.f32 %v2019_v7, %v1702_v4  ;;  %v5397_v8 = vpop.f32.mrf.mxu1  ;;  %vm4160_vm8 = vcmp.ne.s32.totalorder %v7170_v25, 0  ;;  %vm4196_vm9 = vcmp.lt.s32.totalorder %v7170_v25, 0 }
 0x168   : > { %v5431_v57 = vpop.f32.mrf.mxu0  ;;  %5606 = vmatmul.mubr.msk.bf16.gmra.mxu0 %vm530_vm2, %v3418_v35  ;;  %v1711_v2 = vadd.f32 %v5397_v8, %v6923_v27  ;;  %v7156_v34 = vmul.u32.u64.low 3817748708, %v7143_v51  ;;  %v7157_v27 = vmul.u32.u64.high 3817748708, %v7143_v51, %v7156_v34  ;;  %v7173_v8 = vsub.s32 %v7090_v56, %v3769_v45  ;;  %vm7228_vm12 = vmand %vm4196_vm9, %vm4160_vm8 }
 0x169   : > { %v7138_v61 = vadd.f32 %v5431_v57, %v1707_v55  ;;  %v1602_v4 = vpop.f32.mrf.mxu1 }
 0x16a   : > { %v2032_v20 = vpop.f32.mrf.mxu0  ;;  %v1709_v12 = vadd.f32 %v1602_v4, %v6932_v5  ;;  %v7163_v5 = vmul.u32.u64.low 3817748708, %v7149_v22  ;;  %v7164_v44 = vmul.u32.u64.high 3817748708, %v7149_v22, %v7163_v5  ;;  %vm4158_vm10 = vcmp.ne.s32.totalorder %v7173_v8, 0 }
 0x16b   : > { %v7146_v6 = vadd.f32 %v2032_v20, %v1705_v19  ;;  %v5398_v54 = vpop.f32.mrf.mxu1  ;;  %vm4194_vm11 = vcmp.lt.s32.totalorder %v7173_v8, 0 }
 0x16c   : > { %v5432_v24 = vpop.f32.mrf.mxu0  ;;  %v1712_v19 = vadd.f32 %v5398_v54, %v6938_v60  ;;  %v3802_v60 = vmul.u32 18, %v3801_v62  ;;  %v7198_v45 = vmul.u32.u64.low 3817748708, %v7179_v18  ;;  %v7199_v62 = vmul.u32.u64.high 3817748708, %v7179_v18, %v7198_v45  ;;  %vm7238_vm15 = vmand %vm4194_vm11, %vm4158_vm10 }
 0x16d   : > { %v7152_v39 = vadd.f32 %v5432_v24, %v1708_v37  ;;  %v1605_v21 = vpop.f32.mrf.mxu1 }
 0x16e   : > { %v2035_v55 = vpop.f32.mrf.mxu0  ;;  %v1710_v37 = vadd.f32 %v1605_v21, %v6943_v31  ;;  %v3834_v21 = vshrl.u32 %v7164_v44, 4  ;;  %v4266_v44 = vadd.s32 18, %v7173_v8 }
 0x16f   : > { %v7160_v35 = vadd.f32 %v2035_v55, %v1706_v29  ;;  %v5401_v57 = vpop.f32.mrf.mxu1 }
 0x170   : > { %v5435_v7 = vpop.f32.mrf.mxu0  ;;  %v1715_v29 = vadd.f32 %v5401_v57, %v6949_v46  ;;  %v7191_v46 = vsub.s32 %v7120_v30, %v3802_v60  ;;  %v7207_v30 = vadd.s32 80, %v7090_v56  ;;  %v4268_v60 = vadd.s32 18, %v7170_v25 }
 0x171   : > { %v7167_v40 = vadd.f32 %v5435_v7, %v1711_v2  ;;  %v1618_v4 = vpop.f32.mrf.mxu1  ;;  %v7204_v7 = vadd.s32 40, %v7090_v56  ;;  %v3835_v45 = vmul.u32 18, %v3834_v21 }
 0x172   : > { %v2048_v14 = vpop.f32.mrf.mxu0  ;;  %v1713_v2 = vadd.f32 %v1618_v4, %v6955_v13  ;;  %vm4161_vm13 = vcmp.ne.s32.totalorder %v7191_v46, 0  ;;  %vm4197_vm14 = vcmp.lt.s32.totalorder %v7191_v46, 0 }
 0x173   : > { %v7176_v20 = vadd.f32 %v2048_v14, %v1709_v12  ;;  %v5402_v59 = vpop.f32.mrf.mxu1  ;;  %v3779_v12 = vshrl.u32 %v7157_v27, 4  ;;  %vm7261_vm0 = vmand %vm4197_vm14, %vm4161_vm13 }
 0x174   : > { %v5436_v31 = vpop.f32.mrf.mxu0  ;;  %v1716_v13 = vadd.f32 %v5402_v59, %v6962_v28 }
 0x175   : > { %v7182_v24 = vadd.f32 %v5436_v31, %v1712_v19  ;;  %v1621_v34 = vpop.f32.mrf.mxu1  ;;  %v3780_v4 = vmul.u32 18, %v3779_v12  ;;  %v7219_v31 = vadd.s32 64, %v7090_v56 }
 0x176   : > { %v2051_v54 = vpop.f32.mrf.mxu0  ;;  %v1714_v28 = vadd.f32 %v1621_v34, %v6968_v42 }
 0x177   : > { %8881 = vst [vmem:[#allocation9_spill] sm:$0xff] %v7182_v24  ;;  %v7195_v55 = vadd.f32 %v2051_v54, %v1710_v37  ;;  %v7213_v5 = vmul.u32.u64.low 3817748708, %v7186_v58  ;;  %v7214_v37 = vmul.u32.u64.high 3817748708, %v7186_v58, %v7213_v5  ;;  %v5405_v57 = vpop.f32.mrf.mxu1  ;;  %v4304_v24 = vsel %vm7228_vm12, %v4268_v60, %v7170_v25 }
 0x178   : > { %v5439_v19 = vpop.f32.mrf.mxu0  ;;  %v1719_v59 = vadd.f32 %v5405_v57, %v6973_v47  ;;  %v4302_v25 = vsel %vm7238_vm15, %v4266_v44, %v7173_v8  ;;  %v3812_v60 = vshrl.u32 %v7199_v62, 4  ;;  %vm7289_vm1 = vcmp.lt.s32.totalorder %v4304_v24, 16 }
 0x179   : > { %8882 = vst [vmem:[#allocation17_spill] sm:$0xff] %v7195_v55  ;;  %v7210_v27 = vadd.f32 %v5439_v19, %v1715_v29  ;;  %v1634_v29 = vpop.f32.mrf.mxu1  ;;  %v7244_v34 = vmul.u32.u64.low 3817748708, %v7204_v7  ;;  %v7245_v19 = vmul.u32.u64.high 3817748708, %v7204_v7, %v7244_v34  ;;  %vm7293_vm2 = vcmp.lt.s32.totalorder %v4302_v25, 16 }
 0x17a   : > { %v2064_v14 = vpop.f32.mrf.mxu0  ;;  %v1717_v5 = vadd.f32 %v1634_v29, %v6982_v11  ;;  %v7266_v11 = vsub.s32 %v7143_v51, %v3780_v4 }
 0x17b   : > { %8883 = vst [vmem:[#allocation19_spill] sm:$0xff] %v7210_v27  ;;  %v7222_v54 = vadd.f32 %v2064_v14, %v1713_v2  ;;  %v4269_v2 = vadd.s32 18, %v7191_v46  ;;  %v5406_v27 = vpop.f32.mrf.mxu1  ;;  %v3823_v47 = vshrl.u32 %v7245_v19, 4 }
 0x17c   : > { %v5440_v12 = vpop.f32.mrf.mxu0  ;;  %vm4159_vm3 = vcmp.ne.s32.totalorder %v7266_v11, 0  ;;  %vm4195_vm4 = vcmp.lt.s32.totalorder %v7266_v11, 0 }
 0x17d   : > { %8884 = vst [vmem:[#allocation10_spill] sm:$0xff] %v7222_v54  ;;  %v7248_v57 = vadd.f32 %v5440_v12, %v1716_v13  ;;  %v7251_v14 = vmul.u32.u64.low 3817748708, %v7207_v30  ;;  %v7252_v54 = vmul.u32.u64.high 3817748708, %v7207_v30, %v7251_v14  ;;  %v1720_v12 = vadd.f32 %v5406_v27, %v6988_v1  ;;  %v1637_v42 = vpop.f32.mrf.mxu1  ;;  %vm7315_vm8 = vmand %vm4195_vm4, %vm4159_vm3 }
 0x17e   : > { %v2067_v55 = vpop.f32.mrf.mxu0  ;;  %v7269_v13 = vmul.u32.u64.low 3817748708, %v7219_v31  ;;  %v7270_v29 = vmul.u32.u64.high 3817748708, %v7219_v31, %v7269_v13  ;;  %v1718_v51 = vadd.f32 %v1637_v42, %v6993_v50  ;;  %v4305_v1 = vsel %vm7261_vm0, %v4269_v2, %v7191_v46 }
 0x17f   : > { %8889 = vst [vmem:[#allocation11_spill] sm:$0xff] %v7248_v57  ;;  %v7273_v34 = vadd.f32 %v2067_v55, %v1714_v28  ;;  %v7280_v57 = vsub.s32 %v7149_v22, %v3835_v45  ;;  %v3845_v55 = vshrl.u32 %v7214_v37, 4  ;;  %v5409_v28 = vpop.f32.mrf.mxu1  ;;  %v4267_v46 = vadd.s32 18, %v7266_v11 }
 0x180   : > { %v5443_v14 = vpop.f32.mrf.mxu0  ;;  %v1723_v50 = vadd.f32 %v5409_v28, %v6999_v41  ;;  %v3813_v37 = vmul.u32 18, %v3812_v60  ;;  %vm7303_vm5 = vcmp.lt.s32.totalorder %v4305_v1, 16  ;;  %v3878_v21 = vshrl.u32 %v7252_v54, 4 }
 0x181   : > { %v7283_v4 = vadd.f32 %v5443_v14, %v1719_v59  ;;  %v1650_v44 = vpop.f32.mrf.mxu1  ;;  %vm4164_vm6 = vcmp.ne.s32.totalorder %v7280_v57, 0  ;;  %vm4200_vm7 = vcmp.lt.s32.totalorder %v7280_v57, 0  ;;  %v8823_v60 = vmov 0.0  }
 0x182   : > { %v2080_v27 = vpop.f32.mrf.mxu0  ;;  %v1721_v2 = vadd.f32 %v1650_v44, %v7006_v52  ;;  %v7323_v19 = vsel %vm7289_vm1, 1.0, %v8823_v60  ;;  %v3856_v52 = vshrl.u32 %v7270_v29, 4  ;;  %v7333_v1 = vadd.s32 18, %v7280_v57  ;;  %vm7355_vm9 = vmand %vm4200_vm7, %vm4164_vm6 }
 0x183   : > { %v7300_v22 = vadd.f32 %v2080_v27, %v1717_v5  ;;  %v3846_v5 = vmul.u32 18, %v3845_v55  ;;  %v5410_v13 = vpop.f32.mrf.mxu1  ;;  %8900 = vst [vmem:[#allocation12_spill] sm:$0xff] %v7323_v19  ;;  %v7336_v54 = vsub.s32 %v7179_v18, %v3813_v37  ;;  %v7341_v27 = vsel %vm7293_vm2, 1.0, %v8823_v60 }
 0x184   : > { %v5444_v24 = vpop.f32.mrf.mxu0  ;;  %v1724_v42 = vadd.f32 %v5410_v13, %v7014_v49  ;;  %v7346_v29 = vsel %vm7303_vm5, 1.0, %v8823_v60  ;;  %v4303_v49 = vsel %vm7315_vm8, %v4267_v46, %v7266_v11  ;;  %v3879_v44 = vmul.u32 18, %v3878_v21 }
 0x185   : > { %v7311_v41 = vadd.f32 %v5444_v24, %v1720_v12  ;;  %v7327_v12 = vadd.s32 88, %v7090_v56  ;;  %v1653_v55 = vpop.f32.mrf.mxu1  ;;  %8901 = vst [vmem:[#allocation13_spill] sm:$0xff] %v7346_v29  ;;  %v7363_v37 = vsub.s32 %v7186_v58, %v3846_v5  ;;  %v3857_v11 = vmul.u32 18, %v3856_v52 }
 0x186   : > { %v2083_v25 = vpop.f32.mrf.mxu0  ;;  %v1722_v8 = vadd.f32 %v1653_v55, %v7020_v26  ;;  %v7370_v13 = vadd.s32 72, %v7090_v56  ;;  %vm7375_vm10 = vcmp.lt.s32.totalorder %v4303_v49, 16  ;;  %v4308_v58 = vsel %vm7355_vm9, %v7333_v1, %v7280_v57 }
 0x187   : > { %v7330_v14 = vadd.f32 %v2083_v25, %v1718_v51  ;;  %v3824_v51 = vmul.u32 18, %v3823_v47  ;;  %v5413_v24 = vpop.f32.mrf.mxu1  ;;  %v7366_v46 = vmul.u32.u64.low 3817748708, %v7327_v12  ;;  %v7367_v45 = vmul.u32.u64.high 3817748708, %v7327_v12, %v7366_v46 }
 0x188   : > { %v5447_v28 = vpop.f32.mrf.mxu0  ;;  %v1727_v47 = vadd.f32 %v5413_v24, %v7025_v10  ;;  %vm4162_vm11 = vcmp.ne.s32.totalorder %v7336_v54, 0  ;;  %vm4198_vm12 = vcmp.lt.s32.totalorder %v7336_v54, 0  ;;  %v4270_v21 = vadd.s32 18, %v7336_v54 }
 0x189   : > { %v7360_v62 = vadd.f32 %v5447_v28, %v1723_v50  ;;  %v1666_v50 = vpop.f32.mrf.mxu1  ;;  %v7387_v10 = vsub.s32 %v7204_v7, %v3824_v51  ;;  %vm4165_vm13 = vcmp.ne.s32.totalorder %v7363_v37, 0  ;;  %v7397_v57 = vsub.s32 %v7207_v30, %v3879_v44  ;;  %vm7425_vm1 = vmand %vm4198_vm12, %vm4162_vm11 }
 0x18a   : > { %v2096_v59 = vpop.f32.mrf.mxu0  ;;  %v1725_v52 = vadd.f32 %v1666_v50, %v7034_v3  ;;  %vm4201_vm14 = vcmp.lt.s32.totalorder %v7363_v37, 0  ;;  %v7401_v49 = vsub.s32 %v7219_v31, %v3857_v11  ;;  %v4273_v51 = vadd.s32 18, %v7363_v37 }
 0x18b   : > { %v7373_v25 = vadd.f32 %v2096_v59, %v1721_v2  ;;  %v7390_v2 = vadd.s32 112, %v7090_v56  ;;  %v5414_v1 = vpop.f32.mrf.mxu1  ;;  %v7404_v7 = vmul.u32.u64.low 3817748708, %v7370_v13  ;;  %v7405_v18 = vmul.u32.u64.high 3817748708, %v7370_v13, %v7404_v7  ;;  %vm7435_vm4 = vmand %vm4201_vm14, %vm4165_vm13 }
 0x18c   : > { %v5448_v5 = vpop.f32.mrf.mxu0  ;;  %v1728_v3 = vadd.f32 %v5414_v1, %v7040_v43  ;;  %v7412_v30 = vadd.s32 96, %v7090_v56  ;;  %vm4163_vm15 = vcmp.ne.s32.totalorder %v7387_v10, 0  ;;  %vm4199_vm0 = vcmp.lt.s32.totalorder %v7387_v10, 0 }
 0x18d   : > { %v7393_v55 = vadd.f32 %v5448_v5, %v1724_v42  ;;  %v1669_v44 = vpop.f32.mrf.mxu1  ;;  %v4271_v31 = vadd.s32 18, %v7387_v10  ;;  %v3889_v59 = vshrl.u32 %v7367_v45, 4  ;;  %vm4168_vm2 = vcmp.ne.s32.totalorder %v7397_v57, 0  ;;  %vm7452_vm7 = vmand %vm4199_vm0, %vm4163_vm15 }
 0x18e   : > { %v2099_v28 = vpop.f32.mrf.mxu0  ;;  %v1726_v11 = vadd.f32 %v1669_v44, %v7048_v32  ;;  %vm4204_vm3 = vcmp.lt.s32.totalorder %v7397_v57, 0  ;;  %vm4166_vm5 = vcmp.ne.s32.totalorder %v7401_v49, 0  ;;  %vm4202_vm6 = vcmp.lt.s32.totalorder %v7401_v49, 0 }
 0x18f   : > { %v7408_v42 = vadd.f32 %v2099_v28, %v1722_v8  ;;  %v5417_v46 = vpop.f32.mrf.mxu1  ;;  %v7457_v7 = vmul.u32.u64.low 3817748708, %v7412_v30  ;;  %v7458_v44 = vmul.u32.u64.high 3817748708, %v7412_v30, %v7457_v7  ;;  %vm7460_vm8 = vcmp.lt.s32.totalorder %v4308_v58, 16  ;;  %vm7478_vm9 = vmand %vm4204_vm3, %vm4168_vm2 }
 0x190   : > { %v5451_v24 = vpop.f32.mrf.mxu0  ;;  %v1731_v5 = vadd.f32 %v5417_v46, %v7054_v9  ;;  %v4306_v9 = vsel %vm7425_vm1, %v4270_v21, %v7336_v54  ;;  %v3890_v46 = vmul.u32 18, %v3889_v59  ;;  %v4309_v7 = vsel %vm7435_vm4, %v4273_v51, %v7363_v37  ;;  %vm7495_vm11 = vmand %vm4202_vm6, %vm4166_vm5 }
 0x191   : > { %v7419_v43 = vadd.f32 %v5451_v24, %v1727_v47  ;;  %v7442_v45 = vmul.u32.u64.low 3817748708, %v7390_v2  ;;  %v7443_v47 = vmul.u32.u64.high 3817748708, %v7390_v2, %v7442_v45  ;;  %v1682_v24 = vpop.f32.mrf.mxu1  ;;  %v4274_v54 = vadd.s32 18, %v7401_v49 }
 0x192   : > { %v2112_v50 = vpop.f32.mrf.mxu0  ;;  %v8916_v8 = vmov 0.0   ;;  %v7501_v51 = vadd.s32 120, %v7090_v56  ;;  %vm7515_vm12 = vcmp.lt.s32.totalorder %v4309_v7, 16  ;;  %v7526_v45 = vadd.s32 104, %v7090_v56 }
 0x193   : > { %v7446_v1 = vadd.f32 %v2112_v50, %v1725_v52  ;;  %v4276_v52 = vadd.s32 18, %v7397_v57  ;;  %v1729_v50 = vadd.f32 %v1682_v24, %v7063_v38  ;;  %v5418_v21 = vpop.f32.mrf.mxu1  ;;  %v7486_v38 = vsel %vm7375_vm10, 1.0, %v8916_v8 }
 0x194   : > { %v5452_v60 = vpop.f32.mrf.mxu0  ;;  %8917 = vst [vmem:[#allocation21_spill] sm:$0xff] %v7486_v38  ;;  %v1732_v26 = vadd.f32 %v5418_v21, %v7069_v23  ;;  %vm7511_vm10 = vcmp.lt.s32.totalorder %v4306_v9, 16  ;;  %v4310_v7 = vsel %vm7495_vm11, %v4274_v54, %v7401_v49  ;;  %v3900_v37 = vshrl.u32 %v7458_v44, 4 }
 0x195   : > { %v7469_v29 = vadd.f32 %v5452_v60, %v1728_v3  ;;  %v4307_v60 = vsel %vm7452_vm7, %v4271_v31, %v7387_v10  ;;  %v3867_v3 = vshrl.u32 %v7405_v18, 4  ;;  %v7509_v10 = vsel %vm7460_vm8, 1.0, %v8916_v8  ;;  %v1685_v28 = vpop.f32.mrf.mxu1 }
 0x196   : > { %v2115_v59 = vpop.f32.mrf.mxu0  ;;  %8920 = vst [vmem:[#allocation14_spill] sm:$0xff] %v7509_v10  ;;  %v4312_v23 = vsel %vm7478_vm9, %v4276_v52, %v7397_v57  ;;  %v1730_v9 = vadd.f32 %v1685_v28, %v7075_v53  ;;  %vm7531_vm13 = vcmp.lt.s32.totalorder %v4307_v60, 16  ;;  %vm7560_vm1 = vcmp.lt.s32.totalorder %v4310_v7, 16 }
 0x197   : > { %v7504_v32 = vadd.f32 %v2115_v59, %v1726_v11  ;;  %v7523_v11 = vsub.s32 %v7327_v12, %v3890_v46  ;;  %v5461_v58 = vpop.f32.mrf.mxu1  ;;  %v3868_v52 = vmul.u32 18, %v3867_v3  ;;  %v3922_v12 = vshrl.u32 %v7443_v47, 4 }
 0x198   : > { %v5455_v24 = vpop.f32.mrf.mxu0  ;;  %v7540_v46 = vmul.u32.u64.low 3817748708, %v7501_v51  ;;  %v7541_v10 = vmul.u32.u64.high 3817748708, %v7501_v51, %v7540_v46  ;;  %v2458_v53 = vadd.f32 %v5461_v58, %v7080_v36  ;;  %vm7546_vm14 = vcmp.lt.s32.totalorder %v4312_v23, 16 }
 0x199   : > { %v7529_v21 = vadd.f32 %v5455_v24, %v1731_v5  ;;  %v2313_v49 = vpop.f32.mrf.mxu1  ;;  %vm4169_vm15 = vcmp.ne.s32.totalorder %v7523_v11, 0  ;;  %vm4205_vm0 = vcmp.lt.s32.totalorder %v7523_v11, 0  ;;  %v7565_v44 = vadd.s32 144, %v7090_v56 }
 0x19a   : > { %v2128_v57 = vpop.f32.mrf.mxu0  ;;  %v7554_v47 = vmul.u32.u64.low 3817748708, %v7526_v45  ;;  %v7555_v3 = vmul.u32.u64.high 3817748708, %v7526_v45, %v7554_v47  ;;  %v2456_v36 = vadd.f32 %v2313_v49, %v7087_v16  ;;  %v7570_v58 = vsel %vm7511_vm10, 1.0, %v8916_v8  ;;  %vm7588_vm2 = vmand %vm4205_vm0, %vm4169_vm15 }
 0x19b   : > { %v7544_v5 = vadd.f32 %v2128_v57, %v1729_v50  ;;  %v5462_v24 = vpop.f32.mrf.mxu1  ;;  %8931 = vst [vmem:[#allocation15_spill] sm:$0xff] %v7570_v58  ;;  %v4277_v57 = vadd.s32 18, %v7523_v11  ;;  %v7574_v16 = vsub.s32 %v7370_v13, %v3868_v52  ;;  %v7582_v49 = vsel %vm7515_vm12, 1.0, %v8916_v8 }
 0x19c   : > { %v5456_v54 = vpop.f32.mrf.mxu0  ;;  %v2459_v7 = vadd.f32 %v5462_v24, %v7093_v17  ;;  %8932 = vst [vmem:[#allocation16_spill] sm:$0xff] %v7582_v49  ;;  %v3901_v13 = vmul.u32 18, %v3900_v37  ;;  %v7595_v17 = vsel %vm7531_vm13, 1.0, %v8916_v8  ;;  %v7600_v18 = vsel %vm7546_vm14, 1.0, %v8916_v8 }
 0x19d   : > { %v7558_v50 = vadd.f32 %v5456_v54, %v1732_v26  ;;  %v3923_v26 = vmul.u32 18, %v3922_v12  ;;  %v2316_v52 = vpop.f32.mrf.mxu1  ;;  %8935 = vst [vmem:[#allocation18_spill] sm:$0xff] %v7595_v17  ;;  %8936 = vst [vmem:[#allocation22_spill] sm:$0xff] %v7600_v18  ;;  %v7608_v54 = vadd.s32 128, %v7090_v56  ;;  %v4313_v18 = vsel %vm7588_vm2, %v4277_v57, %v7523_v11 }
 0x19e   : > { %v2131_v23 = vpop.f32.mrf.mxu0  ;;  %v2457_v37 = vadd.f32 %v2316_v52, %v7101_v63  ;;  %v7614_v59 = vmul.u32.u64.low 3817748708, %v7565_v44  ;;  %v7615_v24 = vmul.u32.u64.high 3817748708, %v7565_v44, %v7614_v59  ;;  %vm4167_vm3 = vcmp.ne.s32.totalorder %v7574_v16, 0 }
 0x19f   : > { %v7577_v46 = vadd.f32 %v2131_v23, %v1730_v9  ;;  %v7605_v9 = vsel %vm7560_vm1, 1.0, %v8916_v8  ;;  %v5465_v23 = vpop.f32.mrf.mxu1  ;;  %v7622_v28 = vsub.s32 %v7390_v2, %v3923_v26  ;;  %vm4203_vm4 = vcmp.lt.s32.totalorder %v7574_v16, 0 }
 0x1a0   : > { %v5499_v12 = vpop.f32.mrf.mxu0  ;;  %8937 = vst [vmem:[#allocation20_spill] sm:$0xff] %v7605_v9  ;;  %v3933_v9 = vshrl.u32 %v7541_v10, 4  ;;  %v2462_v63 = vadd.f32 %v5465_v23, %v7107_v0  ;;  %v7630_v52 = vsub.s32 %v7412_v30, %v3901_v13  ;;  %v3911_v11 = vshrl.u32 %v7555_v3, 4  ;;  %vm7655_vm6 = vmand %vm4203_vm4, %vm4167_vm3 }
 0x1a1   : > { %v7611_v47 = vadd.f32 %v5499_v12, %v2458_v53  ;;  %v2329_v12 = vpop.f32.mrf.mxu1  ;;  %v7634_v57 = vmul.u32.u64.low 3817748708, %v7608_v54  ;;  %v7635_v31 = vmul.u32.u64.high 3817748708, %v7608_v54, %v7634_v57  ;;  %v7638_v2 = vadd.s32 152, %v7090_v56 }
 0x1a2   : > { %v2751_v60 = vpop.f32.mrf.mxu0  ;;  %v2460_v0 = vadd.f32 %v2329_v12, %v7123_v48  ;;  %v7645_v30 = vadd.s32 136, %v7090_v56  ;;  %vm7647_vm5 = vcmp.lt.s32.totalorder %v4313_v18, 16  ;;  %vm4172_vm7 = vcmp.ne.s32.totalorder %v7622_v28, 0 }
 0x1a3   : > { %v7626_v53 = vadd.f32 %v2751_v60, %v2456_v36  ;;  %v4275_v36 = vadd.s32 18, %v7574_v16  ;;  %v5466_v26 = vpop.f32.mrf.mxu1  ;;  %vm4208_vm8 = vcmp.lt.s32.totalorder %v7622_v28, 0  ;;  %v3934_v48 = vmul.u32 18, %v3933_v9 }
 0x1a4   : > { %v5500_v59 = vpop.f32.mrf.mxu0  ;;  %v2463_v18 = vadd.f32 %v5466_v26, %v7126_v33  ;;  %vm4170_vm9 = vcmp.ne.s32.totalorder %v7630_v52, 0  ;;  %vm4206_vm11 = vcmp.lt.s32.totalorder %v7630_v52, 0  ;;  %v3912_v57 = vmul.u32 18, %v3911_v11  ;;  %vm7685_vm10 = vmand %vm4208_vm8, %vm4172_vm7 }
 0x1a5   : > { %v7641_v10 = vadd.f32 %v5500_v59, %v2459_v7  ;;  %v3966_v7 = vshrl.u32 %v7615_v24, 4  ;;  %v2332_v12 = vpop.f32.mrf.mxu1  ;;  %v7668_v49 = vmul.u32.u64.low 3817748708, %v7638_v2  ;;  %v7669_v17 = vmul.u32.u64.high 3817748708, %v7638_v2, %v7668_v49  ;;  %vm7703_vm12 = vmand %vm4206_vm11, %vm4170_vm9 }
 0x1a6   : > { %v2754_v13 = vpop.f32.mrf.mxu0  ;;  %v7672_v58 = vadd.s32 176, %v7090_v56  ;;  %v2461_v9 = vadd.f32 %v2332_v12, %v7134_v15  ;;  %v4311_v33 = vsel %vm7655_vm6, %v4275_v36, %v7574_v16  ;;  %v4278_v15 = vadd.s32 18, %v7630_v52 }
 0x1a7   : > { %v7663_v60 = vadd.f32 %v2754_v13, %v2457_v37  ;;  %v4280_v37 = vadd.s32 18, %v7622_v28  ;;  %v5469_v26 = vpop.f32.mrf.mxu1  ;;  %v3967_v11 = vmul.u32 18, %v3966_v7  ;;  %v7694_v16 = vadd.s32 160, %v7090_v56 }
 0x1a8   : > { %v5503_v59 = vpop.f32.mrf.mxu0  ;;  %v2466_v36 = vadd.f32 %v5469_v26, %v7138_v61  ;;  %v7712_v19 = vsub.s32 %v7526_v45, %v3912_v57  ;;  %v3944_v61 = vshrl.u32 %v7635_v31, 4  ;;  %vm7722_vm13 = vcmp.lt.s32.totalorder %v4311_v33, 16 }
 0x1a9   : > { %v7675_v24 = vadd.f32 %v5503_v59, %v2462_v63  ;;  %v7691_v63 = vsub.s32 %v7501_v51, %v3934_v48  ;;  %v7708_v59 = vmul.u32.u64.low 3817748708, %v7645_v30  ;;  %v7709_v51 = vmul.u32.u64.high 3817748708, %v7645_v30, %v7708_v59  ;;  %v2345_v48 = vpop.f32.mrf.mxu1 }
 0x1aa   : > { %v2767_v13 = vpop.f32.mrf.mxu0  ;;  %v4316_v59 = vsel %vm7685_vm10, %v4280_v37, %v7622_v28  ;;  %v4314_v31 = vsel %vm7703_vm12, %v4278_v15, %v7630_v52  ;;  %v7741_v49 = vmul.u32.u64.low 3817748708, %v7694_v16  ;;  %v7742_v28 = vmul.u32.u64.high 3817748708, %v7694_v16, %v7741_v49 }
 0x1ab   : > { %v7697_v23 = vadd.f32 %v2767_v13, %v2460_v0  ;;  %v7716_v0 = vmul.u32.u64.low 3817748708, %v7672_v58  ;;  %v7717_v26 = vmul.u32.u64.high 3817748708, %v7672_v58, %v7716_v0  ;;  %v2464_v13 = vadd.f32 %v2345_v48, %v7146_v6  ;;  %v5470_v45 = vpop.f32.mrf.mxu1 }
 0x1ac   : > { %v5504_v7 = vpop.f32.mrf.mxu0  ;;  %vm4173_vm14 = vcmp.ne.s32.totalorder %v7691_v63, 0  ;;  %vm4209_vm15 = vcmp.lt.s32.totalorder %v7691_v63, 0  ;;  %v7735_v6 = vsub.s32 %v7565_v44, %v3967_v11  ;;  %vm4171_vm0 = vcmp.ne.s32.totalorder %v7712_v19, 0 }
 0x1ad   : > { %8944 = vst [vmem:[#allocation23_spill] sm:$0xff] %v7697_v23  ;;  %v7720_v23 = vadd.f32 %v5504_v7, %v2463_v18  ;;  %v2467_v18 = vadd.f32 %v5470_v45, %v7152_v39  ;;  %v2348_v37 = vpop.f32.mrf.mxu1  ;;  %vm4207_vm1 = vcmp.lt.s32.totalorder %v7712_v19, 0  ;;  %v3945_v52 = vmul.u32 18, %v3944_v61  ;;  %vm7772_vm4 = vmand %vm4209_vm15, %vm4173_vm14 }
 0x1ae   : > { %v2770_v57 = vpop.f32.mrf.mxu0  ;;  %v3977_v15 = vshrl.u32 %v7669_v17, 4  ;;  %v2465_v44 = vadd.f32 %v2348_v37, %v7160_v35  ;;  %v7753_v39 = vsel %vm7647_vm5, 1.0, %v8916_v8  ;;  %vm7760_vm2 = vcmp.lt.s32.totalorder %v4316_v59, 16  ;;  %vm7785_vm5 = vmand %vm4207_vm1, %vm4171_vm0 }
 0x1af   : > { %v7738_v33 = vadd.f32 %v2770_v57, %v2461_v9  ;;  %8949 = vst [vmem:[#allocation24_spill] sm:$0xff] %v7753_v39  ;;  %v7758_v9 = vsel %vm7722_vm13, 1.0, %v8916_v8  ;;  %v5473_v12 = vpop.f32.mrf.mxu1  ;;  %vm7764_vm3 = vcmp.lt.s32.totalorder %v4314_v31, 16  ;;  %v4281_v38 = vadd.s32 18, %v7691_v63 }
 0x1b0   : > { %v5507_v48 = vpop.f32.mrf.mxu0  ;;  %8950 = vst [vmem:[#allocation25_spill] sm:$0xff] %v7758_v9  ;;  %v4279_v3 = vadd.s32 18, %v7712_v19  ;;  %vm4176_vm6 = vcmp.ne.s32.totalorder %v7735_v6, 0  ;;  %v3955_v45 = vshrl.u32 %v7709_v51, 4  ;;  %vm4212_vm7 = vcmp.lt.s32.totalorder %v7735_v6, 0 }
 0x1b1   : > { %v7748_v11 = vadd.f32 %v5507_v48, %v2466_v36  ;;  %v2470_v36 = vadd.f32 %v5473_v12, %v7167_v40  ;;  %v2361_v57 = vpop.f32.mrf.mxu1  ;;  %v7793_v40 = vsub.s32 %v7608_v54, %v3945_v52  ;;  %v4010_v49 = vshrl.u32 %v7717_v26, 4  ;;  %v8961_v52 = vld [vmem:[#allocation9_spill] sm:$0xff]  ;;  %vm7826_vm8 = vmand %vm4212_vm7, %vm4176_vm6 }
 0x1b2   : > { %v2783_v7 = vpop.f32.mrf.mxu0  ;;  %v2468_v37 = vadd.f32 %v2361_v57, %v7176_v20  ;;  %v7802_v12 = vsel %vm7760_vm2, 1.0, %v8916_v8  ;;  %v7805_v51 = vadd.s32 184, %v7090_v56  ;;  %v7810_v54 = vsel %vm7764_vm3, 1.0, %v8916_v8 }
 0x1b3   : > { %v7779_v0 = vadd.f32 %v2783_v7, %v2464_v13  ;;  %v3978_v13 = vmul.u32 18, %v3977_v15  ;;  %8959 = vst [vmem:[#allocation26_spill] sm:$0xff] %v7802_v12  ;;  %v5474_v7 = vpop.f32.mrf.mxu1  ;;  %8960 = vst [vmem:[#allocation27_spill] sm:$0xff] %v7810_v54  ;;  %v4317_v20 = vsel %vm7772_vm4, %v4281_v38, %v7691_v63  ;;  %v4315_v26 = vsel %vm7785_vm5, %v4279_v3, %v7712_v19 }
 0x1b4   : > { %v5508_v31 = vpop.f32.mrf.mxu0  ;;  %v2471_v15 = vadd.f32 %v5474_v7, %v8961_v52  ;;  %v3956_v17 = vmul.u32 18, %v3955_v45  ;;  %v3988_v63 = vshrl.u32 %v7742_v28, 4  ;;  %vm4174_vm9 = vcmp.ne.s32.totalorder %v7793_v40, 0 }
 0x1b5   : > { %v7797_v48 = vadd.f32 %v5508_v31, %v2467_v18  ;;  %v4284_v18 = vadd.s32 18, %v7735_v6  ;;  %v2364_v38 = vpop.f32.mrf.mxu1  ;;  %vm4210_vm11 = vcmp.lt.s32.totalorder %v7793_v40, 0  ;;  %v7834_v19 = vsub.s32 %v7638_v2, %v3978_v13 }
 0x1b6   : > { %v2786_v39 = vpop.f32.mrf.mxu0  ;;  %v7840_v31 = vmul.u32.u64.low 3817748708, %v7805_v51  ;;  %v7841_v7 = vmul.u32.u64.high 3817748708, %v7805_v51, %v7840_v31  ;;  %vm7843_vm10 = vcmp.lt.s32.totalorder %v4317_v20, 16  ;;  %v4282_v13 = vadd.s32 18, %v7793_v40  ;;  %vm7859_vm12 = vmand %vm4210_vm11, %vm4174_vm9 }
 0x1b7   : > { %v7820_v61 = vadd.f32 %v2786_v39, %v2465_v44  ;;  %v4011_v44 = vmul.u32 18, %v4010_v49  ;;  %v8964_v39 = vld [vmem:[#allocation17_spill] sm:$0xff]  ;;  %v5477_v45 = vpop.f32.mrf.mxu1  ;;  %v4320_v2 = vsel %vm7826_vm8, %v4284_v18, %v7735_v6  ;;  %v7852_v49 = vadd.s32 168, %v7090_v56 }
 0x1b8   : > { %v5511_v59 = vpop.f32.mrf.mxu0  ;;  %v2469_v3 = vadd.f32 %v2364_v38, %v8964_v39  ;;  %v7864_v39 = vsub.s32 %v7645_v30, %v3956_v17  ;;  %v3989_v35 = vmul.u32 18, %v3988_v63  ;;  %vm7866_vm13 = vcmp.lt.s32.totalorder %v4315_v26, 16 }
 0x1b9   : > { %v7837_v57 = vadd.f32 %v5511_v59, %v2470_v36  ;;  %v8967_v36 = vld [vmem:[#allocation19_spill] sm:$0xff]  ;;  %v2377_v6 = vpop.f32.mrf.mxu1  ;;  %vm4177_vm14 = vcmp.ne.s32.totalorder %v7834_v19, 0  ;;  %vm4213_vm15 = vcmp.lt.s32.totalorder %v7834_v19, 0  ;;  %vm7878_vm0 = vcmp.lt.s32.totalorder %v4320_v2, 16 }
 0x1ba   : > { %v2799_v28 = vpop.f32.mrf.mxu0  ;;  %v2474_v38 = vadd.f32 %v5477_v45, %v8967_v36  ;;  %v8972_v45 = vld [vmem:[#allocation10_spill] sm:$0xff]  ;;  %v7883_v26 = vsub.s32 %v7672_v58, %v4011_v44  ;;  %v4318_v12 = vsel %vm7859_vm12, %v4282_v13, %v7793_v40  ;;  %v4285_v54 = vadd.s32 18, %v7834_v19  ;;  %vm7898_vm1 = vmand %vm4213_vm15, %vm4177_vm14 }
 0x1bb   : > { %v7855_v59 = vadd.f32 %v2799_v28, %v2468_v37  ;;  %v7873_v37 = vadd.s32 208, %v7090_v56  ;;  %v2472_v28 = vadd.f32 %v2377_v6, %v8972_v45  ;;  %v5478_v17 = vpop.f32.mrf.mxu1  ;;  %vm4175_vm2 = vcmp.ne.s32.totalorder %v7864_v39, 0 }
 0x1bc   : > { %v5512_v18 = vpop.f32.mrf.mxu0  ;;  %v7890_v9 = vmul.u32.u64.low 3817748708, %v7852_v49  ;;  %v7891_v6 = vmul.u32.u64.high 3817748708, %v7852_v49, %v7890_v9  ;;  %v7904_v40 = vsub.s32 %v7694_v16, %v3989_v35  ;;  %vm4211_vm3 = vcmp.lt.s32.totalorder %v7864_v39, 0 }
 0x1bd   : > { %v7876_v36 = vadd.f32 %v5512_v18, %v2471_v15  ;;  %v8975_v15 = vld [vmem:[#allocation11_spill] sm:$0xff]  ;;  %v2380_v44 = vpop.f32.mrf.mxu1  ;;  %v4021_v9 = vshrl.u32 %v7841_v7, 4  ;;  %vm4180_vm4 = vcmp.ne.s32.totalorder %v7883_v26, 0  ;;  %vm4216_vm5 = vcmp.lt.s32.totalorder %v7883_v26, 0  ;;  %vm7933_vm7 = vmand %vm4211_vm3, %vm4175_vm2 }
 0x1be   : > { %v2802_v63 = vpop.f32.mrf.mxu0  ;;  %v2475_v2 = vadd.f32 %v5478_v17, %v8975_v15  ;;  %v2473_v45 = vadd.f32 %v2380_v44, %v7273_v34  ;;  %vm7917_vm6 = vcmp.lt.s32.totalorder %v4318_v12, 16  ;;  %v4321_v7 = vsel %vm7898_vm1, %v4285_v54, %v7834_v19  ;;  %vm7953_vm11 = vmand %vm4216_vm5, %vm4180_vm4 }
 0x1bf   : > { %v7894_v18 = vadd.f32 %v2802_v63, %v2469_v3  ;;  %v7909_v3 = vmul.u32.u64.low 3817748708, %v7873_v37  ;;  %v7910_v20 = vmul.u32.u64.high 3817748708, %v7873_v37, %v7909_v3  ;;  %v5481_v16 = vpop.f32.mrf.mxu1  ;;  %v4283_v15 = vadd.s32 18, %v7864_v39 }
 0x1c0   : > { %v5515_v13 = vpop.f32.mrf.mxu0  ;;  %v4288_v34 = vadd.s32 18, %v7883_v26  ;;  %vm4178_vm8 = vcmp.ne.s32.totalorder %v7904_v40, 0  ;;  %vm4214_vm9 = vcmp.lt.s32.totalorder %v7904_v40, 0  ;;  %v7958_v3 = vadd.s32 192, %v7090_v56 }
 0x1c1   : > { %v7913_v17 = vadd.f32 %v5515_v13, %v2474_v38  ;;  %v2478_v38 = vadd.f32 %v5481_v16, %v7283_v4  ;;  %v2393_v54 = vpop.f32.mrf.mxu1  ;;  %v7942_v4 = vsel %vm7843_vm10, 1.0, %v8916_v8  ;;  %v4022_v13 = vmul.u32 18, %v4021_v9  ;;  %vm7985_vm12 = vmand %vm4214_vm9, %vm4178_vm8 }
 0x1c2   : > { %v2815_v35 = vpop.f32.mrf.mxu0  ;;  %8984 = vst [vmem:[#allocation19_spill] sm:$0xff] %v7942_v4  ;;  %v2476_v52 = vadd.f32 %v2393_v54, %v7300_v22  ;;  %v4286_v31 = vadd.s32 18, %v7904_v40  ;;  %v7975_v9 = vsel %vm7917_vm6, 1.0, %v8916_v8  ;;  %vm7977_vm10 = vcmp.lt.s32.totalorder %v4321_v7, 16 }
 0x1c3   : > { %8978 = vst [vmem:[#allocation9_spill] sm:$0xff] %v7913_v17  ;;  %v7927_v44 = vadd.f32 %v2815_v35, %v2472_v28  ;;  %v7947_v28 = vsel %vm7866_vm13, 1.0, %v8916_v8  ;;  %v7965_v35 = vadd.s32 216, %v7090_v56  ;;  %v5482_v4 = vpop.f32.mrf.mxu1  ;;  %8990 = vst [vmem:[#allocation29_spill] sm:$0xff] %v7975_v9  ;;  %v3999_v30 = vshrl.u32 %v7891_v6, 4 }
 0x1c4   : > { %v5516_v19 = vpop.f32.mrf.mxu0  ;;  %8985 = vst [vmem:[#allocation10_spill] sm:$0xff] %v7947_v28  ;;  %v2479_v54 = vadd.f32 %v5482_v4, %v7311_v41  ;;  %v4319_v63 = vsel %vm7933_vm7, %v4283_v15, %v7864_v39  ;;  %v4324_v7 = vsel %vm7953_vm11, %v4288_v34, %v7883_v26  ;;  %v4054_v17 = vshrl.u32 %v7910_v20, 4 }
 0x1c5   : > { %8981 = vst [vmem:[#allocation17_spill] sm:$0xff] %v7927_v44  ;;  %v7961_v16 = vadd.f32 %v5516_v19, %v2475_v2  ;;  %v7970_v44 = vsel %vm7878_vm0, 1.0, %v8916_v8  ;;  %v8004_v6 = vmul.u32.u64.low 3817748708, %v7958_v3  ;;  %v8005_v41 = vmul.u32.u64.high 3817748708, %v7958_v3, %v8004_v6 }
 0x1c6   : > { %v2818_v28 = vpop.f32.mrf.mxu0  ;;  %8989 = vst [vmem:[#allocation28_spill] sm:$0xff] %v7970_v44  ;;  %v2396_v44 = vpop.f32.mrf.mxu1  ;;  %v4322_v39 = vsel %vm7985_vm12, %v4286_v31, %v7904_v40  ;;  %v8014_v26 = vadd.s32 200, %v7090_v56  ;;  %vm8016_vm13 = vcmp.lt.s32.totalorder %v4319_v63, 16  ;;  %v4000_v20 = vmul.u32 18, %v3999_v30 }
 0x1c7   : > { %8988 = vst [vmem:[#allocation11_spill] sm:$0xff] %v7961_v16  ;;  %v7991_v19 = vadd.f32 %v2818_v28, %v2473_v45  ;;  %v8000_v16 = vsub.s32 %v7805_v51, %v4022_v13  ;;  %v2477_v45 = vadd.f32 %v2396_v44, %v7330_v14  ;;  %vm8027_vm14 = vcmp.lt.s32.totalorder %v4324_v7, 16 }
 0x1c8   : > { %v5519_v9 = vpop.f32.mrf.mxu0  ;;  %v5485_v15 = vpop.f32.mrf.mxu1  ;;  %v8021_v12 = vmul.u32.u64.low 3817748708, %v7965_v35  ;;  %v8022_v28 = vmul.u32.u64.high 3817748708, %v7965_v35, %v8021_v12  ;;  %v8032_v44 = vadd.s32 240, %v7090_v56  ;;  %vm8034_vm15 = vcmp.lt.s32.totalorder %v4322_v39, 16 }
 0x1c9   : > { %v8008_v4 = vadd.f32 %v5519_v9, %v2478_v38  ;;  %v2482_v14 = vadd.f32 %v5485_v15, %v7360_v62  ;;  %vm4181_vm0 = vcmp.ne.s32.totalorder %v8000_v16, 0  ;;  %vm4217_vm1 = vcmp.lt.s32.totalorder %v8000_v16, 0 }
 0x1ca   : > { %v2831_v51 = vpop.f32.mrf.mxu0  ;;  %v2409_v58 = vpop.f32.mrf.mxu1  ;;  %v4055_v62 = vmul.u32 18, %v4054_v17  ;;  %v8044_v2 = vmul.u32.u64.low 3817748708, %v8014_v26  ;;  %v8045_v30 = vmul.u32.u64.high 3817748708, %v8014_v26, %v8044_v2  ;;  %v8050_v6 = vsel %vm7977_vm10, 1.0, %v8916_v8  ;;  %vm8078_vm2 = vmand %vm4217_vm1, %vm4181_vm0 }
 0x1cb   : > { %v8025_v38 = vadd.f32 %v2831_v51, %v2476_v52  ;;  %v2480_v52 = vadd.f32 %v2409_v58, %v7373_v25  ;;  %v8055_v39 = vsel %vm8016_vm13, 1.0, %v8916_v8  ;;  %v4289_v25 = vadd.s32 18, %v8000_v16 }
 0x1cc   : > { %v5520_v13 = vpop.f32.mrf.mxu0  ;;  %v5486_v63 = vpop.f32.mrf.mxu1  ;;  %v8059_v17 = vsub.s32 %v7852_v49, %v4000_v20  ;;  %v8067_v22 = vsel %vm8027_vm14, 1.0, %v8916_v8  ;;  %v8072_v51 = vsel %vm8034_vm15, 1.0, %v8916_v8  ;;  %v8083_v34 = vsub.s32 %v7873_v37, %v4055_v62 }
 0x1cd   : > { %v8041_v9 = vadd.f32 %v5520_v13, %v2479_v54  ;;  %v2483_v54 = vadd.f32 %v5486_v63, %v7393_v55  ;;  %9001 = vst [vmem:[#allocation30_spill] sm:$0xff] %v8067_v22  ;;  %9002 = vst [vmem:[#allocation31_spill] sm:$0xff] %v8072_v51  ;;  %v4032_v20 = vshrl.u32 %v8005_v41, 4  ;;  %v8087_v12 = vadd.s32 224, %v7090_v56 }
 0x1ce   : > { %v2834_v7 = vpop.f32.mrf.mxu0  ;;  %v2412_v55 = vpop.f32.mrf.mxu1  ;;  %v8090_v40 = vadd.s32 248, %v7090_v56  ;;  %v8096_v31 = vmul.u32.u64.low 3817748708, %v8032_v44  ;;  %v8097_v2 = vmul.u32.u64.high 3817748708, %v8032_v44, %v8096_v31  ;;  %v4325_v37 = vsel %vm8078_vm2, %v4289_v25, %v8000_v16 }
 0x1cf   : > { %v8062_v15 = vadd.f32 %v2834_v7, %v2477_v45  ;;  %v2481_v58 = vadd.f32 %v2412_v55, %v7408_v42  ;;  %vm4179_vm3 = vcmp.ne.s32.totalorder %v8059_v17, 0  ;;  %v4065_v41 = vshrl.u32 %v8022_v28, 4 }
 0x1d0   : > { %v5523_v45 = vpop.f32.mrf.mxu0  ;;  %v5489_v63 = vpop.f32.mrf.mxu1  ;;  %v8105_v62 = vadd.s32 232, %v7090_v56  ;;  %vm4215_vm4 = vcmp.lt.s32.totalorder %v8059_v17, 0  ;;  %v4287_v55 = vadd.s32 18, %v8059_v17  ;;  %vm4184_vm5 = vcmp.ne.s32.totalorder %v8083_v34, 0 }
 0x1d1   : > { %v8093_v13 = vadd.f32 %v5523_v45, %v2482_v14  ;;  %v2486_v42 = vadd.f32 %v5489_v63, %v7419_v43  ;;  %v4033_v16 = vmul.u32 18, %v4032_v20  ;;  %vm4220_vm6 = vcmp.lt.s32.totalorder %v8083_v34, 0  ;;  %vm8124_vm7 = vmand %vm4215_vm4, %vm4179_vm3 }
 0x1d2   : > { %v2847_v7 = vpop.f32.mrf.mxu0  ;;  %v2425_v45 = vpop.f32.mrf.mxu1  ;;  %v8114_v25 = vmul.u32.u64.low 3817748708, %v8087_v12  ;;  %v8115_v49 = vmul.u32.u64.high 3817748708, %v8087_v12, %v8114_v25  ;;  %v4043_v43 = vshrl.u32 %v8045_v30, 4  ;;  %v4066_v20 = vmul.u32 18, %v4065_v41  ;;  %vm8161_vm9 = vmand %vm4220_vm6, %vm4184_vm5 }
 0x1d3   : > { %9005 = vst [vmem:[#allocation32_spill] sm:$0xff] %v8093_v13  ;;  %v8108_v14 = vadd.f32 %v2847_v7, %v2480_v52  ;;  %v2484_v28 = vadd.f32 %v2425_v45, %v7446_v1  ;;  %v8130_v25 = vmul.u32.u64.low 3817748708, %v8090_v40  ;;  %v8131_v1 = vmul.u32.u64.high 3817748708, %v8090_v40, %v8130_v25 }
 0x1d4   : > { %v5524_v31 = vpop.f32.mrf.mxu0  ;;  %v5490_v52 = vpop.f32.mrf.mxu1  ;;  %vm8136_vm8 = vcmp.lt.s32.totalorder %v4325_v37, 16  ;;  %v8144_v41 = vsub.s32 %v7958_v3, %v4033_v16  ;;  %v8148_v25 = vmul.u32.u64.low 3817748708, %v8105_v62  ;;  %v8149_v13 = vmul.u32.u64.high 3817748708, %v8105_v62, %v8148_v25 }
 0x1d5   : > { %9006 = vst [vmem:[#allocation33_spill] sm:$0xff] %v8108_v14  ;;  %v8118_v22 = vadd.f32 %v5524_v31, %v2483_v54  ;;  %v4098_v14 = vshrl.u32 %v8097_v2, 4  ;;  %v2487_v54 = vadd.f32 %v5490_v52, %v7469_v29  ;;  %v8141_v31 = vadd.s32 18, %v8083_v34 }
 0x1d6   : > { %v2850_v63 = vpop.f32.mrf.mxu0  ;;  %v4076_v2 = vshrl.u32 %v8115_v49, 4  ;;  %v4323_v37 = vsel %vm8124_vm7, %v4287_v55, %v8059_v17  ;;  %v4044_v16 = vmul.u32 18, %v4043_v43  ;;  %v8178_v55 = vsel %vm8136_vm8, 1.0, %v8916_v8 }
 0x1d7   : > { %9007 = vst [vmem:[#allocation34_spill] sm:$0xff] %v8118_v22  ;;  %v8134_v45 = vadd.f32 %v2850_v63, %v2481_v58  ;;  %v2428_v22 = vpop.f32.mrf.mxu1  ;;  %v8166_v63 = vsub.s32 %v7965_v35, %v4066_v20  ;;  %vm8180_vm11 = vcmp.lt.s32.totalorder %v4323_v37, 16  ;;  %vm4182_vm10 = vcmp.ne.s32.totalorder %v8144_v41, 0 }
 0x1d8   : > { %v5527_v51 = vpop.f32.mrf.mxu0  ;;  %v2485_v29 = vadd.f32 %v2428_v22, %v7504_v32  ;;  %v4099_v32 = vmul.u32 18, %v4098_v14  ;;  %v4109_v22 = vshrl.u32 %v8131_v1, 4  ;;  %v4077_v43 = vmul.u32 18, %v4076_v2 }
 0x1d9   : > { %v8152_v58 = vadd.f32 %v5527_v51, %v2486_v42  ;;  %v5493_v49 = vpop.f32.mrf.mxu1  ;;  %v8170_v51 = vadd.s32 272, %v7090_v56  ;;  %v4328_v14 = vsel %vm8161_vm9, %v8141_v31, %v8083_v34  ;;  %vm4218_vm12 = vcmp.lt.s32.totalorder %v8144_v41, 0 }
 0x1da   : > { %v2863_v52 = vpop.f32.mrf.mxu0  ;;  %v2490_v17 = vadd.f32 %v5493_v49, %v7529_v21  ;;  %v4110_v21 = vmul.u32 18, %v4109_v22  ;;  %v8194_v1 = vsub.s32 %v8014_v26, %v4044_v16  ;;  %v4290_v37 = vadd.s32 18, %v8144_v41  ;;  %vm8227_vm15 = vmand %vm4218_vm12, %vm4182_vm10 }
 0x1db   : > { %v8173_v42 = vadd.f32 %v2863_v52, %v2484_v28  ;;  %v2441_v7 = vpop.f32.mrf.mxu1  ;;  %vm4185_vm13 = vcmp.ne.s32.totalorder %v8166_v63, 0  ;;  %v8199_v34 = vsub.s32 %v8032_v44, %v4099_v32  ;;  %v4087_v31 = vshrl.u32 %v8149_v13, 4 }
 0x1dc   : > { %v5528_v25 = vpop.f32.mrf.mxu0  ;;  %v2488_v28 = vadd.f32 %v2441_v7, %v7544_v5  ;;  %vm4221_vm14 = vcmp.lt.s32.totalorder %v8166_v63, 0  ;;  %v8207_v26 = vsub.s32 %v8087_v12, %v4077_v43  ;;  %v4293_v49 = vadd.s32 18, %v8166_v63 }
 0x1dd   : > { %v8190_v20 = vadd.f32 %v5528_v25, %v2487_v54  ;;  %v5494_v30 = vpop.f32.mrf.mxu1  ;;  %v8211_v52 = vsub.s32 %v8090_v40, %v4110_v21  ;;  %v8214_v44 = vmul.u32.u64.low 3817748708, %v8170_v51  ;;  %v8215_v32 = vmul.u32.u64.high 3817748708, %v8170_v51, %v8214_v44  ;;  %vm8237_vm2 = vmand %vm4221_vm14, %vm4185_vm13 }
 0x1de   : > { %v2866_v2 = vpop.f32.mrf.mxu0  ;;  %v2491_v5 = vadd.f32 %v5494_v30, %v7558_v50  ;;  %vm4183_vm0 = vcmp.ne.s32.totalorder %v8194_v1, 0  ;;  %vm4219_vm1 = vcmp.lt.s32.totalorder %v8194_v1, 0  ;;  %vm4188_vm3 = vcmp.ne.s32.totalorder %v8199_v34, 0 }
 0x1df   : > { %v8203_v54 = vadd.f32 %v2866_v2, %v2485_v29  ;;  %v2444_v3 = vpop.f32.mrf.mxu1  ;;  %vm4224_vm4 = vcmp.lt.s32.totalorder %v8199_v34, 0  ;;  %v4088_v22 = vmul.u32 18, %v4087_v31  ;;  %v4291_v7 = vadd.s32 18, %v8194_v1  ;;  %vm8260_vm8 = vmand %vm4219_vm1, %vm4183_vm0 }
 0x1e0   : > { %v5531_v16 = vpop.f32.mrf.mxu0  ;;  %v2489_v50 = vadd.f32 %v2444_v3, %v7577_v46  ;;  %vm4186_vm5 = vcmp.ne.s32.totalorder %v8207_v26, 0  ;;  %vm4222_vm6 = vcmp.lt.s32.totalorder %v8207_v26, 0  ;;  %vm8252_vm7 = vcmp.lt.s32.totalorder %v4328_v14, 16  ;;  %vm8279_vm12 = vmand %vm4224_vm4, %vm4188_vm3 }
 0x1e1   : > { %v8218_v13 = vadd.f32 %v5531_v16, %v2490_v17  ;;  %v5537_v40 = vpop.f32.mrf.mxu1  ;;  %v8244_v17 = vadd.s32 256, %v7090_v56  ;;  %v4296_v2 = vadd.s32 18, %v8199_v34  ;;  %vm4189_vm9 = vcmp.ne.s32.totalorder %v8211_v52, 0  ;;  %vm8288_vm13 = vmand %vm4222_vm6, %vm4186_vm5 }
 0x1e2   : > { %v2879_v29 = vpop.f32.mrf.mxu0  ;;  %vm4225_vm10 = vcmp.lt.s32.totalorder %v8211_v52, 0  ;;  %v4326_v14 = vsel %vm8227_vm15, %v4290_v37, %v8144_v41  ;;  %v4329_v3 = vsel %vm8237_vm2, %v4293_v49, %v8166_v63  ;;  %v4294_v44 = vadd.s32 18, %v8207_v26 }
 0x1e3   : > { %9016 = vst [vmem:[#allocation35_spill] sm:$0xff] %v8218_v13  ;;  %v8246_v43 = vadd.f32 %v2879_v29, %v2488_v28  ;;  %v3197_v25 = vpop.f32.mrf.mxu1  ;;  %v4297_v63 = vadd.s32 18, %v8211_v52  ;;  %v8294_v37 = vsub.s32 %v8105_v62, %v4088_v22  ;;  %v3342_v46 = vadd.f32 %v5537_v40, %v7611_v47  ;;  %vm8315_vm14 = vmand %vm4225_vm10, %vm4189_vm9 }
 0x1e4   : > { %v5532_v21 = vpop.f32.mrf.mxu0  ;;  %v8297_v49 = vmul.u32.u64.low 3817748708, %v8244_v17  ;;  %v8298_v12 = vmul.u32.u64.high 3817748708, %v8244_v17, %v8297_v49  ;;  %v8322_v35 = vsel %vm8252_vm7, 1.0, %v8916_v8  ;;  %v4142_v22 = vshrl.u32 %v8215_v32, 4  ;;  %v9051_v32 = vld [vmem:[#allocation21_spill] sm:$0xff] }
 0x1e5   : > { %9021 = vst [vmem:[#allocation36_spill] sm:$0xff] %v8246_v43  ;;  %v8267_v31 = vadd.f32 %v5532_v21, %v2491_v5  ;;  %v5538_v5 = vpop.f32.mrf.mxu1  ;;  %v4327_v43 = vsel %vm8260_vm8, %v4291_v7, %v8194_v1  ;;  %v4332_v1 = vsel %vm8279_vm12, %v4296_v2, %v8199_v34  ;;  %v3340_v7 = vadd.f32 %v3197_v25, %v7626_v53 }
 0x1e6   : > { %v2882_v29 = vpop.f32.mrf.mxu0  ;;  %vm8333_vm15 = vcmp.lt.s32.totalorder %v4329_v3, 16  ;;  %v4330_v30 = vsel %vm8288_vm13, %v4294_v44, %v8207_v26  ;;  %vm8340_vm0 = vcmp.lt.s32.totalorder %v4327_v43, 16  ;;  %v4333_v34 = vsel %vm8315_vm14, %v4297_v63, %v8211_v52 }
 0x1e7   : > { %9026 = vst [vmem:[#allocation37_spill] sm:$0xff] %v8267_v31  ;;  %v8301_v21 = vadd.f32 %v2882_v29, %v2489_v50  ;;  %v8306_v31 = vsel %vm8180_vm11, 1.0, %v8916_v8  ;;  %v3200_v47 = vpop.f32.mrf.mxu1  ;;  %vm8324_vm11 = vcmp.lt.s32.totalorder %v4326_v14, 16  ;;  %vm4187_vm1 = vcmp.ne.s32.totalorder %v8294_v37, 0 }
 0x1e8   : > { %v5575_v50 = vpop.f32.mrf.mxu0  ;;  %vm4223_vm2 = vcmp.lt.s32.totalorder %v8294_v37, 0  ;;  %v8357_v26 = vsel %vm8324_vm11, 1.0, %v8916_v8  ;;  %vm8359_vm3 = vcmp.lt.s32.totalorder %v4332_v1, 16  ;;  %v8364_v52 = vadd.s32 280, %v7090_v56 }
 0x1e9   : > { %9031 = vst [vmem:[#allocation38_spill] sm:$0xff] %v8301_v21  ;;  %v3655_v28 = vadd.f32 %v5575_v50, %v3342_v46  ;;  %v5541_v14 = vpop.f32.mrf.mxu1  ;;  %v3343_v43 = vadd.f32 %v5538_v5, %v7641_v10  ;;  %vm8367_vm4 = vcmp.lt.s32.totalorder %v4330_v30, 16  ;;  %v4295_v16 = vadd.s32 18, %v8294_v37  ;;  %vm8392_vm6 = vmand %vm4223_vm2, %vm4187_vm1  ;;  %v9053_v5 = vld [vmem:[#allocation23_spill] sm:$0xff] }
 0x1ea   : > { %v3510_v49 = vpop.f32.mrf.mxu0  ;;  %v4143_v44 = vmul.u32 18, %v4142_v22  ;;  %v3341_v41 = vadd.f32 %v3200_v47, %v7663_v60  ;;  %v8377_v63 = vsel %vm8333_vm15, 1.0, %v8916_v8  ;;  %v8382_v10 = vsel %vm8340_vm0, 1.0, %v8916_v8 }
 0x1eb   : > { %3691 = vst [vmem:[%s8351_s14 + $0x10] sm:$0xff] %v3655_v28  ;;  %v3653_v53 = vadd.f32 %v3510_v49, %v3340_v7  ;;  %v3213_v25 = vpop.f32.mrf.mxu1  ;;  %vm8384_vm5 = vcmp.lt.s32.totalorder %v4333_v34, 16  ;;  %v8399_v21 = vsel %vm8359_vm3, 1.0, %v8916_v8  ;;  %v4120_v50 = vshrl.u32 %v8298_v12, 4 }
 0x1ec   : > { %v5576_v2 = vpop.f32.mrf.mxu0  ;;  %9048 = vst [vmem:[#allocation39_spill] sm:$0xff] %v8399_v21  ;;  %v8403_v40 = vadd.s32 264, %v7090_v56  ;;  %v3346_v1 = vadd.f32 %v5541_v14, %v7675_v24  ;;  %v8409_v29 = vsel %vm8367_vm4, 1.0, %v8916_v8  ;;  %v4526_v30 = vmul.f32 %v3655_v28, %v3655_v28 }
 0x1ed   : > { %3689 = vst [vmem:[%s8351_s14] sm:$0xff] %v3653_v53  ;;  %v5542_v46 = vpop.f32.mrf.mxu1  ;;  %v3656_v62 = vadd.f32 %v5576_v2, %v3343_v43  ;;  %v4524_v22 = vmul.f32 %v3653_v53, %v3653_v53  ;;  %9049 = vst [vmem:[#allocation40_spill] sm:$0xff] %v8409_v29  ;;  %v8415_v12 = vsel %vm8384_vm5, 1.0, %v8916_v8  ;;  %v4331_v56 = vsel %vm8392_vm6, %v4295_v16, %v8294_v37 }
 0x1ee   : > { %v3513_v47 = vpop.f32.mrf.mxu0  ;;  %9050 = vst [vmem:[#allocation41_spill] sm:$0xff] %v8415_v12  ;;  %v8421_v24 = vsub.s32 %v8170_v51, %v4143_v44  ;;  %v4446_v14 = vmul.f32 %v7341_v27, %v3653_v53  ;;  %v3344_v21 = vadd.f32 %v3213_v25, %v9053_v5  ;;  %v4121_v60 = vmul.u32 18, %v4120_v50  ;;  %v9056_v50 = vld [vmem:[#allocation13_spill] sm:$0xff] }
 0x1ef   : > { %v3654_v7 = vadd.f32 %v3513_v47, %v3341_v41  ;;  %3692 = vst [vmem:[%s8351_s14 + $0x18] sm:$0xff] %v3656_v62  ;;  %v3216_v49 = vpop.f32.mrf.mxu1  ;;  %v9052_v41 = vld [vmem:[#allocation12_spill] sm:$0xff]  ;;  %v4527_v12 = vmul.f32 %v3656_v62, %v3656_v62  ;;  %v4560_v37 = vmul.f32 %v7341_v27, %v4524_v22  ;;  %v3347_v51 = vadd.f32 %v5542_v46, %v7720_v23 }
 0x1f0   : > { %v5579_v34 = vpop.f32.mrf.mxu0  ;;  %v4448_v47 = vmul.f32 %v9052_v41, %v3655_v28  ;;  %v4562_v44 = vmul.f32 %v9052_v41, %v4526_v30  ;;  %vm8433_vm7 = vcmp.lt.s32.totalorder %v4331_v56, 16  ;;  %vm4192_vm8 = vcmp.ne.s32.totalorder %v8421_v24, 0 }
 0x1f1   : > { %3690 = vst [vmem:[%s8351_s14 + $0x8] sm:$0xff] %v3654_v7  ;;  %v4447_v43 = vmul.f32 %v9051_v32, %v3654_v7  ;;  %v4525_v2 = vmul.f32 %v3654_v7, %v3654_v7  ;;  %v3659_v3 = vadd.f32 %v5579_v34, %v3346_v1  ;;  %v5545_v29 = vpop.f32.mrf.mxu1  ;;  %v4449_v27 = vmul.f32 %v9056_v50, %v3656_v62 }
 0x1f2   : > { %v3526_v13 = vpop.f32.mrf.mxu0  ;;  %v4563_v34 = vmul.f32 %v9056_v50, %v4527_v12  ;;  %vm4228_vm9 = vcmp.lt.s32.totalorder %v8421_v24, 0 }
 0x1f3   : > { %v4482_v16 = vadd.f32 %v4447_v43, %v4446_v14  ;;  %v4561_v53 = vmul.f32 %v9051_v32, %v4525_v2  ;;  %3695 = vst [vmem:[%s8351_s14 + $0x30] sm:$0xff] %v3659_v3  ;;  %v3229_v1 = vpop.f32.mrf.mxu1  ;;  %v3657_v7 = vadd.f32 %v3526_v13, %v3344_v21  ;;  %v3345_v14 = vadd.f32 %v3216_v49, %v7738_v33  ;;  %v9057_v43 = vld [vmem:[#allocation15_spill] sm:$0xff]  ;;  %vm8469_vm10 = vmand %vm4228_vm9, %vm4192_vm8 }
 0x1f4   : > { %v5580_v28 = vpop.f32.mrf.mxu0  ;;  %v3350_v32 = vadd.f32 %v5545_v29, %v7748_v11  ;;  %v4530_v41 = vmul.f32 %v3659_v3, %v3659_v3  ;;  %v8447_v33 = vmul.u32.u64.low 3817748708, %v8364_v52  ;;  %v8448_v49 = vmul.u32.u64.high 3817748708, %v8364_v52, %v8447_v33  ;;  %v9058_v29 = vld [vmem:[#allocation18_spill] sm:$0xff] }
 0x1f5   : > { %v4483_v23 = vadd.f32 %v4482_v16, %v4448_v47  ;;  %v4596_v46 = vadd.f32 %v4561_v53, %v4560_v37  ;;  %v3660_v22 = vadd.f32 %v5580_v28, %v3347_v51  ;;  %3693 = vst [vmem:[%s8351_s14 + $0x20] sm:$0xff] %v3657_v7  ;;  %v4528_v30 = vmul.f32 %v3657_v7, %v3657_v7  ;;  %v5546_v13 = vpop.f32.mrf.mxu1 }
 0x1f6   : > { %v3529_v21 = vpop.f32.mrf.mxu0  ;;  %v4450_v2 = vmul.f32 %v9057_v43, %v3657_v7  ;;  %v3348_v11 = vadd.f32 %v3229_v1, %v7779_v0 }
 0x1f7   : > { %v4597_v56 = vadd.f32 %v4596_v46, %v4562_v44  ;;  %v4484_v62 = vadd.f32 %v4483_v23, %v4449_v27  ;;  %3696 = vst [vmem:[%s8351_s14 + $0x38] sm:$0xff] %v3660_v22  ;;  %v3232_v47 = vpop.f32.mrf.mxu1  ;;  %v3658_v5 = vadd.f32 %v3529_v21, %v3345_v14  ;;  %v4564_v51 = vmul.f32 %v9057_v43, %v4528_v30  ;;  %v9059_v30 = vld [vmem:[#allocation14_spill] sm:$0xff] }
 0x1f8   : > { %v5583_v12 = vpop.f32.mrf.mxu0  ;;  %v8456_v27 = vadd.s32 18, %v8421_v24  ;;  %v3351_v46 = vadd.f32 %v5546_v13, %v7797_v48  ;;  %v4531_v14 = vmul.f32 %v3660_v22, %v3660_v22  ;;  %v4452_v0 = vmul.f32 %v9059_v30, %v3659_v3 }
 0x1f9   : > { %v4485_v37 = vadd.f32 %v4484_v62, %v4450_v2  ;;  %v4598_v16 = vadd.f32 %v4597_v56, %v4563_v34  ;;  %v3663_v53 = vadd.f32 %v5583_v12, %v3350_v32  ;;  %3694 = vst [vmem:[%s8351_s14 + $0x28] sm:$0xff] %v3658_v5  ;;  %v4451_v44 = vmul.f32 %v9058_v29, %v3658_v5  ;;  %v5549_v28 = vpop.f32.mrf.mxu1  ;;  %v9062_v2 = vld [vmem:[#allocation16_spill] sm:$0xff] }
 0x1fa   : > { %v4529_v7 = vmul.f32 %v3658_v5, %v3658_v5  ;;  %v3542_v50 = vpop.f32.mrf.mxu0  ;;  %v8461_v34 = vsub.s32 %v8244_v17, %v4121_v60  ;;  %v4566_v17 = vmul.f32 %v9059_v30, %v4530_v41  ;;  %v3349_v60 = vadd.f32 %v3232_v47, %v7820_v61  ;;  %v9063_v47 = vld [vmem:[#allocation20_spill] sm:$0xff] }
 0x1fb   : > { %v4599_v23 = vadd.f32 %v4598_v16, %v4564_v51  ;;  %3699 = vst [vmem:[%s8351_s14 + $0x50] sm:$0xff] %v3663_v53  ;;  %v4486_v1 = vadd.f32 %v4485_v37, %v4451_v44  ;;  %v3245_v56 = vpop.f32.mrf.mxu1  ;;  %v3661_v32 = vadd.f32 %v3542_v50, %v3348_v11  ;;  %v8478_v13 = vsel %vm8433_vm7, 1.0, %v8916_v8 }
 0x1fc   : > { %v4565_v21 = vmul.f32 %v9058_v29, %v4529_v7  ;;  %v5584_v43 = vpop.f32.mrf.mxu0  ;;  %v4453_v62 = vmul.f32 %v9062_v2, %v3660_v22  ;;  %v4567_v16 = vmul.f32 %v9062_v2, %v4531_v14  ;;  %v4336_v61 = vsel %vm8469_vm10, %v8456_v27, %v8421_v24  ;;  %v9093_v27 = vld [vmem:[#allocation36_spill] sm:$0xff] }
 0x1fd   : > { %v3664_v3 = vadd.f32 %v5584_v43, %v3351_v46  ;;  %v4487_v5 = vadd.f32 %v4486_v1, %v4452_v0  ;;  %3697 = vst [vmem:[%s8351_s14 + $0x40] sm:$0xff] %v3661_v32  ;;  %v4532_v33 = vmul.f32 %v3661_v32, %v3661_v32  ;;  %v5550_v37 = vpop.f32.mrf.mxu1  ;;  %vm4190_vm12 = vcmp.ne.s32.totalorder %v8461_v34, 0  ;;  %v9064_v46 = vld [vmem:[#allocation25_spill] sm:$0xff] }
 0x1fe   : > { %v4600_v12 = vadd.f32 %v4599_v23, %v4565_v21  ;;  %v3545_v51 = vpop.f32.mrf.mxu0  ;;  %v3354_v22 = vadd.f32 %v5549_v28, %v7837_v57  ;;  %v4454_v11 = vmul.f32 %v9063_v47, %v3661_v32  ;;  %v4534_v50 = vmul.f32 %v3663_v53, %v3663_v53 }
 0x1ff   : > { %3700 = vst [vmem:[%s8351_s14 + $0x58] sm:$0xff] %v3664_v3  ;;  %v3662_v41 = vadd.f32 %v3545_v51, %v3349_v60  ;;  %v4488_v29 = vadd.f32 %v4487_v5, %v4453_v62  ;;  %v3248_v44 = vpop.f32.mrf.mxu1  ;;  %v3352_v23 = vadd.f32 %v3245_v56, %v7855_v59  ;;  %v4568_v1 = vmul.f32 %v9063_v47, %v4532_v33  ;;  %v9065_v59 = vld [vmem:[#allocation22_spill] sm:$0xff] }
 0x200   : > { %v4601_v25 = vadd.f32 %v4600_v12, %v4566_v17  ;;  %v5587_v7 = vpop.f32.mrf.mxu0  ;;  %v3355_v32 = vadd.f32 %v5550_v37, %v7876_v36  ;;  %v4535_v17 = vmul.f32 %v3664_v3, %v3664_v3  ;;  %v4456_v56 = vmul.f32 %v9065_v59, %v3663_v53  ;;  %v9066_v37 = vld [vmem:[#allocation24_spill] sm:$0xff] }
 0x201   : > { %3698 = vst [vmem:[%s8351_s14 + $0x48] sm:$0xff] %v3662_v41  ;;  %v4455_v14 = vmul.f32 %v9064_v46, %v3662_v41  ;;  %v4533_v30 = vmul.f32 %v3662_v41, %v3662_v41  ;;  %v4489_v0 = vadd.f32 %v4488_v29, %v4454_v11  ;;  %v5553_v43 = vpop.f32.mrf.mxu1  ;;  %v3667_v57 = vadd.f32 %v5587_v7, %v3354_v22 }
 0x202   : > { %v4602_v21 = vadd.f32 %v4601_v25, %v4567_v16  ;;  %v3558_v28 = vpop.f32.mrf.mxu0  ;;  %vm4226_vm13 = vcmp.lt.s32.totalorder %v8461_v34, 0  ;;  %v4570_v33 = vmul.f32 %v9065_v59, %v4534_v50  ;;  %v8503_v36 = vadd.s32 18, %v8461_v34 }
 0x203   : > { %v4569_v60 = vmul.f32 %v9064_v46, %v4533_v30  ;;  %v3665_v2 = vadd.f32 %v3558_v28, %v3352_v23  ;;  %v4490_v5 = vadd.f32 %v4489_v0, %v4455_v14  ;;  %3703 = vst [vmem:[%s8351_s14 + $0x70] sm:$0xff] %v3667_v57  ;;  %v3261_v12 = vpop.f32.mrf.mxu1  ;;  %v4457_v25 = vmul.f32 %v9066_v37, %v3664_v3  ;;  %v9067_v23 = vld [vmem:[#allocation9_spill] sm:$0xff]  ;;  %v9068_v0 = vld [vmem:[#allocation27_spill] sm:$0xff]  ;;  %vm8523_vm14 = vmand %vm4226_vm13, %vm4190_vm12 }
 0x204   : > { %v4603_v62 = vadd.f32 %v4602_v21, %v4568_v1  ;;  %v5588_v51 = vpop.f32.mrf.mxu0  ;;  %v3353_v53 = vadd.f32 %v3248_v44, %v7894_v18  ;;  %v4571_v7 = vmul.f32 %v9066_v37, %v4535_v17  ;;  %v3358_v46 = vadd.f32 %v5553_v43, %v9067_v23 }
 0x205   : > { %3701 = vst [vmem:[%s8351_s14 + $0x60] sm:$0xff] %v3665_v2  ;;  %v4536_v16 = vmul.f32 %v3665_v2, %v3665_v2  ;;  %v3668_v41 = vadd.f32 %v5588_v51, %v3355_v32  ;;  %v4491_v22 = vadd.f32 %v4490_v5, %v4456_v56  ;;  %v5554_v11 = vpop.f32.mrf.mxu1  ;;  %v4458_v1 = vmul.f32 %v9068_v0, %v3665_v2  ;;  %v9069_v32 = vld [vmem:[#allocation17_spill] sm:$0xff] }
 0x206   : > { %v4604_v47 = vadd.f32 %v4603_v62, %v4569_v60  ;;  %v3561_v29 = vpop.f32.mrf.mxu0  ;;  %v8511_v50 = vmul.u32.u64.low 3817748708, %v8403_v40  ;;  %v8512_v14 = vmul.u32.u64.high 3817748708, %v8403_v40, %v8511_v50  ;;  %v4538_v28 = vmul.f32 %v3667_v57, %v3667_v57  ;;  %v9070_v62 = vld [vmem:[#allocation10_spill] sm:$0xff] }
 0x207   : > { %3704 = vst [vmem:[%s8351_s14 + $0x78] sm:$0xff] %v3668_v41  ;;  %v4492_v3 = vadd.f32 %v4491_v22, %v4457_v25  ;;  %v3264_v21 = vpop.f32.mrf.mxu1  ;;  %v3666_v18 = vadd.f32 %v3561_v29, %v3353_v53  ;;  %v3356_v60 = vadd.f32 %v3261_v12, %v9069_v32  ;;  %v4572_v17 = vmul.f32 %v9068_v0, %v4536_v16  ;;  %v9073_v12 = vld [vmem:[#allocation26_spill] sm:$0xff]  ;;  %v9074_v25 = vld [vmem:[#allocation11_spill] sm:$0xff] }
 0x208   : > { %v4605_v30 = vadd.f32 %v4604_v47, %v4570_v33  ;;  %v5591_v44 = vpop.f32.mrf.mxu0  ;;  %v4460_v16 = vmul.f32 %v9073_v12, %v3667_v57  ;;  %v3359_v53 = vadd.f32 %v5554_v11, %v9074_v25  ;;  %v4153_v47 = vshrl.u32 %v8448_v49, 4 }
 0x209   : > { %v3671_v59 = vadd.f32 %v5591_v44, %v3358_v46  ;;  %v4493_v43 = vadd.f32 %v4492_v3, %v4458_v1  ;;  %3702 = vst [vmem:[%s8351_s14 + $0x68] sm:$0xff] %v3666_v18  ;;  %v4459_v5 = vmul.f32 %v9070_v62, %v3666_v18  ;;  %v4537_v51 = vmul.f32 %v3666_v18, %v3666_v18  ;;  %v5557_v33 = vpop.f32.mrf.mxu1  ;;  %v9075_v1 = vld [vmem:[#allocation19_spill] sm:$0xff] }
 0x20a   : > { %v4606_v56 = vadd.f32 %v4605_v30, %v4571_v7  ;;  %v3574_v37 = vpop.f32.mrf.mxu0  ;;  %v4539_v7 = vmul.f32 %v3668_v41, %v3668_v41  ;;  %v4574_v0 = vmul.f32 %v9073_v12, %v4538_v28  ;;  %v4461_v3 = vmul.f32 %v9075_v1, %v3668_v41 }
 0x20b   : > { %3707 = vst [vmem:[%s8351_s14 + $0x90] sm:$0xff] %v3671_v59  ;;  %v3669_v22 = vadd.f32 %v3574_v37, %v3356_v60  ;;  %v4494_v23 = vadd.f32 %v4493_v43, %v4459_v5  ;;  %v4573_v46 = vmul.f32 %v9070_v62, %v4537_v51  ;;  %v3277_v50 = vpop.f32.mrf.mxu1  ;;  %v3357_v18 = vadd.f32 %v3264_v21, %v7991_v19  ;;  %v9076_v62 = vld [vmem:[#allocation29_spill] sm:$0xff] }
 0x20c   : > { %v4607_v29 = vadd.f32 %v4606_v56, %v4572_v17  ;;  %v5592_v30 = vpop.f32.mrf.mxu0  ;;  %v4334_v49 = vsel %vm8523_vm14, %v8503_v36, %v8461_v34  ;;  %v3362_v28 = vadd.f32 %v5557_v33, %v8008_v4  ;;  %v4154_v41 = vmul.u32 18, %v4153_v47 }
 0x20d   : > { %3705 = vst [vmem:[%s8351_s14 + $0x80] sm:$0xff] %v3669_v22  ;;  %v4495_v57 = vadd.f32 %v4494_v23, %v4460_v16  ;;  %v4540_v44 = vmul.f32 %v3669_v22, %v3669_v22  ;;  %v5558_v32 = vpop.f32.mrf.mxu1  ;;  %v3672_v60 = vadd.f32 %v5592_v30, %v3359_v53  ;;  %v4131_v19 = vshrl.u32 %v8512_v14, 4 }
 0x20e   : > { %v4608_v11 = vadd.f32 %v4607_v29, %v4573_v46  ;;  %v3577_v17 = vpop.f32.mrf.mxu0  ;;  %v4575_v21 = vmul.f32 %v9075_v1, %v4539_v7  ;;  %v4462_v5 = vmul.f32 %v9076_v62, %v3669_v22  ;;  %v4542_v37 = vmul.f32 %v3671_v59, %v3671_v59  ;;  %v9077_v46 = vld [vmem:[#allocation28_spill] sm:$0xff] }
 0x20f   : > { %v3670_v43 = vadd.f32 %v3577_v17, %v3357_v18  ;;  %v4496_v51 = vadd.f32 %v4495_v57, %v4461_v3  ;;  %3708 = vst [vmem:[%s8351_s14 + $0x98] sm:$0xff] %v3672_v60  ;;  %v3280_v34 = vpop.f32.mrf.mxu1  ;;  %v3360_v33 = vadd.f32 %v3277_v50, %v8025_v38  ;;  %v4576_v14 = vmul.f32 %v9076_v62, %v4540_v44  ;;  %v9081_v62 = vld [vmem:[#allocation31_spill] sm:$0xff] }
 0x210   : > { %v4609_v56 = vadd.f32 %v4608_v11, %v4574_v0  ;;  %v5595_v36 = vpop.f32.mrf.mxu0  ;;  %v3363_v22 = vadd.f32 %v5558_v32, %v8041_v9  ;;  %v4543_v29 = vmul.f32 %v3672_v60, %v3672_v60  ;;  %v4132_v23 = vmul.u32 18, %v4131_v19 }
 0x211   : > { %3706 = vst [vmem:[%s8351_s14 + $0x88] sm:$0xff] %v3670_v43  ;;  %v4463_v2 = vmul.f32 %v8055_v39, %v3670_v43  ;;  %v4541_v12 = vmul.f32 %v3670_v43, %v3670_v43  ;;  %v3675_v4 = vadd.f32 %v5595_v36, %v3362_v28  ;;  %v4497_v16 = vadd.f32 %v4496_v51, %v4462_v5  ;;  %v5561_v53 = vpop.f32.mrf.mxu1 }
 0x212   : > { %v4610_v25 = vadd.f32 %v4609_v56, %v4575_v21  ;;  %v3590_v47 = vpop.f32.mrf.mxu0  ;;  %v4464_v30 = vmul.f32 %v9077_v46, %v3671_v59  ;;  %v4578_v18 = vmul.f32 %v9077_v46, %v4542_v37  ;;  %v3361_v57 = vadd.f32 %v3280_v34, %v8062_v15  ;;  %v9080_v56 = vld [vmem:[#allocation32_spill] sm:$0xff] }
 0x213   : > { %v4577_v7 = vmul.f32 %v8055_v39, %v4541_v12  ;;  %3711 = vst [vmem:[%s8351_s14 + $0xb0] sm:$0xff] %v3675_v4  ;;  %v4498_v1 = vadd.f32 %v4497_v16, %v4463_v2  ;;  %v3293_v38 = vpop.f32.mrf.mxu1  ;;  %v3673_v50 = vadd.f32 %v3590_v47, %v3360_v33  ;;  %vm8555_vm11 = vcmp.lt.s32.totalorder %v4334_v49, 16  ;;  %v9082_v2 = vld [vmem:[#allocation33_spill] sm:$0xff] }
 0x214   : > { %v4611_v0 = vadd.f32 %v4610_v25, %v4576_v14  ;;  %v5596_v3 = vpop.f32.mrf.mxu0  ;;  %v4465_v39 = vmul.f32 %v8050_v6, %v3672_v60  ;;  %v4579_v43 = vmul.f32 %v8050_v6, %v4543_v29  ;;  %v8564_v15 = vsub.s32 %v8364_v52, %v4154_v41 }
 0x215   : > { %v3676_v11 = vadd.f32 %v5596_v3, %v3363_v22  ;;  %v4499_v44 = vadd.f32 %v4498_v1, %v4464_v30  ;;  %3709 = vst [vmem:[%s8351_s14 + $0xa0] sm:$0xff] %v3673_v50  ;;  %v4544_v59 = vmul.f32 %v3673_v50, %v3673_v50  ;;  %v5562_v17 = vpop.f32.mrf.mxu1  ;;  %v8567_v49 = vsub.s32 %v8403_v40, %v4132_v23  ;;  %v9084_v23 = vld [vmem:[#allocation30_spill] sm:$0xff] }
 0x216   : > { %v4612_v32 = vadd.f32 %v4611_v0, %v4577_v7  ;;  %v3593_v28 = vpop.f32.mrf.mxu0  ;;  %v3366_v60 = vadd.f32 %v5561_v53, %v9080_v56  ;;  %v4466_v5 = vmul.f32 %v9081_v62, %v3673_v50  ;;  %v4546_v37 = vmul.f32 %v3675_v4, %v3675_v4  ;;  %v9083_v53 = vld [vmem:[#allocation34_spill] sm:$0xff] }
 0x217   : > { %3712 = vst [vmem:[%s8351_s14 + $0xb8] sm:$0xff] %v3676_v11  ;;  %v3674_v19 = vadd.f32 %v3593_v28, %v3361_v57  ;;  %v4500_v51 = vadd.f32 %v4499_v44, %v4465_v39  ;;  %v3296_v34 = vpop.f32.mrf.mxu1  ;;  %v3364_v12 = vadd.f32 %v3293_v38, %v9082_v2  ;;  %v4580_v40 = vmul.f32 %v9081_v62, %v4544_v59 }
 0x218   : > { %v4613_v21 = vadd.f32 %v4612_v32, %v4578_v18  ;;  %v5599_v36 = vpop.f32.mrf.mxu0  ;;  %v3367_v47 = vadd.f32 %v5562_v17, %v9083_v53  ;;  %v4547_v22 = vmul.f32 %v3676_v11, %v3676_v11  ;;  %v4468_v46 = vmul.f32 %v9084_v23, %v3675_v4 }
 0x219   : > { %3710 = vst [vmem:[%s8351_s14 + $0xa8] sm:$0xff] %v3674_v19  ;;  %v4467_v6 = vmul.f32 %v8306_v31, %v3674_v19  ;;  %v4545_v52 = vmul.f32 %v3674_v19, %v3674_v19  ;;  %v4501_v41 = vadd.f32 %v4500_v51, %v4466_v5  ;;  %v5565_v16 = vpop.f32.mrf.mxu1  ;;  %v3679_v14 = vadd.f32 %v5599_v36, %v3366_v60 }
 0x21a   : > { %v4614_v33 = vadd.f32 %v4613_v21, %v4579_v43  ;;  %v3606_v25 = vpop.f32.mrf.mxu0  ;;  %v8582_v50 = vsel %vm8555_vm11, 1.0, %v8916_v8  ;;  %v4582_v3 = vmul.f32 %v9084_v23, %v4546_v37  ;;  %vm4193_vm15 = vcmp.ne.s32.totalorder %v8564_v15, 0 }
 0x21b   : > { %v4581_v29 = vmul.f32 %v8306_v31, %v4545_v52  ;;  %v3677_v7 = vadd.f32 %v3606_v25, %v3364_v12  ;;  %v4502_v0 = vadd.f32 %v4501_v41, %v4467_v6  ;;  %3715 = vst [vmem:[%s8351_s14 + $0xd0] sm:$0xff] %v3679_v14  ;;  %v3309_v1 = vpop.f32.mrf.mxu1  ;;  %vm4229_vm0 = vcmp.lt.s32.totalorder %v8564_v15, 0 }
 0x21c   : > { %v4615_v30 = vadd.f32 %v4614_v33, %v4580_v40  ;;  %v5600_v38 = vpop.f32.mrf.mxu0  ;;  %v4469_v31 = vmul.f32 %v8178_v55, %v3676_v11  ;;  %v3365_v4 = vadd.f32 %v3296_v34, %v8134_v45  ;;  %v4583_v59 = vmul.f32 %v8178_v55, %v4547_v22  ;;  %vm8638_vm5 = vmand %vm4229_vm0, %vm4193_vm15 }
 0x21d   : > { %3713 = vst [vmem:[%s8351_s14 + $0xc0] sm:$0xff] %v3677_v7  ;;  %v4548_v18 = vmul.f32 %v3677_v7, %v3677_v7  ;;  %v3680_v57 = vadd.f32 %v5600_v38, %v3367_v47  ;;  %v4503_v39 = vadd.f32 %v4502_v0, %v4468_v46  ;;  %v5566_v32 = vpop.f32.mrf.mxu1  ;;  %v3370_v17 = vadd.f32 %v5565_v16, %v8152_v58 }
 0x21e   : > { %v4616_v44 = vadd.f32 %v4615_v30, %v4581_v29  ;;  %v3609_v9 = vpop.f32.mrf.mxu0  ;;  %vm4191_vm1 = vcmp.ne.s32.totalorder %v8567_v49, 0  ;;  %vm4227_vm2 = vcmp.lt.s32.totalorder %v8567_v49, 0  ;;  %v4470_v43 = vmul.f32 %v8357_v26, %v3677_v7  ;;  %v9089_v30 = vld [vmem:[#allocation35_spill] sm:$0xff] }
 0x21f   : > { %3716 = vst [vmem:[%s8351_s14 + $0xd8] sm:$0xff] %v3680_v57  ;;  %v4504_v11 = vadd.f32 %v4503_v39, %v4469_v31  ;;  %v3312_v19 = vpop.f32.mrf.mxu1  ;;  %v3678_v45 = vadd.f32 %v3609_v9, %v3365_v4  ;;  %v4550_v56 = vmul.f32 %v3679_v14, %v3679_v14  ;;  %v3368_v60 = vadd.f32 %v3309_v1, %v8173_v42  ;;  %vm8609_vm3 = vmand %vm4227_vm2, %vm4191_vm1 }
 0x220   : > { %v4617_v28 = vadd.f32 %v4616_v44, %v4582_v3  ;;  %v5603_v21 = vpop.f32.mrf.mxu0  ;;  %v4584_v55 = vmul.f32 %v8357_v26, %v4548_v18  ;;  %v4472_v2 = vmul.f32 %v8322_v35, %v3679_v14  ;;  %v4551_v12 = vmul.f32 %v3680_v57, %v3680_v57 }
 0x221   : > { %v3683_v58 = vadd.f32 %v5603_v21, %v3370_v17  ;;  %v4505_v62 = vadd.f32 %v4504_v11, %v4470_v43  ;;  %3714 = vst [vmem:[%s8351_s14 + $0xc8] sm:$0xff] %v3678_v45  ;;  %v4471_v51 = vmul.f32 %v8382_v10, %v3678_v45  ;;  %v4549_v34 = vmul.f32 %v3678_v45, %v3678_v45  ;;  %v5569_v36 = vpop.f32.mrf.mxu1  ;;  %v9096_v43 = vld [vmem:[#allocation37_spill] sm:$0xff] }
 0x222   : > { %v4618_v5 = vadd.f32 %v4617_v28, %v4583_v59  ;;  %v3622_v37 = vpop.f32.mrf.mxu0  ;;  %v4299_v52 = vadd.s32 18, %v8567_v49  ;;  %v3371_v26 = vadd.f32 %v5566_v32, %v8190_v20  ;;  %v4586_v14 = vmul.f32 %v8322_v35, %v4550_v56  ;;  %v9097_v56 = vld [vmem:[#allocation39_spill] sm:$0xff] }
 0x223   : > { %3719 = vst [vmem:[%s8351_s14 + $0xf0] sm:$0xff] %v3683_v58  ;;  %v3681_v6 = vadd.f32 %v3622_v37, %v3368_v60  ;;  %v4506_v41 = vadd.f32 %v4505_v62, %v4471_v51  ;;  %v4585_v40 = vmul.f32 %v8382_v10, %v4549_v34  ;;  %v3325_v33 = vpop.f32.mrf.mxu1  ;;  %v4473_v53 = vmul.f32 %v8377_v63, %v3680_v57  ;;  %v9090_v57 = vld [vmem:[#allocation40_spill] sm:$0xff] }
 0x224   : > { %v4619_v42 = vadd.f32 %v4618_v5, %v4584_v55  ;;  %v5604_v16 = vpop.f32.mrf.mxu0  ;;  %v3369_v47 = vadd.f32 %v3312_v19, %v8203_v54  ;;  %v4301_v20 = vadd.s32 18, %v8564_v15  ;;  %vm8623_vm4 = vcmp.lt.s32.totalorder %v4336_v61, 16 }
 0x225   : > { %3717 = vst [vmem:[%s8351_s14 + $0xe0] sm:$0xff] %v3681_v6  ;;  %v4507_v10 = vadd.f32 %v4506_v41, %v4472_v2  ;;  %v4552_v29 = vmul.f32 %v3681_v6, %v3681_v6  ;;  %v5570_v7 = vpop.f32.mrf.mxu1  ;;  %v3684_v23 = vadd.f32 %v5604_v16, %v3371_v26  ;;  %v4587_v54 = vmul.f32 %v8377_v63, %v4551_v12 }
 0x226   : > { %v4620_v22 = vadd.f32 %v4619_v42, %v4585_v40  ;;  %v3625_v46 = vpop.f32.mrf.mxu0  ;;  %v3374_v0 = vadd.f32 %v5569_v36, %v9089_v30  ;;  %v4335_v38 = vsel %vm8609_vm3, %v4299_v52, %v8567_v49  ;;  %v4554_v18 = vmul.f32 %v3683_v58, %v3683_v58  ;;  %v9098_v36 = vld [vmem:[#allocation38_spill] sm:$0xff] }
 0x227   : > { %v3682_v1 = vadd.f32 %v3625_v46, %v3369_v47  ;;  %v4474_v48 = vmul.f32 %v9090_v57, %v3681_v6  ;;  %v4508_v31 = vadd.f32 %v4507_v10, %v4473_v53  ;;  %3720 = vst [vmem:[%s8351_s14 + $0xf8] sm:$0xff] %v3684_v23  ;;  %v3372_v61 = vadd.f32 %v3325_v33, %v9093_v27  ;;  %v3328_v59 = vpop.f32.mrf.mxu1 }
 0x228   : > { %v4621_v3 = vadd.f32 %v4620_v22, %v4586_v14  ;;  %v5607_v24 = vpop.f32.mrf.mxu0  ;;  %v4588_v32 = vmul.f32 %v9090_v57, %v4552_v29  ;;  %vm8648_vm6 = vcmp.lt.s32.totalorder %v4335_v38, 16  ;;  %v3375_v11 = vadd.f32 %v5570_v7, %v9096_v43 }
 0x229   : > { %3718 = vst [vmem:[%s8351_s14 + $0xe8] sm:$0xff] %v3682_v1  ;;  %v4475_v49 = vmul.f32 %v8478_v13, %v3682_v1  ;;  %v4553_v4 = vmul.f32 %v3682_v1, %v3682_v1  ;;  %v8645_v39 = vadd.f32 %v5607_v24, %v3374_v0  ;;  %v4509_v44 = vadd.f32 %v4508_v31, %v4474_v48 }
 0x22a   : > { %v4622_v9 = vadd.f32 %v4621_v3, %v4587_v54  ;;  %v3638_v17 = vpop.f32.mrf.mxu0  ;;  %v4337_v21 = vsel %vm8638_vm5, %v4301_v20, %v8564_v15  ;;  %v4476_v60 = vmul.f32 %v9097_v56, %v3683_v58  ;;  %v4555_v62 = vmul.f32 %v3684_v23, %v3684_v23  ;;  %v9099_v15 = vld [vmem:[#allocation41_spill] sm:$0xff] }
 0x22b   : > { %v4589_v19 = vmul.f32 %v8478_v13, %v4553_v4  ;;  %3723 = vst [vmem:[%s8351_s14 + $0x110] sm:$0xff] %v8645_v39  ;;  %v3685_v45 = vadd.f32 %v3638_v17, %v3372_v61  ;;  %v4510_v5 = vadd.f32 %v4509_v44, %v4475_v49  ;;  %v4590_v34 = vmul.f32 %v9097_v56, %v4554_v18 }
 0x22c   : > { %v4623_v55 = vadd.f32 %v4622_v9, %v4588_v32  ;;  %v5608_v51 = vpop.f32.mrf.mxu0  ;;  %v3373_v13 = vadd.f32 %v3328_v59, %v9098_v36  ;;  %v5087_v2 = vsel %vm8648_vm6, 1.0, %v8916_v8  ;;  %v4477_v12 = vmul.f32 %v9099_v15, %v3684_v23 }
 0x22d   : > { %3721 = vst [vmem:[%s8351_s14 + $0x100] sm:$0xff] %v3685_v45  ;;  %v3688_v37 = vadd.f32 %v5608_v51, %v3375_v11  ;;  %v4511_v6 = vadd.f32 %v4510_v5, %v4476_v60  ;;  %v4556_v52 = vmul.f32 %v3685_v45, %v3685_v45  ;;  %vm8672_vm7 = vcmp.lt.s32.totalorder %v4337_v21, 16 }
 0x22e   : > { %v4624_v58 = vadd.f32 %v4623_v55, %v4589_v19  ;;  %v3641_v42 = vpop.f32.mrf.mxu0  ;;  %v4591_v40 = vmul.f32 %v9099_v15, %v4555_v62  ;;  %v4478_v16 = vmul.f32 %v8582_v50, %v3685_v45  ;;  %v5088_v14 = vsel %vm8623_vm4, 1.0, %v8916_v8 }
 0x22f   : > { %3724 = vst [vmem:[%s8351_s14 + $0x118] sm:$0xff] %v3688_v37  ;;  %v3686_v41 = vadd.f32 %v3641_v42, %v3373_v13  ;;  %v4512_v25 = vadd.f32 %v4511_v6, %v4477_v12  ;;  %v4558_v20 = vmul.f32 %v8645_v39, %v8645_v39  ;;  %v4592_v22 = vmul.f32 %v8582_v50, %v4556_v52 }
 0x230   : > { %v4625_v33 = vadd.f32 %v4624_v58, %v4590_v34 }
 0x231   : > { %3722 = vst [vmem:[%s8351_s14 + $0x108] sm:$0xff] %v3686_v41  ;;  %v4479_v53 = vmul.f32 %v5087_v2, %v3686_v41  ;;  %v4557_v47 = vmul.f32 %v3686_v41, %v3686_v41  ;;  %v4513_v10 = vadd.f32 %v4512_v25, %v4478_v16 }
 0x232   : > { %v4626_v29 = vadd.f32 %v4625_v33, %v4591_v40 }
 0x233   : > { %5838 = shalt.err (!%p5835_p5)
}
 0x234   : > { %s5839_s11 = scalar_lea.hbm %s8679_s5, 4608  ;;  %s5843_s24 = scalar_lea.hbm %s8813_s2, 9216 }
 0x235   : > { %p5840_p6 = scmp.ne.s32.totalorder %s8679_s5, %s5839_s11  ;;  %p5844_p10 = scmp.lt.s32.totalorder %s8679_s5, %s8813_s2 }
 0x236   : > { %p5845_p11 = scmp.lt.s32.totalorder %s5843_s24, %s5839_s11 }
 0x237   : > { %p5841_p7 = pnand %p5840_p6, %p6032_p4 }
 0x238   : > { %p5846_p12 = por %p5845_p11, %p5844_p10 }
 0x239   : > { %p5842_p9 = pneg %p5841_p7 }
 0x23b   : > { %p5847_p13 = pnand %p5846_p12, %p5842_p9 }
 0x23d   : > { %5850 = shalt.err (!%p5847_p13)
}
 0x23e   : > { %s5961_s7 = smov 128   ;;  %s5962_s8 = smov 8   ;;  %v5089_v50 = vsel %vm8672_vm7, 1.0, %v8916_v8  ;;  %v4593_v7 = vmul.f32 %v5087_v2, %v4557_v47  ;;  %v4480_v23 = vmul.f32 %v5088_v14, %v8645_v39  ;;  %v4627_v46 = vadd.f32 %v4626_v29, %v4592_v22 }
 0x23f   : > { %5695 = dma.vmem_to_hbm [thread:$0]  (%p6032_p4), %s8669_s26, 4608, %s8679_s5, %s4639_s6, %s5961_s7, %s5961_s7, %s5962_s8   ;;  %v4559_v35 = vmul.f32 %v3688_v37, %v3688_v37  ;;  %v4514_v54 = vadd.f32 %v4513_v10, %v4479_v53  ;;  %v4594_v30 = vmul.f32 %v5088_v14, %v4558_v20  ;;  %v4481_v0 = vmul.f32 %v5089_v50, %v3688_v37 }
 0x240   : > { %v4628_v38 = vadd.f32 %v4627_v46, %v4593_v7  ;;  %s8719_s26 = sand.u32 1, %s4824_s21   ;;  %s5091_s5 = sshll.u32 %s5949_s18, 4 }
 0x241   : > { %v4515_v1 = vadd.f32 %v4514_v54, %v4480_v23  ;;  %v4595_v3 = vmul.f32 %v5089_v50, %v4559_v35  ;;  %s228_s6 = scalar_lea.vmem [#allocation4], %s8221_s12  ;;  %s234_s10 = scalar_lea.vmem [#allocation6], %s8221_s12 }
 0x242   : > { %v4629_v57 = vadd.f32 %v4628_v38, %v4594_v30  ;;  %s4678_s9 = sshll.u32 %s228_s6, 4  ;;  %s4692_s11 = sshll.u32 %s234_s10, 4  ;;  %s8731_s9 = int_to_ptr.vmem [resolvable:$true] %s4678_s9  ;;  %s8738_s11 = int_to_ptr.vmem [resolvable:$true] %s4692_s11 }
 0x243   : > { %v4516_v18 = vadd.f32 %v4515_v1, %v4481_v0  ;;  %s8729_s24 = scalar_lea.hbm %s8814_s3, %s5091_s5  ;;  %s8736_s29 = scalar_lea.hbm %s8815_s4, %s5091_s5 }
 0x244   : > { %v4630_v48 = vadd.f32 %v4629_v57, %v4595_v3  ;;  %s4644_s30 = scalar_lea.sflag [#allocation5], %s8719_s26  ;;  %s5851_s7 = scalar_lea.vmem %s8731_s9, 16 }
 0x245   : > { %v4517_v8 = vrot.slane %v4516_v18, 4  ;;  %p5852_p0 = scmp.ne.s32.totalorder %s8731_s9, %s5851_s7  ;;  %s5963_s8 = smov [#allocation4]  }
 0x246   : > { %v4631_v24 = vrot.slane %v4630_v48, 4  ;;  %s5855_s13 = sshll.u32 %s5963_s8, 4  ;;  %s5856_s13 = int_to_ptr.vmem [resolvable:$false] %s5855_s13 }
 0x247   : > { %v4518_v31 = vadd.f32 %v4517_v8, %v4516_v18  ;;  %p5853_p1 = pnand %p5852_p0, %p6032_p4  ;;  %s5857_s14 = scalar_lea.vmem %s5856_s13, 32 }
 0x248   : > { %v4632_v27 = vadd.f32 %v4631_v24, %v4630_v48  ;;  %p5858_p3 = scmp.lt.s32.totalorder %s8731_s9, %s5856_s13  ;;  %p5859_p5 = scmp.lt.s32.totalorder %s5857_s14, %s5851_s7 }
 0x249   : > { %v4519_v63 = vrot.slane %v4518_v31, 2  ;;  %p5854_p2 = pneg %p5853_p1 }
 0x24a   : > { %v4633_v49 = vrot.slane %v4632_v27, 2  ;;  %p5860_p6 = por %p5859_p5, %p5858_p3 }
 0x24b   : > { %v4520_v61 = vadd.f32 %v4519_v63, %v4518_v31 }
 0x24c   : > { %v4634_v39 = vadd.f32 %v4633_v49, %v4632_v27  ;;  %p5861_p7 = pnand %p5860_p6, %p5854_p2 }
 0x24d   : > { %v4521_v4 = vrot.slane %v4520_v61, 1 }
 0x24e   : > { %v4635_v32 = vrot.slane %v4634_v39, 1 }
 0x24f   : > { %v4522_v44 = vadd.f32 %v4521_v4, %v4520_v61 }
 0x250   : > { %v4636_v9 = vadd.f32 %v4635_v32, %v4634_v39 }
 0x251   : > { %4523 = vst [vmem:[%s228_s6] sm:$0x1] %v4522_v44 }
 0x252   : > { %5864 = shalt.err (!%p5861_p7)
}
 0x253   : > { %s5865_s5 = scalar_lea.hbm %s8729_s24, 16  ;;  %s5869_s21 = scalar_lea.hbm %s8814_s3, 32 }
 0x254   : > { %p5866_p9 = scmp.ne.s32.totalorder %s8729_s24, %s5865_s5  ;;  %p5870_p12 = scmp.lt.s32.totalorder %s8729_s24, %s8814_s3 }
 0x255   : > { %p5871_p13 = scmp.lt.s32.totalorder %s5869_s21, %s5865_s5 }
 0x256   : > { %p5867_p10 = pnand %p5866_p9, %p6032_p4 }
 0x257   : > { %p5872_p0 = por %p5871_p13, %p5870_p12 }
 0x258   : > { %p5868_p11 = pneg %p5867_p10 }
 0x25a   : > { %p5873_p1 = pnand %p5872_p0, %p5868_p11 }
 0x25c   : > { %5876 = shalt.err (!%p5873_p1)
}
 0x25d   : > { %5696 = dma.vmem_to_hbm [thread:$0]  (%p6032_p4), %s8731_s9, 16, %s8729_s24, %s4644_s30   ;;  %4637 = vst [vmem:[%s234_s10] sm:$0x1] %v4636_v9 }
 0x25e   : > { %s5877_s22 = scalar_lea.vmem %s8738_s11, 16  ;;  %s5964_s7 = smov [#allocation6]  }
 0x25f   : > { %p5878_p2 = scmp.ne.s32.totalorder %s8738_s11, %s5877_s22  ;;  %s5881_s13 = sshll.u32 %s5964_s7, 4  ;;  %s5882_s13 = int_to_ptr.vmem [resolvable:$false] %s5881_s13 }
 0x260   : > { %s5883_s14 = scalar_lea.vmem %s5882_s13, 32  ;;  %p5884_p6 = scmp.lt.s32.totalorder %s8738_s11, %s5882_s13 }
 0x261   : > { %p5879_p3 = pnand %p5878_p2, %p6032_p4  ;;  %p5885_p7 = scmp.lt.s32.totalorder %s5883_s14, %s5877_s22 }
 0x263   : > { %p5880_p5 = pneg %p5879_p3  ;;  %p5886_p9 = por %p5885_p7, %p5884_p6 }
 0x265   : > { %p5887_p10 = pnand %p5886_p9, %p5880_p5 }
 0x267   : > { %5890 = shalt.err (!%p5887_p10)
}
 0x268   : > { %s5891_s12 = scalar_lea.hbm %s8736_s29, 16  ;;  %s5895_s24 = scalar_lea.hbm %s8815_s4, 32 }
 0x269   : > { %p5892_p11 = scmp.ne.s32.totalorder %s8736_s29, %s5891_s12  ;;  %p5896_p0 = scmp.lt.s32.totalorder %s8736_s29, %s8815_s4 }
 0x26a   : > { %p5897_p1 = scmp.lt.s32.totalorder %s5895_s24, %s5891_s12 }
 0x26b   : > { %p5893_p12 = pnand %p5892_p11, %p6032_p4 }
 0x26c   : > { %p5898_p2 = por %p5897_p1, %p5896_p0 }
 0x26d   : > { %p5894_p13 = pneg %p5893_p12 }
 0x26f   : > { %p5899_p3 = pnand %p5898_p2, %p5894_p13 }
 0x271   : > { %5902 = shalt.err (!%p5899_p3)
}
 0x272   : > { %5697 = dma.vmem_to_hbm [thread:$0]  (%p6032_p4), %s8738_s11, 16, %s8736_s29, %s4644_s30  }
 0x273 PF: > { %p5711_p5 = scmp.ge.s32.totalorder %s5957_s20, 2  ;;  %s4704_s18 = sand.u32 1, %s5937_s15  }
 0x274   : > { %s4705_s21 = scalar_lea.sflag [#allocation3], %s4704_s18 }
 0x275   : > { %p5702_p6 = pnand %p5711_p5, %p6041_p8 }
 0x277   : > { %p5703_p7 = pneg %p5702_p6 }
 0x279   : > { %5928 = dma.done.wait (%p5703_p7), %s4705_s21, 4608  }
 0x27a   : > { %5930 = vsyncadd (%p5703_p7), %s4705_s21, 4294962688  ;;  %s9102_s8 = sadd.s32 4294967294, %s5957_s20  }
 0x27b   : > { %s4713_s25 = sand.u32 1, %s9102_s8  }
 0x27c   : > { %s4714_s22 = scalar_lea.sflag [#allocation5], %s4713_s25 }
 0x27d   : > { %5932 = dma.done.wait (%p5703_p7), %s4714_s22, 32  }
 0x27e   : > { %5934 = vsyncadd (%p5703_p7), %s4714_s22, 4294967264  ;;  %s21_s20 = sadd.s32 1, %s5957_s20   ;;  %s9103_s15 = smov %s5941_s16 }
 0x27f   : > { %p18_p4 = scmp.ge.s32.totalorder %s21_s20, 4   ;;  %s9104_s16 = smov %s5945_s17 }
 0x280   : > { %s9105_s17 = smov %s6047_s28  ;;  %s9106_s18 = smov %s5953_s19 }
 0x281   : > { %s9107_s19 = smov %s9109_s23  ;;  %20 = sbr.rel (!%p18_p4) target bundleno = 6 (0x6), region = 95 }
 0x286   :  { %4726 = vsyncpa [#allocation3], 1 }
 0x287   :  { %4728 = vsyncpa [#allocation3 + $0x1], 1 }
 0x288   :  { %4729 = vsyncpa [#allocation5], 1 }
 0x289   :  { %4731 = vsyncpa [#allocation5 + $0x1], 1 }

</bundles_post_ra>
